<compile_context>
chip_gen: v6e
topology: v6e:2x2x1
jax: 0.10.0
libtpu: 0.0.40
codegen_flags: <defaults>
</compile_context>

<pallas_src>
import functools

import jax
import jax.numpy as jnp
from jax.experimental import pallas as pl
from jax.experimental.pallas import tpu as pltpu


def anchornet_kernel(
    x_ref, y_ref,                       # (B,L) inputs, (B,L) folded mask pre-BN act
    c1w_ref, c2w_ref, c3w_ref,          # conv weights, flat (out,in,k) rows in SMEM
    wf_ref, bf_ref,                     # final Linear(4L, L): (4L,L), (1,L)
    out_ref, mask_ref,                  # outputs: (B,L), (B,L)
):
    f32 = jnp.float32
    eps = 1e-5
    x = x_ref[...]
    B, L = x.shape

    # ---------------- mask branch ----------------
    # y_ref already holds (embed_class o Linear^3)(labels); the Linear biases
    # are per-feature constants exactly cancelled by the batch-mean
    # subtraction below, so they never enter the kernel.
    y = y_ref[...]
    inv_b = 1.0 / float(B)
    s = jnp.sum(y, axis=0, keepdims=True)            # (1, L)
    ss = jnp.sum(y * y, axis=0, keepdims=True)       # (1, L), independent reduce
    mu = s * inv_b
    var = jnp.maximum(ss * inv_b - mu * mu, 0.0)     # one-pass biased variance
    h = (y - mu) * jax.lax.rsqrt(var + eps)          # BatchNorm1d(L), train mode
    h = pl.reciprocal(1.0 + jnp.exp(-h), approx=True)        # Sigmoid (EUP)
    h = h - 0.5                                      # Lambda(x - 0.5)
    h = h * pl.reciprocal(1.0 + jnp.abs(h), approx=True)     # Softsign (EUP)
    mask = jnp.maximum(h, 0.0)                       # ReLU
    mask_ref[...] = mask

    # ---------------- CNN branch ----------------
    mx = x * mask                                    # masked input, 1 conv channel

    col = jax.lax.broadcasted_iota(jnp.int32, (B, L), 1)

    def shift_left(a):   # result[l] = a[l+1], zero at the right edge
        return jnp.where(col < L - 1, pltpu.roll(a, shift=L - 1, axis=1), 0.0)

    def shift_right(a):  # result[l] = a[l-1], zero at the left edge
        return jnp.where(col > 0, pltpu.roll(a, shift=1, axis=1), 0.0)

    inv_n = 1.0 / float(B * L)

    def conv_bn_lrelu(chans, w_ref, c_in, c_out):
        # Conv1d(c_in, c_out, 3, 1, 1) + BatchNorm1d(c_out) + LeakyReLU(0.01).
        # Input channels outermost: only the current channel's 3 taps are
        # live, keeping vreg pressure low; conv bias is BN-cancelled.
        accs = [None] * c_out
        for ci in range(c_in):
            c = chans[ci]
            xr, xc, xl = shift_right(c), c, shift_left(c)
            for o in range(c_out):
                base = (o * c_in + ci) * 3
                t = (w_ref[base + 0] * xr
                     + w_ref[base + 1] * xc
                     + w_ref[base + 2] * xl)
                accs[o] = t if accs[o] is None else accs[o] + t
        outs = []
        for o in range(c_out):
            a = accs[o]
            # One-pass per-channel stats over (B, L) (both reductions issued
            # before either is consumed).
            s_c = jnp.sum(a)
            ss_c = jnp.sum(a * a)
            mu_c = s_c * inv_n
            var_c = jnp.maximum(ss_c * inv_n - mu_c * mu_c, 0.0)
            a = (a - mu_c) * jax.lax.rsqrt(var_c + eps)
            outs.append(jnp.where(a > 0, a, 0.01 * a))   # LeakyReLU(0.01)
        return outs

    c1 = conv_bn_lrelu([mx], c1w_ref, 1, 4)
    c2 = conv_bn_lrelu(c1, c2w_ref, 4, 8)
    c3 = conv_bn_lrelu(c2, c3w_ref, 8, 4)

    # View(-1): channel-major flatten (B, 4, L) -> (B, 4L), then Linear(4L, L)
    # as a single MXU matmul with K = 4L (lane-aligned 128-wide pieces).
    flat = jnp.concatenate(c3, axis=1)               # (B, 4L)
    z = jnp.dot(flat, wf_ref[...], preferred_element_type=f32) + bf_ref[...]

    out_ref[...] = mask * z + (1.0 - mask) * x


def init_params(key, latent_size, num_classes):
    def uni(k, shape):
        return jax.random.uniform(k, shape, jnp.float32, -0.08, 0.08)

    ks = jax.random.split(key, 8)
    L, C = latent_size, num_classes
    # Linear weights stored transposed (in_features, out_features).
    # Biases of layers followed by a training-mode BatchNorm (embed/mask MLP,
    # all Conv1d layers) are omitted: the mean subtraction cancels them
    # exactly, so they cannot affect the forward output.
    p = {
        "we": uni(ks[0], (C, L)),
        "w1": uni(ks[1], (L, L)),
        "w2": uni(ks[2], (L, L)),
        "w3": uni(ks[3], (L, L)),
        # Conv1d weights flattened (out, in, k) row-major for SMEM scalar reads.
        "c1w": uni(ks[4], (4 * 1 * 3,)),
        "c2w": uni(ks[5], (8 * 4 * 3,)),
        "c3w": uni(ks[6], (4 * 8 * 3,)),
        # Final Linear(4L, L), stored transposed as (4L, L); its bias is kept.
        "wf": uni(ks[7], (4 * L, L)),
        "bf": jnp.zeros((1, L), jnp.float32),
    }
    return p


@functools.partial(jax.jit, static_argnames=("num_classes",))
def anchor_net_forward(inputs, labels, params, num_classes):
    del num_classes  # class count is baked into the embedding-table shape
    B, L = inputs.shape

    # Fold embed_class + the three bias-free Linear layers into one (C, L)
    # table and gather the per-sample row here.  Row-gather commutes with the
    # right-multiplications, so this equals the original chain exactly
    # (biases dropped: zero-init and BN-cancelled).
    w_fold = params["we"] @ params["w1"] @ params["w2"] @ params["w3"]
    y = jnp.take(w_fold, labels, axis=0)             # (B, L)

    vmem = pl.BlockSpec(memory_space=pltpu.MemorySpace.VMEM)
    smem = pl.BlockSpec(memory_space=pltpu.MemorySpace.SMEM)

    out, mask = pl.pallas_call(
        anchornet_kernel,
        out_shape=(jax.ShapeDtypeStruct((B, L), jnp.float32),
                   jax.ShapeDtypeStruct((B, L), jnp.float32)),
        in_specs=[vmem, vmem,            # inputs, folded mask-branch activation
                  smem, smem, smem,      # conv weights (scalar reads)
                  vmem, vmem],           # final linear weight / bias
        out_specs=(vmem, vmem),
    )(inputs, y,
      params["c1w"], params["c2w"], params["c3w"],
      params["wf"], params["bf"])
    return out, mask


if __name__ == "__main__":
    B, L, NUM_CLASSES = 8, 128, 16   # batch, latent_size, num_classes

    key = jax.random.PRNGKey(0)
    k_in, k_lab, k_par = jax.random.split(key, 3)

    inputs = jax.random.normal(k_in, (B, L), jnp.float32)
    labels = jax.random.randint(k_lab, (B,), 0, NUM_CLASSES)
    params = init_params(k_par, L, NUM_CLASSES)

    out, mask = anchor_net_forward(inputs, labels, params, NUM_CLASSES)
    jax.block_until_ready((out, mask))

    assert out.shape == (B, L) and mask.shape == (B, L)
    print("KERNEL_OK")
</pallas_src>

<mosaic_0001>
module attributes {stable_mosaic.version = 11 : i64} {
  func.func @anchornet_kernel(%arg0: memref<8x128xf32, #tpu.memory_space<vmem>>, %arg1: memref<8x128xf32, #tpu.memory_space<vmem>>, %arg2: memref<12xf32, #tpu.memory_space<smem>>, %arg3: memref<96xf32, #tpu.memory_space<smem>>, %arg4: memref<96xf32, #tpu.memory_space<smem>>, %arg5: memref<512x128xf32, #tpu.memory_space<vmem>>, %arg6: memref<1x128xf32, #tpu.memory_space<vmem>>, %arg7: memref<8x128xf32, #tpu.memory_space<vmem>>, %arg8: memref<8x128xf32, #tpu.memory_space<vmem>>) attributes {dimension_semantics = [], scalar_prefetch = 0 : i64, scratch_operands = 0 : i64, tpu.core_type = #tpu.core_type<tc>} {
    %c0 = arith.constant 0 : index
    %c0_0 = arith.constant 0 : index
    %0 = vector.load %arg0[%c0, %c0_0] : memref<8x128xf32, #tpu.memory_space<vmem>>, vector<8x128xf32>
    %c0_1 = arith.constant 0 : index
    %c0_2 = arith.constant 0 : index
    %1 = vector.load %arg1[%c0_1, %c0_2] : memref<8x128xf32, #tpu.memory_space<vmem>>, vector<8x128xf32>
    %cst = arith.constant dense<0.000000e+00> : vector<128xf32>
    %2 = vector.multi_reduction <add>, %1, %cst [0] : vector<8x128xf32> to vector<128xf32>
    %3 = vector.shape_cast %2 : vector<128xf32> to vector<1x128xf32>
    %4 = arith.mulf %1, %1 : vector<8x128xf32>
    %cst_3 = arith.constant dense<0.000000e+00> : vector<128xf32>
    %5 = vector.multi_reduction <add>, %4, %cst_3 [0] : vector<8x128xf32> to vector<128xf32>
    %6 = vector.shape_cast %5 : vector<128xf32> to vector<1x128xf32>
    %cst_4 = arith.constant 1.250000e-01 : f32
    %7 = vector.broadcast %cst_4 : f32 to vector<1x128xf32>
    %8 = arith.mulf %3, %7 : vector<1x128xf32>
    %cst_5 = arith.constant 1.250000e-01 : f32
    %9 = vector.broadcast %cst_5 : f32 to vector<1x128xf32>
    %10 = arith.mulf %6, %9 : vector<1x128xf32>
    %11 = arith.mulf %8, %8 : vector<1x128xf32>
    %12 = arith.subf %10, %11 : vector<1x128xf32>
    %cst_6 = arith.constant 0.000000e+00 : f32
    %13 = vector.broadcast %cst_6 : f32 to vector<1x128xf32>
    %14 = arith.maximumf %12, %13 : vector<1x128xf32>
    %15 = vector.broadcast %8 : vector<1x128xf32> to vector<8x128xf32>
    %16 = arith.subf %1, %15 : vector<8x128xf32>
    %cst_7 = arith.constant 9.99999974E-6 : f32
    %17 = vector.broadcast %cst_7 : f32 to vector<1x128xf32>
    %18 = arith.addf %14, %17 : vector<1x128xf32>
    %19 = math.rsqrt %18 : vector<1x128xf32>
    %20 = vector.broadcast %19 : vector<1x128xf32> to vector<8x128xf32>
    %21 = arith.mulf %16, %20 : vector<8x128xf32>
    %cst_8 = arith.constant 0.000000e+00 : f32
    %22 = vector.broadcast %cst_8 : f32 to vector<8x128xf32>
    %23 = arith.subf %22, %21 : vector<8x128xf32>
    %24 = math.exp %23 : vector<8x128xf32>
    %cst_9 = arith.constant 1.000000e+00 : f32
    %25 = vector.broadcast %cst_9 : f32 to vector<8x128xf32>
    %26 = arith.addf %25, %24 : vector<8x128xf32>
    %27 = tpu.reciprocal %26 {approx = true} : vector<8x128xf32> -> vector<8x128xf32>
    %cst_10 = arith.constant 5.000000e-01 : f32
    %28 = vector.broadcast %cst_10 : f32 to vector<8x128xf32>
    %29 = arith.subf %27, %28 : vector<8x128xf32>
    %30 = math.absf %29 : vector<8x128xf32>
    %cst_11 = arith.constant 1.000000e+00 : f32
    %31 = vector.broadcast %cst_11 : f32 to vector<8x128xf32>
    %32 = arith.addf %31, %30 : vector<8x128xf32>
    %33 = tpu.reciprocal %32 {approx = true} : vector<8x128xf32> -> vector<8x128xf32>
    %34 = arith.mulf %29, %33 : vector<8x128xf32>
    %cst_12 = arith.constant 0.000000e+00 : f32
    %35 = vector.broadcast %cst_12 : f32 to vector<8x128xf32>
    %36 = arith.maximumf %34, %35 : vector<8x128xf32>
    %c0_13 = arith.constant 0 : index
    %c0_14 = arith.constant 0 : index
    %37 = vector.load %arg8[%c0_13, %c0_14] : memref<8x128xf32, #tpu.memory_space<vmem>>, vector<8x128xf32>
    tpu.vector_store %arg8[%c0_13, %c0_14], %36 {strides = array<i32>} : memref<8x128xf32, #tpu.memory_space<vmem>>, vector<8x128xf32>,
    %38 = arith.mulf %0, %36 : vector<8x128xf32>
    %39 = tpu.iota {dimensions = array<i32: 1>} : vector<8x128xi32>
    %c0_i32 = arith.constant 0 : i32
    %40 = vector.broadcast %c0_i32 : i32 to vector<8x128xi32>
    %41 = arith.cmpi sgt, %39, %40 : vector<8x128xi32>
    %c1_i32 = arith.constant 1 : i32
    %42 = tpu.dynamic_rotate %38 by %c1_i32 dim 1 : vector<8x128xf32>, i32 -> vector<8x128xf32>
    %cst_15 = arith.constant 0.000000e+00 : f32
    %43 = vector.broadcast %cst_15 : f32 to vector<8x128xf32>
    %44 = arith.select %41, %42, %43 : vector<8x128xi1>, vector<8x128xf32>
    %c127_i32 = arith.constant 127 : i32
    %45 = vector.broadcast %c127_i32 : i32 to vector<8x128xi32>
    %46 = arith.cmpi slt, %39, %45 : vector<8x128xi32>
    %c127_i32_16 = arith.constant 127 : i32
    %47 = tpu.dynamic_rotate %38 by %c127_i32_16 dim 1 : vector<8x128xf32>, i32 -> vector<8x128xf32>
    %cst_17 = arith.constant 0.000000e+00 : f32
    %48 = vector.broadcast %cst_17 : f32 to vector<8x128xf32>
    %49 = arith.select %46, %47, %48 : vector<8x128xi1>, vector<8x128xf32>
    %c0_18 = arith.constant 0 : index
    %50 = memref.load %arg2[%c0_18] : memref<12xf32, #tpu.memory_space<smem>>
    %51 = vector.broadcast %50 : f32 to vector<8x128xf32>
    %52 = arith.mulf %51, %44 : vector<8x128xf32>
    %c1 = arith.constant 1 : index
    %53 = memref.load %arg2[%c1] : memref<12xf32, #tpu.memory_space<smem>>
    %54 = vector.broadcast %53 : f32 to vector<8x128xf32>
    %55 = arith.mulf %54, %38 : vector<8x128xf32>
    %56 = arith.addf %52, %55 : vector<8x128xf32>
    %c2 = arith.constant 2 : index
    %57 = memref.load %arg2[%c2] : memref<12xf32, #tpu.memory_space<smem>>
    %58 = vector.broadcast %57 : f32 to vector<8x128xf32>
    %59 = arith.mulf %58, %49 : vector<8x128xf32>
    %60 = arith.addf %56, %59 : vector<8x128xf32>
    %c3 = arith.constant 3 : index
    %61 = memref.load %arg2[%c3] : memref<12xf32, #tpu.memory_space<smem>>
    %62 = vector.broadcast %61 : f32 to vector<8x128xf32>
    %63 = arith.mulf %62, %44 : vector<8x128xf32>
    %c4 = arith.constant 4 : index
    %64 = memref.load %arg2[%c4] : memref<12xf32, #tpu.memory_space<smem>>
    %65 = vector.broadcast %64 : f32 to vector<8x128xf32>
    %66 = arith.mulf %65, %38 : vector<8x128xf32>
    %67 = arith.addf %63, %66 : vector<8x128xf32>
    %c5 = arith.constant 5 : index
    %68 = memref.load %arg2[%c5] : memref<12xf32, #tpu.memory_space<smem>>
    %69 = vector.broadcast %68 : f32 to vector<8x128xf32>
    %70 = arith.mulf %69, %49 : vector<8x128xf32>
    %71 = arith.addf %67, %70 : vector<8x128xf32>
    %c6 = arith.constant 6 : index
    %72 = memref.load %arg2[%c6] : memref<12xf32, #tpu.memory_space<smem>>
    %73 = vector.broadcast %72 : f32 to vector<8x128xf32>
    %74 = arith.mulf %73, %44 : vector<8x128xf32>
    %c7 = arith.constant 7 : index
    %75 = memref.load %arg2[%c7] : memref<12xf32, #tpu.memory_space<smem>>
    %76 = vector.broadcast %75 : f32 to vector<8x128xf32>
    %77 = arith.mulf %76, %38 : vector<8x128xf32>
    %78 = arith.addf %74, %77 : vector<8x128xf32>
    %c8 = arith.constant 8 : index
    %79 = memref.load %arg2[%c8] : memref<12xf32, #tpu.memory_space<smem>>
    %80 = vector.broadcast %79 : f32 to vector<8x128xf32>
    %81 = arith.mulf %80, %49 : vector<8x128xf32>
    %82 = arith.addf %78, %81 : vector<8x128xf32>
    %c9 = arith.constant 9 : index
    %83 = memref.load %arg2[%c9] : memref<12xf32, #tpu.memory_space<smem>>
    %84 = vector.broadcast %83 : f32 to vector<8x128xf32>
    %85 = arith.mulf %84, %44 : vector<8x128xf32>
    %c10 = arith.constant 10 : index
    %86 = memref.load %arg2[%c10] : memref<12xf32, #tpu.memory_space<smem>>
    %87 = vector.broadcast %86 : f32 to vector<8x128xf32>
    %88 = arith.mulf %87, %38 : vector<8x128xf32>
    %89 = arith.addf %85, %88 : vector<8x128xf32>
    %c11 = arith.constant 11 : index
    %90 = memref.load %arg2[%c11] : memref<12xf32, #tpu.memory_space<smem>>
    %91 = vector.broadcast %90 : f32 to vector<8x128xf32>
    %92 = arith.mulf %91, %49 : vector<8x128xf32>
    %93 = arith.addf %89, %92 : vector<8x128xf32>
    %94 = vector.shape_cast %60 : vector<8x128xf32> to vector<1x8x128xf32>
    %cst_19 = arith.constant dense<0.000000e+00> : vector<1xf32>
    %95 = vector.multi_reduction <add>, %94, %cst_19 [1, 2] : vector<1x8x128xf32> to vector<1xf32>
    %96 = vector.shape_cast %95 : vector<1xf32> to vector<1x1x1xf32>
    %97 = vector.extract %96[0, 0, 0] : f32 from vector<1x1x1xf32>
    %98 = arith.mulf %60, %60 : vector<8x128xf32>
    %99 = vector.shape_cast %98 : vector<8x128xf32> to vector<1x8x128xf32>
    %cst_20 = arith.constant dense<0.000000e+00> : vector<1xf32>
    %100 = vector.multi_reduction <add>, %99, %cst_20 [1, 2] : vector<1x8x128xf32> to vector<1xf32>
    %101 = vector.shape_cast %100 : vector<1xf32> to vector<1x1x1xf32>
    %102 = vector.extract %101[0, 0, 0] : f32 from vector<1x1x1xf32>
    %cst_21 = arith.constant 9.765625E-4 : f32
    %103 = arith.mulf %97, %cst_21 : f32
    %cst_22 = arith.constant 9.765625E-4 : f32
    %104 = arith.mulf %102, %cst_22 : f32
    %105 = arith.mulf %103, %103 : f32
    %106 = arith.subf %104, %105 : f32
    %cst_23 = arith.constant 0.000000e+00 : f32
    %107 = arith.maximumf %106, %cst_23 : f32
    %108 = vector.broadcast %103 : f32 to vector<8x128xf32>
    %109 = arith.subf %60, %108 : vector<8x128xf32>
    %cst_24 = arith.constant 9.99999974E-6 : f32
    %110 = arith.addf %107, %cst_24 : f32
    %111 = math.rsqrt %110 : f32
    %112 = vector.broadcast %111 : f32 to vector<8x128xf32>
    %113 = arith.mulf %109, %112 : vector<8x128xf32>
    %cst_25 = arith.constant 0.000000e+00 : f32
    %114 = vector.broadcast %cst_25 : f32 to vector<8x128xf32>
    %115 = arith.cmpf ogt, %113, %114 : vector<8x128xf32>
    %cst_26 = arith.constant 0.00999999977 : f32
    %116 = vector.broadcast %cst_26 : f32 to vector<8x128xf32>
    %117 = arith.mulf %116, %113 : vector<8x128xf32>
    %118 = arith.select %115, %113, %117 : vector<8x128xi1>, vector<8x128xf32>
    %119 = vector.shape_cast %71 : vector<8x128xf32> to vector<1x8x128xf32>
    %cst_27 = arith.constant dense<0.000000e+00> : vector<1xf32>
    %120 = vector.multi_reduction <add>, %119, %cst_27 [1, 2] : vector<1x8x128xf32> to vector<1xf32>
    %121 = vector.shape_cast %120 : vector<1xf32> to vector<1x1x1xf32>
    %122 = vector.extract %121[0, 0, 0] : f32 from vector<1x1x1xf32>
    %123 = arith.mulf %71, %71 : vector<8x128xf32>
    %124 = vector.shape_cast %123 : vector<8x128xf32> to vector<1x8x128xf32>
    %cst_28 = arith.constant dense<0.000000e+00> : vector<1xf32>
    %125 = vector.multi_reduction <add>, %124, %cst_28 [1, 2] : vector<1x8x128xf32> to vector<1xf32>
    %126 = vector.shape_cast %125 : vector<1xf32> to vector<1x1x1xf32>
    %127 = vector.extract %126[0, 0, 0] : f32 from vector<1x1x1xf32>
    %cst_29 = arith.constant 9.765625E-4 : f32
    %128 = arith.mulf %122, %cst_29 : f32
    %cst_30 = arith.constant 9.765625E-4 : f32
    %129 = arith.mulf %127, %cst_30 : f32
    %130 = arith.mulf %128, %128 : f32
    %131 = arith.subf %129, %130 : f32
    %cst_31 = arith.constant 0.000000e+00 : f32
    %132 = arith.maximumf %131, %cst_31 : f32
    %133 = vector.broadcast %128 : f32 to vector<8x128xf32>
    %134 = arith.subf %71, %133 : vector<8x128xf32>
    %cst_32 = arith.constant 9.99999974E-6 : f32
    %135 = arith.addf %132, %cst_32 : f32
    %136 = math.rsqrt %135 : f32
    %137 = vector.broadcast %136 : f32 to vector<8x128xf32>
    %138 = arith.mulf %134, %137 : vector<8x128xf32>
    %cst_33 = arith.constant 0.000000e+00 : f32
    %139 = vector.broadcast %cst_33 : f32 to vector<8x128xf32>
    %140 = arith.cmpf ogt, %138, %139 : vector<8x128xf32>
    %cst_34 = arith.constant 0.00999999977 : f32
    %141 = vector.broadcast %cst_34 : f32 to vector<8x128xf32>
    %142 = arith.mulf %141, %138 : vector<8x128xf32>
    %143 = arith.select %140, %138, %142 : vector<8x128xi1>, vector<8x128xf32>
    %144 = vector.shape_cast %82 : vector<8x128xf32> to vector<1x8x128xf32>
    %cst_35 = arith.constant dense<0.000000e+00> : vector<1xf32>
    %145 = vector.multi_reduction <add>, %144, %cst_35 [1, 2] : vector<1x8x128xf32> to vector<1xf32>
    %146 = vector.shape_cast %145 : vector<1xf32> to vector<1x1x1xf32>
    %147 = vector.extract %146[0, 0, 0] : f32 from vector<1x1x1xf32>
    %148 = arith.mulf %82, %82 : vector<8x128xf32>
    %149 = vector.shape_cast %148 : vector<8x128xf32> to vector<1x8x128xf32>
    %cst_36 = arith.constant dense<0.000000e+00> : vector<1xf32>
    %150 = vector.multi_reduction <add>, %149, %cst_36 [1, 2] : vector<1x8x128xf32> to vector<1xf32>
    %151 = vector.shape_cast %150 : vector<1xf32> to vector<1x1x1xf32>
    %152 = vector.extract %151[0, 0, 0] : f32 from vector<1x1x1xf32>
    %cst_37 = arith.constant 9.765625E-4 : f32
    %153 = arith.mulf %147, %cst_37 : f32
    %cst_38 = arith.constant 9.765625E-4 : f32
    %154 = arith.mulf %152, %cst_38 : f32
    %155 = arith.mulf %153, %153 : f32
    %156 = arith.subf %154, %155 : f32
    %cst_39 = arith.constant 0.000000e+00 : f32
    %157 = arith.maximumf %156, %cst_39 : f32
    %158 = vector.broadcast %153 : f32 to vector<8x128xf32>
    %159 = arith.subf %82, %158 : vector<8x128xf32>
    %cst_40 = arith.constant 9.99999974E-6 : f32
    %160 = arith.addf %157, %cst_40 : f32
    %161 = math.rsqrt %160 : f32
    %162 = vector.broadcast %161 : f32 to vector<8x128xf32>
    %163 = arith.mulf %159, %162 : vector<8x128xf32>
    %cst_41 = arith.constant 0.000000e+00 : f32
    %164 = vector.broadcast %cst_41 : f32 to vector<8x128xf32>
    %165 = arith.cmpf ogt, %163, %164 : vector<8x128xf32>
    %cst_42 = arith.constant 0.00999999977 : f32
    %166 = vector.broadcast %cst_42 : f32 to vector<8x128xf32>
    %167 = arith.mulf %166, %163 : vector<8x128xf32>
    %168 = arith.select %165, %163, %167 : vector<8x128xi1>, vector<8x128xf32>
    %169 = vector.shape_cast %93 : vector<8x128xf32> to vector<1x8x128xf32>
    %cst_43 = arith.constant dense<0.000000e+00> : vector<1xf32>
    %170 = vector.multi_reduction <add>, %169, %cst_43 [1, 2] : vector<1x8x128xf32> to vector<1xf32>
    %171 = vector.shape_cast %170 : vector<1xf32> to vector<1x1x1xf32>
    %172 = vector.extract %171[0, 0, 0] : f32 from vector<1x1x1xf32>
    %173 = arith.mulf %93, %93 : vector<8x128xf32>
    %174 = vector.shape_cast %173 : vector<8x128xf32> to vector<1x8x128xf32>
    %cst_44 = arith.constant dense<0.000000e+00> : vector<1xf32>
    %175 = vector.multi_reduction <add>, %174, %cst_44 [1, 2] : vector<1x8x128xf32> to vector<1xf32>
    %176 = vector.shape_cast %175 : vector<1xf32> to vector<1x1x1xf32>
    %177 = vector.extract %176[0, 0, 0] : f32 from vector<1x1x1xf32>
    %cst_45 = arith.constant 9.765625E-4 : f32
    %178 = arith.mulf %172, %cst_45 : f32
    %cst_46 = arith.constant 9.765625E-4 : f32
    %179 = arith.mulf %177, %cst_46 : f32
    %180 = arith.mulf %178, %178 : f32
    %181 = arith.subf %179, %180 : f32
    %cst_47 = arith.constant 0.000000e+00 : f32
    %182 = arith.maximumf %181, %cst_47 : f32
    %183 = vector.broadcast %178 : f32 to vector<8x128xf32>
    %184 = arith.subf %93, %183 : vector<8x128xf32>
    %cst_48 = arith.constant 9.99999974E-6 : f32
    %185 = arith.addf %182, %cst_48 : f32
    %186 = math.rsqrt %185 : f32
    %187 = vector.broadcast %186 : f32 to vector<8x128xf32>
    %188 = arith.mulf %184, %187 : vector<8x128xf32>
    %cst_49 = arith.constant 0.000000e+00 : f32
    %189 = vector.broadcast %cst_49 : f32 to vector<8x128xf32>
    %190 = arith.cmpf ogt, %188, %189 : vector<8x128xf32>
    %cst_50 = arith.constant 0.00999999977 : f32
    %191 = vector.broadcast %cst_50 : f32 to vector<8x128xf32>
    %192 = arith.mulf %191, %188 : vector<8x128xf32>
    %193 = arith.select %190, %188, %192 : vector<8x128xi1>, vector<8x128xf32>
    %c0_i32_51 = arith.constant 0 : i32
    %194 = vector.broadcast %c0_i32_51 : i32 to vector<8x128xi32>
    %195 = arith.cmpi sgt, %39, %194 : vector<8x128xi32>
    %c1_i32_52 = arith.constant 1 : i32
    %196 = tpu.dynamic_rotate %118 by %c1_i32_52 dim 1 : vector<8x128xf32>, i32 -> vector<8x128xf32>
    %cst_53 = arith.constant 0.000000e+00 : f32
    %197 = vector.broadcast %cst_53 : f32 to vector<8x128xf32>
    %198 = arith.select %195, %196, %197 : vector<8x128xi1>, vector<8x128xf32>
    %c127_i32_54 = arith.constant 127 : i32
    %199 = vector.broadcast %c127_i32_54 : i32 to vector<8x128xi32>
    %200 = arith.cmpi slt, %39, %199 : vector<8x128xi32>
    %c127_i32_55 = arith.constant 127 : i32
    %201 = tpu.dynamic_rotate %118 by %c127_i32_55 dim 1 : vector<8x128xf32>, i32 -> vector<8x128xf32>
    %cst_56 = arith.constant 0.000000e+00 : f32
    %202 = vector.broadcast %cst_56 : f32 to vector<8x128xf32>
    %203 = arith.select %200, %201, %202 : vector<8x128xi1>, vector<8x128xf32>
    %c0_57 = arith.constant 0 : index
    %204 = memref.load %arg3[%c0_57] : memref<96xf32, #tpu.memory_space<smem>>
    %205 = vector.broadcast %204 : f32 to vector<8x128xf32>
    %206 = arith.mulf %205, %198 : vector<8x128xf32>
    %c1_58 = arith.constant 1 : index
    %207 = memref.load %arg3[%c1_58] : memref<96xf32, #tpu.memory_space<smem>>
    %208 = vector.broadcast %207 : f32 to vector<8x128xf32>
    %209 = arith.mulf %208, %118 : vector<8x128xf32>
    %210 = arith.addf %206, %209 : vector<8x128xf32>
    %c2_59 = arith.constant 2 : index
    %211 = memref.load %arg3[%c2_59] : memref<96xf32, #tpu.memory_space<smem>>
    %212 = vector.broadcast %211 : f32 to vector<8x128xf32>
    %213 = arith.mulf %212, %203 : vector<8x128xf32>
    %214 = arith.addf %210, %213 : vector<8x128xf32>
    %c12 = arith.constant 12 : index
    %215 = memref.load %arg3[%c12] : memref<96xf32, #tpu.memory_space<smem>>
    %216 = vector.broadcast %215 : f32 to vector<8x128xf32>
    %217 = arith.mulf %216, %198 : vector<8x128xf32>
    %c13 = arith.constant 13 : index
    %218 = memref.load %arg3[%c13] : memref<96xf32, #tpu.memory_space<smem>>
    %219 = vector.broadcast %218 : f32 to vector<8x128xf32>
    %220 = arith.mulf %219, %118 : vector<8x128xf32>
    %221 = arith.addf %217, %220 : vector<8x128xf32>
    %c14 = arith.constant 14 : index
    %222 = memref.load %arg3[%c14] : memref<96xf32, #tpu.memory_space<smem>>
    %223 = vector.broadcast %222 : f32 to vector<8x128xf32>
    %224 = arith.mulf %223, %203 : vector<8x128xf32>
    %225 = arith.addf %221, %224 : vector<8x128xf32>
    %c24 = arith.constant 24 : index
    %226 = memref.load %arg3[%c24] : memref<96xf32, #tpu.memory_space<smem>>
    %227 = vector.broadcast %226 : f32 to vector<8x128xf32>
    %228 = arith.mulf %227, %198 : vector<8x128xf32>
    %c25 = arith.constant 25 : index
    %229 = memref.load %arg3[%c25] : memref<96xf32, #tpu.memory_space<smem>>
    %230 = vector.broadcast %229 : f32 to vector<8x128xf32>
    %231 = arith.mulf %230, %118 : vector<8x128xf32>
    %232 = arith.addf %228, %231 : vector<8x128xf32>
    %c26 = arith.constant 26 : index
    %233 = memref.load %arg3[%c26] : memref<96xf32, #tpu.memory_space<smem>>
    %234 = vector.broadcast %233 : f32 to vector<8x128xf32>
    %235 = arith.mulf %234, %203 : vector<8x128xf32>
    %236 = arith.addf %232, %235 : vector<8x128xf32>
    %c36 = arith.constant 36 : index
    %237 = memref.load %arg3[%c36] : memref<96xf32, #tpu.memory_space<smem>>
    %238 = vector.broadcast %237 : f32 to vector<8x128xf32>
    %239 = arith.mulf %238, %198 : vector<8x128xf32>
    %c37 = arith.constant 37 : index
    %240 = memref.load %arg3[%c37] : memref<96xf32, #tpu.memory_space<smem>>
    %241 = vector.broadcast %240 : f32 to vector<8x128xf32>
    %242 = arith.mulf %241, %118 : vector<8x128xf32>
    %243 = arith.addf %239, %242 : vector<8x128xf32>
    %c38 = arith.constant 38 : index
    %244 = memref.load %arg3[%c38] : memref<96xf32, #tpu.memory_space<smem>>
    %245 = vector.broadcast %244 : f32 to vector<8x128xf32>
    %246 = arith.mulf %245, %203 : vector<8x128xf32>
    %247 = arith.addf %243, %246 : vector<8x128xf32>
    %c48 = arith.constant 48 : index
    %248 = memref.load %arg3[%c48] : memref<96xf32, #tpu.memory_space<smem>>
    %249 = vector.broadcast %248 : f32 to vector<8x128xf32>
    %250 = arith.mulf %249, %198 : vector<8x128xf32>
    %c49 = arith.constant 49 : index
    %251 = memref.load %arg3[%c49] : memref<96xf32, #tpu.memory_space<smem>>
    %252 = vector.broadcast %251 : f32 to vector<8x128xf32>
    %253 = arith.mulf %252, %118 : vector<8x128xf32>
    %254 = arith.addf %250, %253 : vector<8x128xf32>
    %c50 = arith.constant 50 : index
    %255 = memref.load %arg3[%c50] : memref<96xf32, #tpu.memory_space<smem>>
    %256 = vector.broadcast %255 : f32 to vector<8x128xf32>
    %257 = arith.mulf %256, %203 : vector<8x128xf32>
    %258 = arith.addf %254, %257 : vector<8x128xf32>
    %c60 = arith.constant 60 : index
    %259 = memref.load %arg3[%c60] : memref<96xf32, #tpu.memory_space<smem>>
    %260 = vector.broadcast %259 : f32 to vector<8x128xf32>
    %261 = arith.mulf %260, %198 : vector<8x128xf32>
    %c61 = arith.constant 61 : index
    %262 = memref.load %arg3[%c61] : memref<96xf32, #tpu.memory_space<smem>>
    %263 = vector.broadcast %262 : f32 to vector<8x128xf32>
    %264 = arith.mulf %263, %118 : vector<8x128xf32>
    %265 = arith.addf %261, %264 : vector<8x128xf32>
    %c62 = arith.constant 62 : index
    %266 = memref.load %arg3[%c62] : memref<96xf32, #tpu.memory_space<smem>>
    %267 = vector.broadcast %266 : f32 to vector<8x128xf32>
    %268 = arith.mulf %267, %203 : vector<8x128xf32>
    %269 = arith.addf %265, %268 : vector<8x128xf32>
    %c72 = arith.constant 72 : index
    %270 = memref.load %arg3[%c72] : memref<96xf32, #tpu.memory_space<smem>>
    %271 = vector.broadcast %270 : f32 to vector<8x128xf32>
    %272 = arith.mulf %271, %198 : vector<8x128xf32>
    %c73 = arith.constant 73 : index
    %273 = memref.load %arg3[%c73] : memref<96xf32, #tpu.memory_space<smem>>
    %274 = vector.broadcast %273 : f32 to vector<8x128xf32>
    %275 = arith.mulf %274, %118 : vector<8x128xf32>
    %276 = arith.addf %272, %275 : vector<8x128xf32>
    %c74 = arith.constant 74 : index
    %277 = memref.load %arg3[%c74] : memref<96xf32, #tpu.memory_space<smem>>
    %278 = vector.broadcast %277 : f32 to vector<8x128xf32>
    %279 = arith.mulf %278, %203 : vector<8x128xf32>
    %280 = arith.addf %276, %279 : vector<8x128xf32>
    %c84 = arith.constant 84 : index
    %281 = memref.load %arg3[%c84] : memref<96xf32, #tpu.memory_space<smem>>
    %282 = vector.broadcast %281 : f32 to vector<8x128xf32>
    %283 = arith.mulf %282, %198 : vector<8x128xf32>
    %c85 = arith.constant 85 : index
    %284 = memref.load %arg3[%c85] : memref<96xf32, #tpu.memory_space<smem>>
    %285 = vector.broadcast %284 : f32 to vector<8x128xf32>
    %286 = arith.mulf %285, %118 : vector<8x128xf32>
    %287 = arith.addf %283, %286 : vector<8x128xf32>
    %c86 = arith.constant 86 : index
    %288 = memref.load %arg3[%c86] : memref<96xf32, #tpu.memory_space<smem>>
    %289 = vector.broadcast %288 : f32 to vector<8x128xf32>
    %290 = arith.mulf %289, %203 : vector<8x128xf32>
    %291 = arith.addf %287, %290 : vector<8x128xf32>
    %c0_i32_60 = arith.constant 0 : i32
    %292 = vector.broadcast %c0_i32_60 : i32 to vector<8x128xi32>
    %293 = arith.cmpi sgt, %39, %292 : vector<8x128xi32>
    %c1_i32_61 = arith.constant 1 : i32
    %294 = tpu.dynamic_rotate %143 by %c1_i32_61 dim 1 : vector<8x128xf32>, i32 -> vector<8x128xf32>
    %cst_62 = arith.constant 0.000000e+00 : f32
    %295 = vector.broadcast %cst_62 : f32 to vector<8x128xf32>
    %296 = arith.select %293, %294, %295 : vector<8x128xi1>, vector<8x128xf32>
    %c127_i32_63 = arith.constant 127 : i32
    %297 = vector.broadcast %c127_i32_63 : i32 to vector<8x128xi32>
    %298 = arith.cmpi slt, %39, %297 : vector<8x128xi32>
    %c127_i32_64 = arith.constant 127 : i32
    %299 = tpu.dynamic_rotate %143 by %c127_i32_64 dim 1 : vector<8x128xf32>, i32 -> vector<8x128xf32>
    %cst_65 = arith.constant 0.000000e+00 : f32
    %300 = vector.broadcast %cst_65 : f32 to vector<8x128xf32>
    %301 = arith.select %298, %299, %300 : vector<8x128xi1>, vector<8x128xf32>
    %c3_66 = arith.constant 3 : index
    %302 = memref.load %arg3[%c3_66] : memref<96xf32, #tpu.memory_space<smem>>
    %303 = vector.broadcast %302 : f32 to vector<8x128xf32>
    %304 = arith.mulf %303, %296 : vector<8x128xf32>
    %c4_67 = arith.constant 4 : index
    %305 = memref.load %arg3[%c4_67] : memref<96xf32, #tpu.memory_space<smem>>
    %306 = vector.broadcast %305 : f32 to vector<8x128xf32>
    %307 = arith.mulf %306, %143 : vector<8x128xf32>
    %308 = arith.addf %304, %307 : vector<8x128xf32>
    %c5_68 = arith.constant 5 : index
    %309 = memref.load %arg3[%c5_68] : memref<96xf32, #tpu.memory_space<smem>>
    %310 = vector.broadcast %309 : f32 to vector<8x128xf32>
    %311 = arith.mulf %310, %301 : vector<8x128xf32>
    %312 = arith.addf %308, %311 : vector<8x128xf32>
    %313 = arith.addf %214, %312 : vector<8x128xf32>
    %c15 = arith.constant 15 : index
    %314 = memref.load %arg3[%c15] : memref<96xf32, #tpu.memory_space<smem>>
    %315 = vector.broadcast %314 : f32 to vector<8x128xf32>
    %316 = arith.mulf %315, %296 : vector<8x128xf32>
    %c16 = arith.constant 16 : index
    %317 = memref.load %arg3[%c16] : memref<96xf32, #tpu.memory_space<smem>>
    %318 = vector.broadcast %317 : f32 to vector<8x128xf32>
    %319 = arith.mulf %318, %143 : vector<8x128xf32>
    %320 = arith.addf %316, %319 : vector<8x128xf32>
    %c17 = arith.constant 17 : index
    %321 = memref.load %arg3[%c17] : memref<96xf32, #tpu.memory_space<smem>>
    %322 = vector.broadcast %321 : f32 to vector<8x128xf32>
    %323 = arith.mulf %322, %301 : vector<8x128xf32>
    %324 = arith.addf %320, %323 : vector<8x128xf32>
    %325 = arith.addf %225, %324 : vector<8x128xf32>
    %c27 = arith.constant 27 : index
    %326 = memref.load %arg3[%c27] : memref<96xf32, #tpu.memory_space<smem>>
    %327 = vector.broadcast %326 : f32 to vector<8x128xf32>
    %328 = arith.mulf %327, %296 : vector<8x128xf32>
    %c28 = arith.constant 28 : index
    %329 = memref.load %arg3[%c28] : memref<96xf32, #tpu.memory_space<smem>>
    %330 = vector.broadcast %329 : f32 to vector<8x128xf32>
    %331 = arith.mulf %330, %143 : vector<8x128xf32>
    %332 = arith.addf %328, %331 : vector<8x128xf32>
    %c29 = arith.constant 29 : index
    %333 = memref.load %arg3[%c29] : memref<96xf32, #tpu.memory_space<smem>>
    %334 = vector.broadcast %333 : f32 to vector<8x128xf32>
    %335 = arith.mulf %334, %301 : vector<8x128xf32>
    %336 = arith.addf %332, %335 : vector<8x128xf32>
    %337 = arith.addf %236, %336 : vector<8x128xf32>
    %c39 = arith.constant 39 : index
    %338 = memref.load %arg3[%c39] : memref<96xf32, #tpu.memory_space<smem>>
    %339 = vector.broadcast %338 : f32 to vector<8x128xf32>
    %340 = arith.mulf %339, %296 : vector<8x128xf32>
    %c40 = arith.constant 40 : index
    %341 = memref.load %arg3[%c40] : memref<96xf32, #tpu.memory_space<smem>>
    %342 = vector.broadcast %341 : f32 to vector<8x128xf32>
    %343 = arith.mulf %342, %143 : vector<8x128xf32>
    %344 = arith.addf %340, %343 : vector<8x128xf32>
    %c41 = arith.constant 41 : index
    %345 = memref.load %arg3[%c41] : memref<96xf32, #tpu.memory_space<smem>>
    %346 = vector.broadcast %345 : f32 to vector<8x128xf32>
    %347 = arith.mulf %346, %301 : vector<8x128xf32>
    %348 = arith.addf %344, %347 : vector<8x128xf32>
    %349 = arith.addf %247, %348 : vector<8x128xf32>
    %c51 = arith.constant 51 : index
    %350 = memref.load %arg3[%c51] : memref<96xf32, #tpu.memory_space<smem>>
    %351 = vector.broadcast %350 : f32 to vector<8x128xf32>
    %352 = arith.mulf %351, %296 : vector<8x128xf32>
    %c52 = arith.constant 52 : index
    %353 = memref.load %arg3[%c52] : memref<96xf32, #tpu.memory_space<smem>>
    %354 = vector.broadcast %353 : f32 to vector<8x128xf32>
    %355 = arith.mulf %354, %143 : vector<8x128xf32>
    %356 = arith.addf %352, %355 : vector<8x128xf32>
    %c53 = arith.constant 53 : index
    %357 = memref.load %arg3[%c53] : memref<96xf32, #tpu.memory_space<smem>>
    %358 = vector.broadcast %357 : f32 to vector<8x128xf32>
    %359 = arith.mulf %358, %301 : vector<8x128xf32>
    %360 = arith.addf %356, %359 : vector<8x128xf32>
    %361 = arith.addf %258, %360 : vector<8x128xf32>
    %c63 = arith.constant 63 : index
    %362 = memref.load %arg3[%c63] : memref<96xf32, #tpu.memory_space<smem>>
    %363 = vector.broadcast %362 : f32 to vector<8x128xf32>
    %364 = arith.mulf %363, %296 : vector<8x128xf32>
    %c64 = arith.constant 64 : index
    %365 = memref.load %arg3[%c64] : memref<96xf32, #tpu.memory_space<smem>>
    %366 = vector.broadcast %365 : f32 to vector<8x128xf32>
    %367 = arith.mulf %366, %143 : vector<8x128xf32>
    %368 = arith.addf %364, %367 : vector<8x128xf32>
    %c65 = arith.constant 65 : index
    %369 = memref.load %arg3[%c65] : memref<96xf32, #tpu.memory_space<smem>>
    %370 = vector.broadcast %369 : f32 to vector<8x128xf32>
    %371 = arith.mulf %370, %301 : vector<8x128xf32>
    %372 = arith.addf %368, %371 : vector<8x128xf32>
    %373 = arith.addf %269, %372 : vector<8x128xf32>
    %c75 = arith.constant 75 : index
    %374 = memref.load %arg3[%c75] : memref<96xf32, #tpu.memory_space<smem>>
    %375 = vector.broadcast %374 : f32 to vector<8x128xf32>
    %376 = arith.mulf %375, %296 : vector<8x128xf32>
    %c76 = arith.constant 76 : index
    %377 = memref.load %arg3[%c76] : memref<96xf32, #tpu.memory_space<smem>>
    %378 = vector.broadcast %377 : f32 to vector<8x128xf32>
    %379 = arith.mulf %378, %143 : vector<8x128xf32>
    %380 = arith.addf %376, %379 : vector<8x128xf32>
    %c77 = arith.constant 77 : index
    %381 = memref.load %arg3[%c77] : memref<96xf32, #tpu.memory_space<smem>>
    %382 = vector.broadcast %381 : f32 to vector<8x128xf32>
    %383 = arith.mulf %382, %301 : vector<8x128xf32>
    %384 = arith.addf %380, %383 : vector<8x128xf32>
    %385 = arith.addf %280, %384 : vector<8x128xf32>
    %c87 = arith.constant 87 : index
    %386 = memref.load %arg3[%c87] : memref<96xf32, #tpu.memory_space<smem>>
    %387 = vector.broadcast %386 : f32 to vector<8x128xf32>
    %388 = arith.mulf %387, %296 : vector<8x128xf32>
    %c88 = arith.constant 88 : index
    %389 = memref.load %arg3[%c88] : memref<96xf32, #tpu.memory_space<smem>>
    %390 = vector.broadcast %389 : f32 to vector<8x128xf32>
    %391 = arith.mulf %390, %143 : vector<8x128xf32>
    %392 = arith.addf %388, %391 : vector<8x128xf32>
    %c89 = arith.constant 89 : index
    %393 = memref.load %arg3[%c89] : memref<96xf32, #tpu.memory_space<smem>>
    %394 = vector.broadcast %393 : f32 to vector<8x128xf32>
    %395 = arith.mulf %394, %301 : vector<8x128xf32>
    %396 = arith.addf %392, %395 : vector<8x128xf32>
    %397 = arith.addf %291, %396 : vector<8x128xf32>
    %c0_i32_69 = arith.constant 0 : i32
    %398 = vector.broadcast %c0_i32_69 : i32 to vector<8x128xi32>
    %399 = arith.cmpi sgt, %39, %398 : vector<8x128xi32>
    %c1_i32_70 = arith.constant 1 : i32
    %400 = tpu.dynamic_rotate %168 by %c1_i32_70 dim 1 : vector<8x128xf32>, i32 -> vector<8x128xf32>
    %cst_71 = arith.constant 0.000000e+00 : f32
    %401 = vector.broadcast %cst_71 : f32 to vector<8x128xf32>
    %402 = arith.select %399, %400, %401 : vector<8x128xi1>, vector<8x128xf32>
    %c127_i32_72 = arith.constant 127 : i32
    %403 = vector.broadcast %c127_i32_72 : i32 to vector<8x128xi32>
    %404 = arith.cmpi slt, %39, %403 : vector<8x128xi32>
    %c127_i32_73 = arith.constant 127 : i32
    %405 = tpu.dynamic_rotate %168 by %c127_i32_73 dim 1 : vector<8x128xf32>, i32 -> vector<8x128xf32>
    %cst_74 = arith.constant 0.000000e+00 : f32
    %406 = vector.broadcast %cst_74 : f32 to vector<8x128xf32>
    %407 = arith.select %404, %405, %406 : vector<8x128xi1>, vector<8x128xf32>
    %c6_75 = arith.constant 6 : index
    %408 = memref.load %arg3[%c6_75] : memref<96xf32, #tpu.memory_space<smem>>
    %409 = vector.broadcast %408 : f32 to vector<8x128xf32>
    %410 = arith.mulf %409, %402 : vector<8x128xf32>
    %c7_76 = arith.constant 7 : index
    %411 = memref.load %arg3[%c7_76] : memref<96xf32, #tpu.memory_space<smem>>
    %412 = vector.broadcast %411 : f32 to vector<8x128xf32>
    %413 = arith.mulf %412, %168 : vector<8x128xf32>
    %414 = arith.addf %410, %413 : vector<8x128xf32>
    %c8_77 = arith.constant 8 : index
    %415 = memref.load %arg3[%c8_77] : memref<96xf32, #tpu.memory_space<smem>>
    %416 = vector.broadcast %415 : f32 to vector<8x128xf32>
    %417 = arith.mulf %416, %407 : vector<8x128xf32>
    %418 = arith.addf %414, %417 : vector<8x128xf32>
    %419 = arith.addf %313, %418 : vector<8x128xf32>
    %c18 = arith.constant 18 : index
    %420 = memref.load %arg3[%c18] : memref<96xf32, #tpu.memory_space<smem>>
    %421 = vector.broadcast %420 : f32 to vector<8x128xf32>
    %422 = arith.mulf %421, %402 : vector<8x128xf32>
    %c19 = arith.constant 19 : index
    %423 = memref.load %arg3[%c19] : memref<96xf32, #tpu.memory_space<smem>>
    %424 = vector.broadcast %423 : f32 to vector<8x128xf32>
    %425 = arith.mulf %424, %168 : vector<8x128xf32>
    %426 = arith.addf %422, %425 : vector<8x128xf32>
    %c20 = arith.constant 20 : index
    %427 = memref.load %arg3[%c20] : memref<96xf32, #tpu.memory_space<smem>>
    %428 = vector.broadcast %427 : f32 to vector<8x128xf32>
    %429 = arith.mulf %428, %407 : vector<8x128xf32>
    %430 = arith.addf %426, %429 : vector<8x128xf32>
    %431 = arith.addf %325, %430 : vector<8x128xf32>
    %c30 = arith.constant 30 : index
    %432 = memref.load %arg3[%c30] : memref<96xf32, #tpu.memory_space<smem>>
    %433 = vector.broadcast %432 : f32 to vector<8x128xf32>
    %434 = arith.mulf %433, %402 : vector<8x128xf32>
    %c31 = arith.constant 31 : index
    %435 = memref.load %arg3[%c31] : memref<96xf32, #tpu.memory_space<smem>>
    %436 = vector.broadcast %435 : f32 to vector<8x128xf32>
    %437 = arith.mulf %436, %168 : vector<8x128xf32>
    %438 = arith.addf %434, %437 : vector<8x128xf32>
    %c32 = arith.constant 32 : index
    %439 = memref.load %arg3[%c32] : memref<96xf32, #tpu.memory_space<smem>>
    %440 = vector.broadcast %439 : f32 to vector<8x128xf32>
    %441 = arith.mulf %440, %407 : vector<8x128xf32>
    %442 = arith.addf %438, %441 : vector<8x128xf32>
    %443 = arith.addf %337, %442 : vector<8x128xf32>
    %c42 = arith.constant 42 : index
    %444 = memref.load %arg3[%c42] : memref<96xf32, #tpu.memory_space<smem>>
    %445 = vector.broadcast %444 : f32 to vector<8x128xf32>
    %446 = arith.mulf %445, %402 : vector<8x128xf32>
    %c43 = arith.constant 43 : index
    %447 = memref.load %arg3[%c43] : memref<96xf32, #tpu.memory_space<smem>>
    %448 = vector.broadcast %447 : f32 to vector<8x128xf32>
    %449 = arith.mulf %448, %168 : vector<8x128xf32>
    %450 = arith.addf %446, %449 : vector<8x128xf32>
    %c44 = arith.constant 44 : index
    %451 = memref.load %arg3[%c44] : memref<96xf32, #tpu.memory_space<smem>>
    %452 = vector.broadcast %451 : f32 to vector<8x128xf32>
    %453 = arith.mulf %452, %407 : vector<8x128xf32>
    %454 = arith.addf %450, %453 : vector<8x128xf32>
    %455 = arith.addf %349, %454 : vector<8x128xf32>
    %c54 = arith.constant 54 : index
    %456 = memref.load %arg3[%c54] : memref<96xf32, #tpu.memory_space<smem>>
    %457 = vector.broadcast %456 : f32 to vector<8x128xf32>
    %458 = arith.mulf %457, %402 : vector<8x128xf32>
    %c55 = arith.constant 55 : index
    %459 = memref.load %arg3[%c55] : memref<96xf32, #tpu.memory_space<smem>>
    %460 = vector.broadcast %459 : f32 to vector<8x128xf32>
    %461 = arith.mulf %460, %168 : vector<8x128xf32>
    %462 = arith.addf %458, %461 : vector<8x128xf32>
    %c56 = arith.constant 56 : index
    %463 = memref.load %arg3[%c56] : memref<96xf32, #tpu.memory_space<smem>>
    %464 = vector.broadcast %463 : f32 to vector<8x128xf32>
    %465 = arith.mulf %464, %407 : vector<8x128xf32>
    %466 = arith.addf %462, %465 : vector<8x128xf32>
    %467 = arith.addf %361, %466 : vector<8x128xf32>
    %c66 = arith.constant 66 : index
    %468 = memref.load %arg3[%c66] : memref<96xf32, #tpu.memory_space<smem>>
    %469 = vector.broadcast %468 : f32 to vector<8x128xf32>
    %470 = arith.mulf %469, %402 : vector<8x128xf32>
    %c67 = arith.constant 67 : index
    %471 = memref.load %arg3[%c67] : memref<96xf32, #tpu.memory_space<smem>>
    %472 = vector.broadcast %471 : f32 to vector<8x128xf32>
    %473 = arith.mulf %472, %168 : vector<8x128xf32>
    %474 = arith.addf %470, %473 : vector<8x128xf32>
    %c68 = arith.constant 68 : index
    %475 = memref.load %arg3[%c68] : memref<96xf32, #tpu.memory_space<smem>>
    %476 = vector.broadcast %475 : f32 to vector<8x128xf32>
    %477 = arith.mulf %476, %407 : vector<8x128xf32>
    %478 = arith.addf %474, %477 : vector<8x128xf32>
    %479 = arith.addf %373, %478 : vector<8x128xf32>
    %c78 = arith.constant 78 : index
    %480 = memref.load %arg3[%c78] : memref<96xf32, #tpu.memory_space<smem>>
    %481 = vector.broadcast %480 : f32 to vector<8x128xf32>
    %482 = arith.mulf %481, %402 : vector<8x128xf32>
    %c79 = arith.constant 79 : index
    %483 = memref.load %arg3[%c79] : memref<96xf32, #tpu.memory_space<smem>>
    %484 = vector.broadcast %483 : f32 to vector<8x128xf32>
    %485 = arith.mulf %484, %168 : vector<8x128xf32>
    %486 = arith.addf %482, %485 : vector<8x128xf32>
    %c80 = arith.constant 80 : index
    %487 = memref.load %arg3[%c80] : memref<96xf32, #tpu.memory_space<smem>>
    %488 = vector.broadcast %487 : f32 to vector<8x128xf32>
    %489 = arith.mulf %488, %407 : vector<8x128xf32>
    %490 = arith.addf %486, %489 : vector<8x128xf32>
    %491 = arith.addf %385, %490 : vector<8x128xf32>
    %c90 = arith.constant 90 : index
    %492 = memref.load %arg3[%c90] : memref<96xf32, #tpu.memory_space<smem>>
    %493 = vector.broadcast %492 : f32 to vector<8x128xf32>
    %494 = arith.mulf %493, %402 : vector<8x128xf32>
    %c91 = arith.constant 91 : index
    %495 = memref.load %arg3[%c91] : memref<96xf32, #tpu.memory_space<smem>>
    %496 = vector.broadcast %495 : f32 to vector<8x128xf32>
    %497 = arith.mulf %496, %168 : vector<8x128xf32>
    %498 = arith.addf %494, %497 : vector<8x128xf32>
    %c92 = arith.constant 92 : index
    %499 = memref.load %arg3[%c92] : memref<96xf32, #tpu.memory_space<smem>>
    %500 = vector.broadcast %499 : f32 to vector<8x128xf32>
    %501 = arith.mulf %500, %407 : vector<8x128xf32>
    %502 = arith.addf %498, %501 : vector<8x128xf32>
    %503 = arith.addf %397, %502 : vector<8x128xf32>
    %c0_i32_78 = arith.constant 0 : i32
    %504 = vector.broadcast %c0_i32_78 : i32 to vector<8x128xi32>
    %505 = arith.cmpi sgt, %39, %504 : vector<8x128xi32>
    %c1_i32_79 = arith.constant 1 : i32
    %506 = tpu.dynamic_rotate %193 by %c1_i32_79 dim 1 : vector<8x128xf32>, i32 -> vector<8x128xf32>
    %cst_80 = arith.constant 0.000000e+00 : f32
    %507 = vector.broadcast %cst_80 : f32 to vector<8x128xf32>
    %508 = arith.select %505, %506, %507 : vector<8x128xi1>, vector<8x128xf32>
    %c127_i32_81 = arith.constant 127 : i32
    %509 = vector.broadcast %c127_i32_81 : i32 to vector<8x128xi32>
    %510 = arith.cmpi slt, %39, %509 : vector<8x128xi32>
    %c127_i32_82 = arith.constant 127 : i32
    %511 = tpu.dynamic_rotate %193 by %c127_i32_82 dim 1 : vector<8x128xf32>, i32 -> vector<8x128xf32>
    %cst_83 = arith.constant 0.000000e+00 : f32
    %512 = vector.broadcast %cst_83 : f32 to vector<8x128xf32>
    %513 = arith.select %510, %511, %512 : vector<8x128xi1>, vector<8x128xf32>
    %c9_84 = arith.constant 9 : index
    %514 = memref.load %arg3[%c9_84] : memref<96xf32, #tpu.memory_space<smem>>
    %515 = vector.broadcast %514 : f32 to vector<8x128xf32>
    %516 = arith.mulf %515, %508 : vector<8x128xf32>
    %c10_85 = arith.constant 10 : index
    %517 = memref.load %arg3[%c10_85] : memref<96xf32, #tpu.memory_space<smem>>
    %518 = vector.broadcast %517 : f32 to vector<8x128xf32>
    %519 = arith.mulf %518, %193 : vector<8x128xf32>
    %520 = arith.addf %516, %519 : vector<8x128xf32>
    %c11_86 = arith.constant 11 : index
    %521 = memref.load %arg3[%c11_86] : memref<96xf32, #tpu.memory_space<smem>>
    %522 = vector.broadcast %521 : f32 to vector<8x128xf32>
    %523 = arith.mulf %522, %513 : vector<8x128xf32>
    %524 = arith.addf %520, %523 : vector<8x128xf32>
    %525 = arith.addf %419, %524 : vector<8x128xf32>
    %c21 = arith.constant 21 : index
    %526 = memref.load %arg3[%c21] : memref<96xf32, #tpu.memory_space<smem>>
    %527 = vector.broadcast %526 : f32 to vector<8x128xf32>
    %528 = arith.mulf %527, %508 : vector<8x128xf32>
    %c22 = arith.constant 22 : index
    %529 = memref.load %arg3[%c22] : memref<96xf32, #tpu.memory_space<smem>>
    %530 = vector.broadcast %529 : f32 to vector<8x128xf32>
    %531 = arith.mulf %530, %193 : vector<8x128xf32>
    %532 = arith.addf %528, %531 : vector<8x128xf32>
    %c23 = arith.constant 23 : index
    %533 = memref.load %arg3[%c23] : memref<96xf32, #tpu.memory_space<smem>>
    %534 = vector.broadcast %533 : f32 to vector<8x128xf32>
    %535 = arith.mulf %534, %513 : vector<8x128xf32>
    %536 = arith.addf %532, %535 : vector<8x128xf32>
    %537 = arith.addf %431, %536 : vector<8x128xf32>
    %c33 = arith.constant 33 : index
    %538 = memref.load %arg3[%c33] : memref<96xf32, #tpu.memory_space<smem>>
    %539 = vector.broadcast %538 : f32 to vector<8x128xf32>
    %540 = arith.mulf %539, %508 : vector<8x128xf32>
    %c34 = arith.constant 34 : index
    %541 = memref.load %arg3[%c34] : memref<96xf32, #tpu.memory_space<smem>>
    %542 = vector.broadcast %541 : f32 to vector<8x128xf32>
    %543 = arith.mulf %542, %193 : vector<8x128xf32>
    %544 = arith.addf %540, %543 : vector<8x128xf32>
    %c35 = arith.constant 35 : index
    %545 = memref.load %arg3[%c35] : memref<96xf32, #tpu.memory_space<smem>>
    %546 = vector.broadcast %545 : f32 to vector<8x128xf32>
    %547 = arith.mulf %546, %513 : vector<8x128xf32>
    %548 = arith.addf %544, %547 : vector<8x128xf32>
    %549 = arith.addf %443, %548 : vector<8x128xf32>
    %c45 = arith.constant 45 : index
    %550 = memref.load %arg3[%c45] : memref<96xf32, #tpu.memory_space<smem>>
    %551 = vector.broadcast %550 : f32 to vector<8x128xf32>
    %552 = arith.mulf %551, %508 : vector<8x128xf32>
    %c46 = arith.constant 46 : index
    %553 = memref.load %arg3[%c46] : memref<96xf32, #tpu.memory_space<smem>>
    %554 = vector.broadcast %553 : f32 to vector<8x128xf32>
    %555 = arith.mulf %554, %193 : vector<8x128xf32>
    %556 = arith.addf %552, %555 : vector<8x128xf32>
    %c47 = arith.constant 47 : index
    %557 = memref.load %arg3[%c47] : memref<96xf32, #tpu.memory_space<smem>>
    %558 = vector.broadcast %557 : f32 to vector<8x128xf32>
    %559 = arith.mulf %558, %513 : vector<8x128xf32>
    %560 = arith.addf %556, %559 : vector<8x128xf32>
    %561 = arith.addf %455, %560 : vector<8x128xf32>
    %c57 = arith.constant 57 : index
    %562 = memref.load %arg3[%c57] : memref<96xf32, #tpu.memory_space<smem>>
    %563 = vector.broadcast %562 : f32 to vector<8x128xf32>
    %564 = arith.mulf %563, %508 : vector<8x128xf32>
    %c58 = arith.constant 58 : index
    %565 = memref.load %arg3[%c58] : memref<96xf32, #tpu.memory_space<smem>>
    %566 = vector.broadcast %565 : f32 to vector<8x128xf32>
    %567 = arith.mulf %566, %193 : vector<8x128xf32>
    %568 = arith.addf %564, %567 : vector<8x128xf32>
    %c59 = arith.constant 59 : index
    %569 = memref.load %arg3[%c59] : memref<96xf32, #tpu.memory_space<smem>>
    %570 = vector.broadcast %569 : f32 to vector<8x128xf32>
    %571 = arith.mulf %570, %513 : vector<8x128xf32>
    %572 = arith.addf %568, %571 : vector<8x128xf32>
    %573 = arith.addf %467, %572 : vector<8x128xf32>
    %c69 = arith.constant 69 : index
    %574 = memref.load %arg3[%c69] : memref<96xf32, #tpu.memory_space<smem>>
    %575 = vector.broadcast %574 : f32 to vector<8x128xf32>
    %576 = arith.mulf %575, %508 : vector<8x128xf32>
    %c70 = arith.constant 70 : index
    %577 = memref.load %arg3[%c70] : memref<96xf32, #tpu.memory_space<smem>>
    %578 = vector.broadcast %577 : f32 to vector<8x128xf32>
    %579 = arith.mulf %578, %193 : vector<8x128xf32>
    %580 = arith.addf %576, %579 : vector<8x128xf32>
    %c71 = arith.constant 71 : index
    %581 = memref.load %arg3[%c71] : memref<96xf32, #tpu.memory_space<smem>>
    %582 = vector.broadcast %581 : f32 to vector<8x128xf32>
    %583 = arith.mulf %582, %513 : vector<8x128xf32>
    %584 = arith.addf %580, %583 : vector<8x128xf32>
    %585 = arith.addf %479, %584 : vector<8x128xf32>
    %c81 = arith.constant 81 : index
    %586 = memref.load %arg3[%c81] : memref<96xf32, #tpu.memory_space<smem>>
    %587 = vector.broadcast %586 : f32 to vector<8x128xf32>
    %588 = arith.mulf %587, %508 : vector<8x128xf32>
    %c82 = arith.constant 82 : index
    %589 = memref.load %arg3[%c82] : memref<96xf32, #tpu.memory_space<smem>>
    %590 = vector.broadcast %589 : f32 to vector<8x128xf32>
    %591 = arith.mulf %590, %193 : vector<8x128xf32>
    %592 = arith.addf %588, %591 : vector<8x128xf32>
    %c83 = arith.constant 83 : index
    %593 = memref.load %arg3[%c83] : memref<96xf32, #tpu.memory_space<smem>>
    %594 = vector.broadcast %593 : f32 to vector<8x128xf32>
    %595 = arith.mulf %594, %513 : vector<8x128xf32>
    %596 = arith.addf %592, %595 : vector<8x128xf32>
    %597 = arith.addf %491, %596 : vector<8x128xf32>
    %c93 = arith.constant 93 : index
    %598 = memref.load %arg3[%c93] : memref<96xf32, #tpu.memory_space<smem>>
    %599 = vector.broadcast %598 : f32 to vector<8x128xf32>
    %600 = arith.mulf %599, %508 : vector<8x128xf32>
    %c94 = arith.constant 94 : index
    %601 = memref.load %arg3[%c94] : memref<96xf32, #tpu.memory_space<smem>>
    %602 = vector.broadcast %601 : f32 to vector<8x128xf32>
    %603 = arith.mulf %602, %193 : vector<8x128xf32>
    %604 = arith.addf %600, %603 : vector<8x128xf32>
    %c95 = arith.constant 95 : index
    %605 = memref.load %arg3[%c95] : memref<96xf32, #tpu.memory_space<smem>>
    %606 = vector.broadcast %605 : f32 to vector<8x128xf32>
    %607 = arith.mulf %606, %513 : vector<8x128xf32>
    %608 = arith.addf %604, %607 : vector<8x128xf32>
    %609 = arith.addf %503, %608 : vector<8x128xf32>
    %610 = vector.shape_cast %525 : vector<8x128xf32> to vector<1x8x128xf32>
    %cst_87 = arith.constant dense<0.000000e+00> : vector<1xf32>
    %611 = vector.multi_reduction <add>, %610, %cst_87 [1, 2] : vector<1x8x128xf32> to vector<1xf32>
    %612 = vector.shape_cast %611 : vector<1xf32> to vector<1x1x1xf32>
    %613 = vector.extract %612[0, 0, 0] : f32 from vector<1x1x1xf32>
    %614 = arith.mulf %525, %525 : vector<8x128xf32>
    %615 = vector.shape_cast %614 : vector<8x128xf32> to vector<1x8x128xf32>
    %cst_88 = arith.constant dense<0.000000e+00> : vector<1xf32>
    %616 = vector.multi_reduction <add>, %615, %cst_88 [1, 2] : vector<1x8x128xf32> to vector<1xf32>
    %617 = vector.shape_cast %616 : vector<1xf32> to vector<1x1x1xf32>
    %618 = vector.extract %617[0, 0, 0] : f32 from vector<1x1x1xf32>
    %cst_89 = arith.constant 9.765625E-4 : f32
    %619 = arith.mulf %613, %cst_89 : f32
    %cst_90 = arith.constant 9.765625E-4 : f32
    %620 = arith.mulf %618, %cst_90 : f32
    %621 = arith.mulf %619, %619 : f32
    %622 = arith.subf %620, %621 : f32
    %cst_91 = arith.constant 0.000000e+00 : f32
    %623 = arith.maximumf %622, %cst_91 : f32
    %624 = vector.broadcast %619 : f32 to vector<8x128xf32>
    %625 = arith.subf %525, %624 : vector<8x128xf32>
    %cst_92 = arith.constant 9.99999974E-6 : f32
    %626 = arith.addf %623, %cst_92 : f32
    %627 = math.rsqrt %626 : f32
    %628 = vector.broadcast %627 : f32 to vector<8x128xf32>
    %629 = arith.mulf %625, %628 : vector<8x128xf32>
    %cst_93 = arith.constant 0.000000e+00 : f32
    %630 = vector.broadcast %cst_93 : f32 to vector<8x128xf32>
    %631 = arith.cmpf ogt, %629, %630 : vector<8x128xf32>
    %cst_94 = arith.constant 0.00999999977 : f32
    %632 = vector.broadcast %cst_94 : f32 to vector<8x128xf32>
    %633 = arith.mulf %632, %629 : vector<8x128xf32>
    %634 = arith.select %631, %629, %633 : vector<8x128xi1>, vector<8x128xf32>
    %635 = vector.shape_cast %537 : vector<8x128xf32> to vector<1x8x128xf32>
    %cst_95 = arith.constant dense<0.000000e+00> : vector<1xf32>
    %636 = vector.multi_reduction <add>, %635, %cst_95 [1, 2] : vector<1x8x128xf32> to vector<1xf32>
    %637 = vector.shape_cast %636 : vector<1xf32> to vector<1x1x1xf32>
    %638 = vector.extract %637[0, 0, 0] : f32 from vector<1x1x1xf32>
    %639 = arith.mulf %537, %537 : vector<8x128xf32>
    %640 = vector.shape_cast %639 : vector<8x128xf32> to vector<1x8x128xf32>
    %cst_96 = arith.constant dense<0.000000e+00> : vector<1xf32>
    %641 = vector.multi_reduction <add>, %640, %cst_96 [1, 2] : vector<1x8x128xf32> to vector<1xf32>
    %642 = vector.shape_cast %641 : vector<1xf32> to vector<1x1x1xf32>
    %643 = vector.extract %642[0, 0, 0] : f32 from vector<1x1x1xf32>
    %cst_97 = arith.constant 9.765625E-4 : f32
    %644 = arith.mulf %638, %cst_97 : f32
    %cst_98 = arith.constant 9.765625E-4 : f32
    %645 = arith.mulf %643, %cst_98 : f32
    %646 = arith.mulf %644, %644 : f32
    %647 = arith.subf %645, %646 : f32
    %cst_99 = arith.constant 0.000000e+00 : f32
    %648 = arith.maximumf %647, %cst_99 : f32
    %649 = vector.broadcast %644 : f32 to vector<8x128xf32>
    %650 = arith.subf %537, %649 : vector<8x128xf32>
    %cst_100 = arith.constant 9.99999974E-6 : f32
    %651 = arith.addf %648, %cst_100 : f32
    %652 = math.rsqrt %651 : f32
    %653 = vector.broadcast %652 : f32 to vector<8x128xf32>
    %654 = arith.mulf %650, %653 : vector<8x128xf32>
    %cst_101 = arith.constant 0.000000e+00 : f32
    %655 = vector.broadcast %cst_101 : f32 to vector<8x128xf32>
    %656 = arith.cmpf ogt, %654, %655 : vector<8x128xf32>
    %cst_102 = arith.constant 0.00999999977 : f32
    %657 = vector.broadcast %cst_102 : f32 to vector<8x128xf32>
    %658 = arith.mulf %657, %654 : vector<8x128xf32>
    %659 = arith.select %656, %654, %658 : vector<8x128xi1>, vector<8x128xf32>
    %660 = vector.shape_cast %549 : vector<8x128xf32> to vector<1x8x128xf32>
    %cst_103 = arith.constant dense<0.000000e+00> : vector<1xf32>
    %661 = vector.multi_reduction <add>, %660, %cst_103 [1, 2] : vector<1x8x128xf32> to vector<1xf32>
    %662 = vector.shape_cast %661 : vector<1xf32> to vector<1x1x1xf32>
    %663 = vector.extract %662[0, 0, 0] : f32 from vector<1x1x1xf32>
    %664 = arith.mulf %549, %549 : vector<8x128xf32>
    %665 = vector.shape_cast %664 : vector<8x128xf32> to vector<1x8x128xf32>
    %cst_104 = arith.constant dense<0.000000e+00> : vector<1xf32>
    %666 = vector.multi_reduction <add>, %665, %cst_104 [1, 2] : vector<1x8x128xf32> to vector<1xf32>
    %667 = vector.shape_cast %666 : vector<1xf32> to vector<1x1x1xf32>
    %668 = vector.extract %667[0, 0, 0] : f32 from vector<1x1x1xf32>
    %cst_105 = arith.constant 9.765625E-4 : f32
    %669 = arith.mulf %663, %cst_105 : f32
    %cst_106 = arith.constant 9.765625E-4 : f32
    %670 = arith.mulf %668, %cst_106 : f32
    %671 = arith.mulf %669, %669 : f32
    %672 = arith.subf %670, %671 : f32
    %cst_107 = arith.constant 0.000000e+00 : f32
    %673 = arith.maximumf %672, %cst_107 : f32
    %674 = vector.broadcast %669 : f32 to vector<8x128xf32>
    %675 = arith.subf %549, %674 : vector<8x128xf32>
    %cst_108 = arith.constant 9.99999974E-6 : f32
    %676 = arith.addf %673, %cst_108 : f32
    %677 = math.rsqrt %676 : f32
    %678 = vector.broadcast %677 : f32 to vector<8x128xf32>
    %679 = arith.mulf %675, %678 : vector<8x128xf32>
    %cst_109 = arith.constant 0.000000e+00 : f32
    %680 = vector.broadcast %cst_109 : f32 to vector<8x128xf32>
    %681 = arith.cmpf ogt, %679, %680 : vector<8x128xf32>
    %cst_110 = arith.constant 0.00999999977 : f32
    %682 = vector.broadcast %cst_110 : f32 to vector<8x128xf32>
    %683 = arith.mulf %682, %679 : vector<8x128xf32>
    %684 = arith.select %681, %679, %683 : vector<8x128xi1>, vector<8x128xf32>
    %685 = vector.shape_cast %561 : vector<8x128xf32> to vector<1x8x128xf32>
    %cst_111 = arith.constant dense<0.000000e+00> : vector<1xf32>
    %686 = vector.multi_reduction <add>, %685, %cst_111 [1, 2] : vector<1x8x128xf32> to vector<1xf32>
    %687 = vector.shape_cast %686 : vector<1xf32> to vector<1x1x1xf32>
    %688 = vector.extract %687[0, 0, 0] : f32 from vector<1x1x1xf32>
    %689 = arith.mulf %561, %561 : vector<8x128xf32>
    %690 = vector.shape_cast %689 : vector<8x128xf32> to vector<1x8x128xf32>
    %cst_112 = arith.constant dense<0.000000e+00> : vector<1xf32>
    %691 = vector.multi_reduction <add>, %690, %cst_112 [1, 2] : vector<1x8x128xf32> to vector<1xf32>
    %692 = vector.shape_cast %691 : vector<1xf32> to vector<1x1x1xf32>
    %693 = vector.extract %692[0, 0, 0] : f32 from vector<1x1x1xf32>
    %cst_113 = arith.constant 9.765625E-4 : f32
    %694 = arith.mulf %688, %cst_113 : f32
    %cst_114 = arith.constant 9.765625E-4 : f32
    %695 = arith.mulf %693, %cst_114 : f32
    %696 = arith.mulf %694, %694 : f32
    %697 = arith.subf %695, %696 : f32
    %cst_115 = arith.constant 0.000000e+00 : f32
    %698 = arith.maximumf %697, %cst_115 : f32
    %699 = vector.broadcast %694 : f32 to vector<8x128xf32>
    %700 = arith.subf %561, %699 : vector<8x128xf32>
    %cst_116 = arith.constant 9.99999974E-6 : f32
    %701 = arith.addf %698, %cst_116 : f32
    %702 = math.rsqrt %701 : f32
    %703 = vector.broadcast %702 : f32 to vector<8x128xf32>
    %704 = arith.mulf %700, %703 : vector<8x128xf32>
    %cst_117 = arith.constant 0.000000e+00 : f32
    %705 = vector.broadcast %cst_117 : f32 to vector<8x128xf32>
    %706 = arith.cmpf ogt, %704, %705 : vector<8x128xf32>
    %cst_118 = arith.constant 0.00999999977 : f32
    %707 = vector.broadcast %cst_118 : f32 to vector<8x128xf32>
    %708 = arith.mulf %707, %704 : vector<8x128xf32>
    %709 = arith.select %706, %704, %708 : vector<8x128xi1>, vector<8x128xf32>
    %710 = vector.shape_cast %573 : vector<8x128xf32> to vector<1x8x128xf32>
    %cst_119 = arith.constant dense<0.000000e+00> : vector<1xf32>
    %711 = vector.multi_reduction <add>, %710, %cst_119 [1, 2] : vector<1x8x128xf32> to vector<1xf32>
    %712 = vector.shape_cast %711 : vector<1xf32> to vector<1x1x1xf32>
    %713 = vector.extract %712[0, 0, 0] : f32 from vector<1x1x1xf32>
    %714 = arith.mulf %573, %573 : vector<8x128xf32>
    %715 = vector.shape_cast %714 : vector<8x128xf32> to vector<1x8x128xf32>
    %cst_120 = arith.constant dense<0.000000e+00> : vector<1xf32>
    %716 = vector.multi_reduction <add>, %715, %cst_120 [1, 2] : vector<1x8x128xf32> to vector<1xf32>
    %717 = vector.shape_cast %716 : vector<1xf32> to vector<1x1x1xf32>
    %718 = vector.extract %717[0, 0, 0] : f32 from vector<1x1x1xf32>
    %cst_121 = arith.constant 9.765625E-4 : f32
    %719 = arith.mulf %713, %cst_121 : f32
    %cst_122 = arith.constant 9.765625E-4 : f32
    %720 = arith.mulf %718, %cst_122 : f32
    %721 = arith.mulf %719, %719 : f32
    %722 = arith.subf %720, %721 : f32
    %cst_123 = arith.constant 0.000000e+00 : f32
    %723 = arith.maximumf %722, %cst_123 : f32
    %724 = vector.broadcast %719 : f32 to vector<8x128xf32>
    %725 = arith.subf %573, %724 : vector<8x128xf32>
    %cst_124 = arith.constant 9.99999974E-6 : f32
    %726 = arith.addf %723, %cst_124 : f32
    %727 = math.rsqrt %726 : f32
    %728 = vector.broadcast %727 : f32 to vector<8x128xf32>
    %729 = arith.mulf %725, %728 : vector<8x128xf32>
    %cst_125 = arith.constant 0.000000e+00 : f32
    %730 = vector.broadcast %cst_125 : f32 to vector<8x128xf32>
    %731 = arith.cmpf ogt, %729, %730 : vector<8x128xf32>
    %cst_126 = arith.constant 0.00999999977 : f32
    %732 = vector.broadcast %cst_126 : f32 to vector<8x128xf32>
    %733 = arith.mulf %732, %729 : vector<8x128xf32>
    %734 = arith.select %731, %729, %733 : vector<8x128xi1>, vector<8x128xf32>
    %735 = vector.shape_cast %585 : vector<8x128xf32> to vector<1x8x128xf32>
    %cst_127 = arith.constant dense<0.000000e+00> : vector<1xf32>
    %736 = vector.multi_reduction <add>, %735, %cst_127 [1, 2] : vector<1x8x128xf32> to vector<1xf32>
    %737 = vector.shape_cast %736 : vector<1xf32> to vector<1x1x1xf32>
    %738 = vector.extract %737[0, 0, 0] : f32 from vector<1x1x1xf32>
    %739 = arith.mulf %585, %585 : vector<8x128xf32>
    %740 = vector.shape_cast %739 : vector<8x128xf32> to vector<1x8x128xf32>
    %cst_128 = arith.constant dense<0.000000e+00> : vector<1xf32>
    %741 = vector.multi_reduction <add>, %740, %cst_128 [1, 2] : vector<1x8x128xf32> to vector<1xf32>
    %742 = vector.shape_cast %741 : vector<1xf32> to vector<1x1x1xf32>
    %743 = vector.extract %742[0, 0, 0] : f32 from vector<1x1x1xf32>
    %cst_129 = arith.constant 9.765625E-4 : f32
    %744 = arith.mulf %738, %cst_129 : f32
    %cst_130 = arith.constant 9.765625E-4 : f32
    %745 = arith.mulf %743, %cst_130 : f32
    %746 = arith.mulf %744, %744 : f32
    %747 = arith.subf %745, %746 : f32
    %cst_131 = arith.constant 0.000000e+00 : f32
    %748 = arith.maximumf %747, %cst_131 : f32
    %749 = vector.broadcast %744 : f32 to vector<8x128xf32>
    %750 = arith.subf %585, %749 : vector<8x128xf32>
    %cst_132 = arith.constant 9.99999974E-6 : f32
    %751 = arith.addf %748, %cst_132 : f32
    %752 = math.rsqrt %751 : f32
    %753 = vector.broadcast %752 : f32 to vector<8x128xf32>
    %754 = arith.mulf %750, %753 : vector<8x128xf32>
    %cst_133 = arith.constant 0.000000e+00 : f32
    %755 = vector.broadcast %cst_133 : f32 to vector<8x128xf32>
    %756 = arith.cmpf ogt, %754, %755 : vector<8x128xf32>
    %cst_134 = arith.constant 0.00999999977 : f32
    %757 = vector.broadcast %cst_134 : f32 to vector<8x128xf32>
    %758 = arith.mulf %757, %754 : vector<8x128xf32>
    %759 = arith.select %756, %754, %758 : vector<8x128xi1>, vector<8x128xf32>
    %760 = vector.shape_cast %597 : vector<8x128xf32> to vector<1x8x128xf32>
    %cst_135 = arith.constant dense<0.000000e+00> : vector<1xf32>
    %761 = vector.multi_reduction <add>, %760, %cst_135 [1, 2] : vector<1x8x128xf32> to vector<1xf32>
    %762 = vector.shape_cast %761 : vector<1xf32> to vector<1x1x1xf32>
    %763 = vector.extract %762[0, 0, 0] : f32 from vector<1x1x1xf32>
    %764 = arith.mulf %597, %597 : vector<8x128xf32>
    %765 = vector.shape_cast %764 : vector<8x128xf32> to vector<1x8x128xf32>
    %cst_136 = arith.constant dense<0.000000e+00> : vector<1xf32>
    %766 = vector.multi_reduction <add>, %765, %cst_136 [1, 2] : vector<1x8x128xf32> to vector<1xf32>
    %767 = vector.shape_cast %766 : vector<1xf32> to vector<1x1x1xf32>
    %768 = vector.extract %767[0, 0, 0] : f32 from vector<1x1x1xf32>
    %cst_137 = arith.constant 9.765625E-4 : f32
    %769 = arith.mulf %763, %cst_137 : f32
    %cst_138 = arith.constant 9.765625E-4 : f32
    %770 = arith.mulf %768, %cst_138 : f32
    %771 = arith.mulf %769, %769 : f32
    %772 = arith.subf %770, %771 : f32
    %cst_139 = arith.constant 0.000000e+00 : f32
    %773 = arith.maximumf %772, %cst_139 : f32
    %774 = vector.broadcast %769 : f32 to vector<8x128xf32>
    %775 = arith.subf %597, %774 : vector<8x128xf32>
    %cst_140 = arith.constant 9.99999974E-6 : f32
    %776 = arith.addf %773, %cst_140 : f32
    %777 = math.rsqrt %776 : f32
    %778 = vector.broadcast %777 : f32 to vector<8x128xf32>
    %779 = arith.mulf %775, %778 : vector<8x128xf32>
    %cst_141 = arith.constant 0.000000e+00 : f32
    %780 = vector.broadcast %cst_141 : f32 to vector<8x128xf32>
    %781 = arith.cmpf ogt, %779, %780 : vector<8x128xf32>
    %cst_142 = arith.constant 0.00999999977 : f32
    %782 = vector.broadcast %cst_142 : f32 to vector<8x128xf32>
    %783 = arith.mulf %782, %779 : vector<8x128xf32>
    %784 = arith.select %781, %779, %783 : vector<8x128xi1>, vector<8x128xf32>
    %785 = vector.shape_cast %609 : vector<8x128xf32> to vector<1x8x128xf32>
    %cst_143 = arith.constant dense<0.000000e+00> : vector<1xf32>
    %786 = vector.multi_reduction <add>, %785, %cst_143 [1, 2] : vector<1x8x128xf32> to vector<1xf32>
    %787 = vector.shape_cast %786 : vector<1xf32> to vector<1x1x1xf32>
    %788 = vector.extract %787[0, 0, 0] : f32 from vector<1x1x1xf32>
    %789 = arith.mulf %609, %609 : vector<8x128xf32>
    %790 = vector.shape_cast %789 : vector<8x128xf32> to vector<1x8x128xf32>
    %cst_144 = arith.constant dense<0.000000e+00> : vector<1xf32>
    %791 = vector.multi_reduction <add>, %790, %cst_144 [1, 2] : vector<1x8x128xf32> to vector<1xf32>
    %792 = vector.shape_cast %791 : vector<1xf32> to vector<1x1x1xf32>
    %793 = vector.extract %792[0, 0, 0] : f32 from vector<1x1x1xf32>
    %cst_145 = arith.constant 9.765625E-4 : f32
    %794 = arith.mulf %788, %cst_145 : f32
    %cst_146 = arith.constant 9.765625E-4 : f32
    %795 = arith.mulf %793, %cst_146 : f32
    %796 = arith.mulf %794, %794 : f32
    %797 = arith.subf %795, %796 : f32
    %cst_147 = arith.constant 0.000000e+00 : f32
    %798 = arith.maximumf %797, %cst_147 : f32
    %799 = vector.broadcast %794 : f32 to vector<8x128xf32>
    %800 = arith.subf %609, %799 : vector<8x128xf32>
    %cst_148 = arith.constant 9.99999974E-6 : f32
    %801 = arith.addf %798, %cst_148 : f32
    %802 = math.rsqrt %801 : f32
    %803 = vector.broadcast %802 : f32 to vector<8x128xf32>
    %804 = arith.mulf %800, %803 : vector<8x128xf32>
    %cst_149 = arith.constant 0.000000e+00 : f32
    %805 = vector.broadcast %cst_149 : f32 to vector<8x128xf32>
    %806 = arith.cmpf ogt, %804, %805 : vector<8x128xf32>
    %cst_150 = arith.constant 0.00999999977 : f32
    %807 = vector.broadcast %cst_150 : f32 to vector<8x128xf32>
    %808 = arith.mulf %807, %804 : vector<8x128xf32>
    %809 = arith.select %806, %804, %808 : vector<8x128xi1>, vector<8x128xf32>
    %c0_i32_151 = arith.constant 0 : i32
    %810 = vector.broadcast %c0_i32_151 : i32 to vector<8x128xi32>
    %811 = arith.cmpi sgt, %39, %810 : vector<8x128xi32>
    %c1_i32_152 = arith.constant 1 : i32
    %812 = tpu.dynamic_rotate %634 by %c1_i32_152 dim 1 : vector<8x128xf32>, i32 -> vector<8x128xf32>
    %cst_153 = arith.constant 0.000000e+00 : f32
    %813 = vector.broadcast %cst_153 : f32 to vector<8x128xf32>
    %814 = arith.select %811, %812, %813 : vector<8x128xi1>, vector<8x128xf32>
    %c127_i32_154 = arith.constant 127 : i32
    %815 = vector.broadcast %c127_i32_154 : i32 to vector<8x128xi32>
    %816 = arith.cmpi slt, %39, %815 : vector<8x128xi32>
    %c127_i32_155 = arith.constant 127 : i32
    %817 = tpu.dynamic_rotate %634 by %c127_i32_155 dim 1 : vector<8x128xf32>, i32 -> vector<8x128xf32>
    %cst_156 = arith.constant 0.000000e+00 : f32
    %818 = vector.broadcast %cst_156 : f32 to vector<8x128xf32>
    %819 = arith.select %816, %817, %818 : vector<8x128xi1>, vector<8x128xf32>
    %c0_157 = arith.constant 0 : index
    %820 = memref.load %arg4[%c0_157] : memref<96xf32, #tpu.memory_space<smem>>
    %821 = vector.broadcast %820 : f32 to vector<8x128xf32>
    %822 = arith.mulf %821, %814 : vector<8x128xf32>
    %c1_158 = arith.constant 1 : index
    %823 = memref.load %arg4[%c1_158] : memref<96xf32, #tpu.memory_space<smem>>
    %824 = vector.broadcast %823 : f32 to vector<8x128xf32>
    %825 = arith.mulf %824, %634 : vector<8x128xf32>
    %826 = arith.addf %822, %825 : vector<8x128xf32>
    %c2_159 = arith.constant 2 : index
    %827 = memref.load %arg4[%c2_159] : memref<96xf32, #tpu.memory_space<smem>>
    %828 = vector.broadcast %827 : f32 to vector<8x128xf32>
    %829 = arith.mulf %828, %819 : vector<8x128xf32>
    %830 = arith.addf %826, %829 : vector<8x128xf32>
    %c24_160 = arith.constant 24 : index
    %831 = memref.load %arg4[%c24_160] : memref<96xf32, #tpu.memory_space<smem>>
    %832 = vector.broadcast %831 : f32 to vector<8x128xf32>
    %833 = arith.mulf %832, %814 : vector<8x128xf32>
    %c25_161 = arith.constant 25 : index
    %834 = memref.load %arg4[%c25_161] : memref<96xf32, #tpu.memory_space<smem>>
    %835 = vector.broadcast %834 : f32 to vector<8x128xf32>
    %836 = arith.mulf %835, %634 : vector<8x128xf32>
    %837 = arith.addf %833, %836 : vector<8x128xf32>
    %c26_162 = arith.constant 26 : index
    %838 = memref.load %arg4[%c26_162] : memref<96xf32, #tpu.memory_space<smem>>
    %839 = vector.broadcast %838 : f32 to vector<8x128xf32>
    %840 = arith.mulf %839, %819 : vector<8x128xf32>
    %841 = arith.addf %837, %840 : vector<8x128xf32>
    %c48_163 = arith.constant 48 : index
    %842 = memref.load %arg4[%c48_163] : memref<96xf32, #tpu.memory_space<smem>>
    %843 = vector.broadcast %842 : f32 to vector<8x128xf32>
    %844 = arith.mulf %843, %814 : vector<8x128xf32>
    %c49_164 = arith.constant 49 : index
    %845 = memref.load %arg4[%c49_164] : memref<96xf32, #tpu.memory_space<smem>>
    %846 = vector.broadcast %845 : f32 to vector<8x128xf32>
    %847 = arith.mulf %846, %634 : vector<8x128xf32>
    %848 = arith.addf %844, %847 : vector<8x128xf32>
    %c50_165 = arith.constant 50 : index
    %849 = memref.load %arg4[%c50_165] : memref<96xf32, #tpu.memory_space<smem>>
    %850 = vector.broadcast %849 : f32 to vector<8x128xf32>
    %851 = arith.mulf %850, %819 : vector<8x128xf32>
    %852 = arith.addf %848, %851 : vector<8x128xf32>
    %c72_166 = arith.constant 72 : index
    %853 = memref.load %arg4[%c72_166] : memref<96xf32, #tpu.memory_space<smem>>
    %854 = vector.broadcast %853 : f32 to vector<8x128xf32>
    %855 = arith.mulf %854, %814 : vector<8x128xf32>
    %c73_167 = arith.constant 73 : index
    %856 = memref.load %arg4[%c73_167] : memref<96xf32, #tpu.memory_space<smem>>
    %857 = vector.broadcast %856 : f32 to vector<8x128xf32>
    %858 = arith.mulf %857, %634 : vector<8x128xf32>
    %859 = arith.addf %855, %858 : vector<8x128xf32>
    %c74_168 = arith.constant 74 : index
    %860 = memref.load %arg4[%c74_168] : memref<96xf32, #tpu.memory_space<smem>>
    %861 = vector.broadcast %860 : f32 to vector<8x128xf32>
    %862 = arith.mulf %861, %819 : vector<8x128xf32>
    %863 = arith.addf %859, %862 : vector<8x128xf32>
    %c0_i32_169 = arith.constant 0 : i32
    %864 = vector.broadcast %c0_i32_169 : i32 to vector<8x128xi32>
    %865 = arith.cmpi sgt, %39, %864 : vector<8x128xi32>
    %c1_i32_170 = arith.constant 1 : i32
    %866 = tpu.dynamic_rotate %659 by %c1_i32_170 dim 1 : vector<8x128xf32>, i32 -> vector<8x128xf32>
    %cst_171 = arith.constant 0.000000e+00 : f32
    %867 = vector.broadcast %cst_171 : f32 to vector<8x128xf32>
    %868 = arith.select %865, %866, %867 : vector<8x128xi1>, vector<8x128xf32>
    %c127_i32_172 = arith.constant 127 : i32
    %869 = vector.broadcast %c127_i32_172 : i32 to vector<8x128xi32>
    %870 = arith.cmpi slt, %39, %869 : vector<8x128xi32>
    %c127_i32_173 = arith.constant 127 : i32
    %871 = tpu.dynamic_rotate %659 by %c127_i32_173 dim 1 : vector<8x128xf32>, i32 -> vector<8x128xf32>
    %cst_174 = arith.constant 0.000000e+00 : f32
    %872 = vector.broadcast %cst_174 : f32 to vector<8x128xf32>
    %873 = arith.select %870, %871, %872 : vector<8x128xi1>, vector<8x128xf32>
    %c3_175 = arith.constant 3 : index
    %874 = memref.load %arg4[%c3_175] : memref<96xf32, #tpu.memory_space<smem>>
    %875 = vector.broadcast %874 : f32 to vector<8x128xf32>
    %876 = arith.mulf %875, %868 : vector<8x128xf32>
    %c4_176 = arith.constant 4 : index
    %877 = memref.load %arg4[%c4_176] : memref<96xf32, #tpu.memory_space<smem>>
    %878 = vector.broadcast %877 : f32 to vector<8x128xf32>
    %879 = arith.mulf %878, %659 : vector<8x128xf32>
    %880 = arith.addf %876, %879 : vector<8x128xf32>
    %c5_177 = arith.constant 5 : index
    %881 = memref.load %arg4[%c5_177] : memref<96xf32, #tpu.memory_space<smem>>
    %882 = vector.broadcast %881 : f32 to vector<8x128xf32>
    %883 = arith.mulf %882, %873 : vector<8x128xf32>
    %884 = arith.addf %880, %883 : vector<8x128xf32>
    %885 = arith.addf %830, %884 : vector<8x128xf32>
    %c27_178 = arith.constant 27 : index
    %886 = memref.load %arg4[%c27_178] : memref<96xf32, #tpu.memory_space<smem>>
    %887 = vector.broadcast %886 : f32 to vector<8x128xf32>
    %888 = arith.mulf %887, %868 : vector<8x128xf32>
    %c28_179 = arith.constant 28 : index
    %889 = memref.load %arg4[%c28_179] : memref<96xf32, #tpu.memory_space<smem>>
    %890 = vector.broadcast %889 : f32 to vector<8x128xf32>
    %891 = arith.mulf %890, %659 : vector<8x128xf32>
    %892 = arith.addf %888, %891 : vector<8x128xf32>
    %c29_180 = arith.constant 29 : index
    %893 = memref.load %arg4[%c29_180] : memref<96xf32, #tpu.memory_space<smem>>
    %894 = vector.broadcast %893 : f32 to vector<8x128xf32>
    %895 = arith.mulf %894, %873 : vector<8x128xf32>
    %896 = arith.addf %892, %895 : vector<8x128xf32>
    %897 = arith.addf %841, %896 : vector<8x128xf32>
    %c51_181 = arith.constant 51 : index
    %898 = memref.load %arg4[%c51_181] : memref<96xf32, #tpu.memory_space<smem>>
    %899 = vector.broadcast %898 : f32 to vector<8x128xf32>
    %900 = arith.mulf %899, %868 : vector<8x128xf32>
    %c52_182 = arith.constant 52 : index
    %901 = memref.load %arg4[%c52_182] : memref<96xf32, #tpu.memory_space<smem>>
    %902 = vector.broadcast %901 : f32 to vector<8x128xf32>
    %903 = arith.mulf %902, %659 : vector<8x128xf32>
    %904 = arith.addf %900, %903 : vector<8x128xf32>
    %c53_183 = arith.constant 53 : index
    %905 = memref.load %arg4[%c53_183] : memref<96xf32, #tpu.memory_space<smem>>
    %906 = vector.broadcast %905 : f32 to vector<8x128xf32>
    %907 = arith.mulf %906, %873 : vector<8x128xf32>
    %908 = arith.addf %904, %907 : vector<8x128xf32>
    %909 = arith.addf %852, %908 : vector<8x128xf32>
    %c75_184 = arith.constant 75 : index
    %910 = memref.load %arg4[%c75_184] : memref<96xf32, #tpu.memory_space<smem>>
    %911 = vector.broadcast %910 : f32 to vector<8x128xf32>
    %912 = arith.mulf %911, %868 : vector<8x128xf32>
    %c76_185 = arith.constant 76 : index
    %913 = memref.load %arg4[%c76_185] : memref<96xf32, #tpu.memory_space<smem>>
    %914 = vector.broadcast %913 : f32 to vector<8x128xf32>
    %915 = arith.mulf %914, %659 : vector<8x128xf32>
    %916 = arith.addf %912, %915 : vector<8x128xf32>
    %c77_186 = arith.constant 77 : index
    %917 = memref.load %arg4[%c77_186] : memref<96xf32, #tpu.memory_space<smem>>
    %918 = vector.broadcast %917 : f32 to vector<8x128xf32>
    %919 = arith.mulf %918, %873 : vector<8x128xf32>
    %920 = arith.addf %916, %919 : vector<8x128xf32>
    %921 = arith.addf %863, %920 : vector<8x128xf32>
    %c0_i32_187 = arith.constant 0 : i32
    %922 = vector.broadcast %c0_i32_187 : i32 to vector<8x128xi32>
    %923 = arith.cmpi sgt, %39, %922 : vector<8x128xi32>
    %c1_i32_188 = arith.constant 1 : i32
    %924 = tpu.dynamic_rotate %684 by %c1_i32_188 dim 1 : vector<8x128xf32>, i32 -> vector<8x128xf32>
    %cst_189 = arith.constant 0.000000e+00 : f32
    %925 = vector.broadcast %cst_189 : f32 to vector<8x128xf32>
    %926 = arith.select %923, %924, %925 : vector<8x128xi1>, vector<8x128xf32>
    %c127_i32_190 = arith.constant 127 : i32
    %927 = vector.broadcast %c127_i32_190 : i32 to vector<8x128xi32>
    %928 = arith.cmpi slt, %39, %927 : vector<8x128xi32>
    %c127_i32_191 = arith.constant 127 : i32
    %929 = tpu.dynamic_rotate %684 by %c127_i32_191 dim 1 : vector<8x128xf32>, i32 -> vector<8x128xf32>
    %cst_192 = arith.constant 0.000000e+00 : f32
    %930 = vector.broadcast %cst_192 : f32 to vector<8x128xf32>
    %931 = arith.select %928, %929, %930 : vector<8x128xi1>, vector<8x128xf32>
    %c6_193 = arith.constant 6 : index
    %932 = memref.load %arg4[%c6_193] : memref<96xf32, #tpu.memory_space<smem>>
    %933 = vector.broadcast %932 : f32 to vector<8x128xf32>
    %934 = arith.mulf %933, %926 : vector<8x128xf32>
    %c7_194 = arith.constant 7 : index
    %935 = memref.load %arg4[%c7_194] : memref<96xf32, #tpu.memory_space<smem>>
    %936 = vector.broadcast %935 : f32 to vector<8x128xf32>
    %937 = arith.mulf %936, %684 : vector<8x128xf32>
    %938 = arith.addf %934, %937 : vector<8x128xf32>
    %c8_195 = arith.constant 8 : index
    %939 = memref.load %arg4[%c8_195] : memref<96xf32, #tpu.memory_space<smem>>
    %940 = vector.broadcast %939 : f32 to vector<8x128xf32>
    %941 = arith.mulf %940, %931 : vector<8x128xf32>
    %942 = arith.addf %938, %941 : vector<8x128xf32>
    %943 = arith.addf %885, %942 : vector<8x128xf32>
    %c30_196 = arith.constant 30 : index
    %944 = memref.load %arg4[%c30_196] : memref<96xf32, #tpu.memory_space<smem>>
    %945 = vector.broadcast %944 : f32 to vector<8x128xf32>
    %946 = arith.mulf %945, %926 : vector<8x128xf32>
    %c31_197 = arith.constant 31 : index
    %947 = memref.load %arg4[%c31_197] : memref<96xf32, #tpu.memory_space<smem>>
    %948 = vector.broadcast %947 : f32 to vector<8x128xf32>
    %949 = arith.mulf %948, %684 : vector<8x128xf32>
    %950 = arith.addf %946, %949 : vector<8x128xf32>
    %c32_198 = arith.constant 32 : index
    %951 = memref.load %arg4[%c32_198] : memref<96xf32, #tpu.memory_space<smem>>
    %952 = vector.broadcast %951 : f32 to vector<8x128xf32>
    %953 = arith.mulf %952, %931 : vector<8x128xf32>
    %954 = arith.addf %950, %953 : vector<8x128xf32>
    %955 = arith.addf %897, %954 : vector<8x128xf32>
    %c54_199 = arith.constant 54 : index
    %956 = memref.load %arg4[%c54_199] : memref<96xf32, #tpu.memory_space<smem>>
    %957 = vector.broadcast %956 : f32 to vector<8x128xf32>
    %958 = arith.mulf %957, %926 : vector<8x128xf32>
    %c55_200 = arith.constant 55 : index
    %959 = memref.load %arg4[%c55_200] : memref<96xf32, #tpu.memory_space<smem>>
    %960 = vector.broadcast %959 : f32 to vector<8x128xf32>
    %961 = arith.mulf %960, %684 : vector<8x128xf32>
    %962 = arith.addf %958, %961 : vector<8x128xf32>
    %c56_201 = arith.constant 56 : index
    %963 = memref.load %arg4[%c56_201] : memref<96xf32, #tpu.memory_space<smem>>
    %964 = vector.broadcast %963 : f32 to vector<8x128xf32>
    %965 = arith.mulf %964, %931 : vector<8x128xf32>
    %966 = arith.addf %962, %965 : vector<8x128xf32>
    %967 = arith.addf %909, %966 : vector<8x128xf32>
    %c78_202 = arith.constant 78 : index
    %968 = memref.load %arg4[%c78_202] : memref<96xf32, #tpu.memory_space<smem>>
    %969 = vector.broadcast %968 : f32 to vector<8x128xf32>
    %970 = arith.mulf %969, %926 : vector<8x128xf32>
    %c79_203 = arith.constant 79 : index
    %971 = memref.load %arg4[%c79_203] : memref<96xf32, #tpu.memory_space<smem>>
    %972 = vector.broadcast %971 : f32 to vector<8x128xf32>
    %973 = arith.mulf %972, %684 : vector<8x128xf32>
    %974 = arith.addf %970, %973 : vector<8x128xf32>
    %c80_204 = arith.constant 80 : index
    %975 = memref.load %arg4[%c80_204] : memref<96xf32, #tpu.memory_space<smem>>
    %976 = vector.broadcast %975 : f32 to vector<8x128xf32>
    %977 = arith.mulf %976, %931 : vector<8x128xf32>
    %978 = arith.addf %974, %977 : vector<8x128xf32>
    %979 = arith.addf %921, %978 : vector<8x128xf32>
    %c0_i32_205 = arith.constant 0 : i32
    %980 = vector.broadcast %c0_i32_205 : i32 to vector<8x128xi32>
    %981 = arith.cmpi sgt, %39, %980 : vector<8x128xi32>
    %c1_i32_206 = arith.constant 1 : i32
    %982 = tpu.dynamic_rotate %709 by %c1_i32_206 dim 1 : vector<8x128xf32>, i32 -> vector<8x128xf32>
    %cst_207 = arith.constant 0.000000e+00 : f32
    %983 = vector.broadcast %cst_207 : f32 to vector<8x128xf32>
    %984 = arith.select %981, %982, %983 : vector<8x128xi1>, vector<8x128xf32>
    %c127_i32_208 = arith.constant 127 : i32
    %985 = vector.broadcast %c127_i32_208 : i32 to vector<8x128xi32>
    %986 = arith.cmpi slt, %39, %985 : vector<8x128xi32>
    %c127_i32_209 = arith.constant 127 : i32
    %987 = tpu.dynamic_rotate %709 by %c127_i32_209 dim 1 : vector<8x128xf32>, i32 -> vector<8x128xf32>
    %cst_210 = arith.constant 0.000000e+00 : f32
    %988 = vector.broadcast %cst_210 : f32 to vector<8x128xf32>
    %989 = arith.select %986, %987, %988 : vector<8x128xi1>, vector<8x128xf32>
    %c9_211 = arith.constant 9 : index
    %990 = memref.load %arg4[%c9_211] : memref<96xf32, #tpu.memory_space<smem>>
    %991 = vector.broadcast %990 : f32 to vector<8x128xf32>
    %992 = arith.mulf %991, %984 : vector<8x128xf32>
    %c10_212 = arith.constant 10 : index
    %993 = memref.load %arg4[%c10_212] : memref<96xf32, #tpu.memory_space<smem>>
    %994 = vector.broadcast %993 : f32 to vector<8x128xf32>
    %995 = arith.mulf %994, %709 : vector<8x128xf32>
    %996 = arith.addf %992, %995 : vector<8x128xf32>
    %c11_213 = arith.constant 11 : index
    %997 = memref.load %arg4[%c11_213] : memref<96xf32, #tpu.memory_space<smem>>
    %998 = vector.broadcast %997 : f32 to vector<8x128xf32>
    %999 = arith.mulf %998, %989 : vector<8x128xf32>
    %1000 = arith.addf %996, %999 : vector<8x128xf32>
    %1001 = arith.addf %943, %1000 : vector<8x128xf32>
    %c33_214 = arith.constant 33 : index
    %1002 = memref.load %arg4[%c33_214] : memref<96xf32, #tpu.memory_space<smem>>
    %1003 = vector.broadcast %1002 : f32 to vector<8x128xf32>
    %1004 = arith.mulf %1003, %984 : vector<8x128xf32>
    %c34_215 = arith.constant 34 : index
    %1005 = memref.load %arg4[%c34_215] : memref<96xf32, #tpu.memory_space<smem>>
    %1006 = vector.broadcast %1005 : f32 to vector<8x128xf32>
    %1007 = arith.mulf %1006, %709 : vector<8x128xf32>
    %1008 = arith.addf %1004, %1007 : vector<8x128xf32>
    %c35_216 = arith.constant 35 : index
    %1009 = memref.load %arg4[%c35_216] : memref<96xf32, #tpu.memory_space<smem>>
    %1010 = vector.broadcast %1009 : f32 to vector<8x128xf32>
    %1011 = arith.mulf %1010, %989 : vector<8x128xf32>
    %1012 = arith.addf %1008, %1011 : vector<8x128xf32>
    %1013 = arith.addf %955, %1012 : vector<8x128xf32>
    %c57_217 = arith.constant 57 : index
    %1014 = memref.load %arg4[%c57_217] : memref<96xf32, #tpu.memory_space<smem>>
    %1015 = vector.broadcast %1014 : f32 to vector<8x128xf32>
    %1016 = arith.mulf %1015, %984 : vector<8x128xf32>
    %c58_218 = arith.constant 58 : index
    %1017 = memref.load %arg4[%c58_218] : memref<96xf32, #tpu.memory_space<smem>>
    %1018 = vector.broadcast %1017 : f32 to vector<8x128xf32>
    %1019 = arith.mulf %1018, %709 : vector<8x128xf32>
    %1020 = arith.addf %1016, %1019 : vector<8x128xf32>
    %c59_219 = arith.constant 59 : index
    %1021 = memref.load %arg4[%c59_219] : memref<96xf32, #tpu.memory_space<smem>>
    %1022 = vector.broadcast %1021 : f32 to vector<8x128xf32>
    %1023 = arith.mulf %1022, %989 : vector<8x128xf32>
    %1024 = arith.addf %1020, %1023 : vector<8x128xf32>
    %1025 = arith.addf %967, %1024 : vector<8x128xf32>
    %c81_220 = arith.constant 81 : index
    %1026 = memref.load %arg4[%c81_220] : memref<96xf32, #tpu.memory_space<smem>>
    %1027 = vector.broadcast %1026 : f32 to vector<8x128xf32>
    %1028 = arith.mulf %1027, %984 : vector<8x128xf32>
    %c82_221 = arith.constant 82 : index
    %1029 = memref.load %arg4[%c82_221] : memref<96xf32, #tpu.memory_space<smem>>
    %1030 = vector.broadcast %1029 : f32 to vector<8x128xf32>
    %1031 = arith.mulf %1030, %709 : vector<8x128xf32>
    %1032 = arith.addf %1028, %1031 : vector<8x128xf32>
    %c83_222 = arith.constant 83 : index
    %1033 = memref.load %arg4[%c83_222] : memref<96xf32, #tpu.memory_space<smem>>
    %1034 = vector.broadcast %1033 : f32 to vector<8x128xf32>
    %1035 = arith.mulf %1034, %989 : vector<8x128xf32>
    %1036 = arith.addf %1032, %1035 : vector<8x128xf32>
    %1037 = arith.addf %979, %1036 : vector<8x128xf32>
    %c0_i32_223 = arith.constant 0 : i32
    %1038 = vector.broadcast %c0_i32_223 : i32 to vector<8x128xi32>
    %1039 = arith.cmpi sgt, %39, %1038 : vector<8x128xi32>
    %c1_i32_224 = arith.constant 1 : i32
    %1040 = tpu.dynamic_rotate %734 by %c1_i32_224 dim 1 : vector<8x128xf32>, i32 -> vector<8x128xf32>
    %cst_225 = arith.constant 0.000000e+00 : f32
    %1041 = vector.broadcast %cst_225 : f32 to vector<8x128xf32>
    %1042 = arith.select %1039, %1040, %1041 : vector<8x128xi1>, vector<8x128xf32>
    %c127_i32_226 = arith.constant 127 : i32
    %1043 = vector.broadcast %c127_i32_226 : i32 to vector<8x128xi32>
    %1044 = arith.cmpi slt, %39, %1043 : vector<8x128xi32>
    %c127_i32_227 = arith.constant 127 : i32
    %1045 = tpu.dynamic_rotate %734 by %c127_i32_227 dim 1 : vector<8x128xf32>, i32 -> vector<8x128xf32>
    %cst_228 = arith.constant 0.000000e+00 : f32
    %1046 = vector.broadcast %cst_228 : f32 to vector<8x128xf32>
    %1047 = arith.select %1044, %1045, %1046 : vector<8x128xi1>, vector<8x128xf32>
    %c12_229 = arith.constant 12 : index
    %1048 = memref.load %arg4[%c12_229] : memref<96xf32, #tpu.memory_space<smem>>
    %1049 = vector.broadcast %1048 : f32 to vector<8x128xf32>
    %1050 = arith.mulf %1049, %1042 : vector<8x128xf32>
    %c13_230 = arith.constant 13 : index
    %1051 = memref.load %arg4[%c13_230] : memref<96xf32, #tpu.memory_space<smem>>
    %1052 = vector.broadcast %1051 : f32 to vector<8x128xf32>
    %1053 = arith.mulf %1052, %734 : vector<8x128xf32>
    %1054 = arith.addf %1050, %1053 : vector<8x128xf32>
    %c14_231 = arith.constant 14 : index
    %1055 = memref.load %arg4[%c14_231] : memref<96xf32, #tpu.memory_space<smem>>
    %1056 = vector.broadcast %1055 : f32 to vector<8x128xf32>
    %1057 = arith.mulf %1056, %1047 : vector<8x128xf32>
    %1058 = arith.addf %1054, %1057 : vector<8x128xf32>
    %1059 = arith.addf %1001, %1058 : vector<8x128xf32>
    %c36_232 = arith.constant 36 : index
    %1060 = memref.load %arg4[%c36_232] : memref<96xf32, #tpu.memory_space<smem>>
    %1061 = vector.broadcast %1060 : f32 to vector<8x128xf32>
    %1062 = arith.mulf %1061, %1042 : vector<8x128xf32>
    %c37_233 = arith.constant 37 : index
    %1063 = memref.load %arg4[%c37_233] : memref<96xf32, #tpu.memory_space<smem>>
    %1064 = vector.broadcast %1063 : f32 to vector<8x128xf32>
    %1065 = arith.mulf %1064, %734 : vector<8x128xf32>
    %1066 = arith.addf %1062, %1065 : vector<8x128xf32>
    %c38_234 = arith.constant 38 : index
    %1067 = memref.load %arg4[%c38_234] : memref<96xf32, #tpu.memory_space<smem>>
    %1068 = vector.broadcast %1067 : f32 to vector<8x128xf32>
    %1069 = arith.mulf %1068, %1047 : vector<8x128xf32>
    %1070 = arith.addf %1066, %1069 : vector<8x128xf32>
    %1071 = arith.addf %1013, %1070 : vector<8x128xf32>
    %c60_235 = arith.constant 60 : index
    %1072 = memref.load %arg4[%c60_235] : memref<96xf32, #tpu.memory_space<smem>>
    %1073 = vector.broadcast %1072 : f32 to vector<8x128xf32>
    %1074 = arith.mulf %1073, %1042 : vector<8x128xf32>
    %c61_236 = arith.constant 61 : index
    %1075 = memref.load %arg4[%c61_236] : memref<96xf32, #tpu.memory_space<smem>>
    %1076 = vector.broadcast %1075 : f32 to vector<8x128xf32>
    %1077 = arith.mulf %1076, %734 : vector<8x128xf32>
    %1078 = arith.addf %1074, %1077 : vector<8x128xf32>
    %c62_237 = arith.constant 62 : index
    %1079 = memref.load %arg4[%c62_237] : memref<96xf32, #tpu.memory_space<smem>>
    %1080 = vector.broadcast %1079 : f32 to vector<8x128xf32>
    %1081 = arith.mulf %1080, %1047 : vector<8x128xf32>
    %1082 = arith.addf %1078, %1081 : vector<8x128xf32>
    %1083 = arith.addf %1025, %1082 : vector<8x128xf32>
    %c84_238 = arith.constant 84 : index
    %1084 = memref.load %arg4[%c84_238] : memref<96xf32, #tpu.memory_space<smem>>
    %1085 = vector.broadcast %1084 : f32 to vector<8x128xf32>
    %1086 = arith.mulf %1085, %1042 : vector<8x128xf32>
    %c85_239 = arith.constant 85 : index
    %1087 = memref.load %arg4[%c85_239] : memref<96xf32, #tpu.memory_space<smem>>
    %1088 = vector.broadcast %1087 : f32 to vector<8x128xf32>
    %1089 = arith.mulf %1088, %734 : vector<8x128xf32>
    %1090 = arith.addf %1086, %1089 : vector<8x128xf32>
    %c86_240 = arith.constant 86 : index
    %1091 = memref.load %arg4[%c86_240] : memref<96xf32, #tpu.memory_space<smem>>
    %1092 = vector.broadcast %1091 : f32 to vector<8x128xf32>
    %1093 = arith.mulf %1092, %1047 : vector<8x128xf32>
    %1094 = arith.addf %1090, %1093 : vector<8x128xf32>
    %1095 = arith.addf %1037, %1094 : vector<8x128xf32>
    %c0_i32_241 = arith.constant 0 : i32
    %1096 = vector.broadcast %c0_i32_241 : i32 to vector<8x128xi32>
    %1097 = arith.cmpi sgt, %39, %1096 : vector<8x128xi32>
    %c1_i32_242 = arith.constant 1 : i32
    %1098 = tpu.dynamic_rotate %759 by %c1_i32_242 dim 1 : vector<8x128xf32>, i32 -> vector<8x128xf32>
    %cst_243 = arith.constant 0.000000e+00 : f32
    %1099 = vector.broadcast %cst_243 : f32 to vector<8x128xf32>
    %1100 = arith.select %1097, %1098, %1099 : vector<8x128xi1>, vector<8x128xf32>
    %c127_i32_244 = arith.constant 127 : i32
    %1101 = vector.broadcast %c127_i32_244 : i32 to vector<8x128xi32>
    %1102 = arith.cmpi slt, %39, %1101 : vector<8x128xi32>
    %c127_i32_245 = arith.constant 127 : i32
    %1103 = tpu.dynamic_rotate %759 by %c127_i32_245 dim 1 : vector<8x128xf32>, i32 -> vector<8x128xf32>
    %cst_246 = arith.constant 0.000000e+00 : f32
    %1104 = vector.broadcast %cst_246 : f32 to vector<8x128xf32>
    %1105 = arith.select %1102, %1103, %1104 : vector<8x128xi1>, vector<8x128xf32>
    %c15_247 = arith.constant 15 : index
    %1106 = memref.load %arg4[%c15_247] : memref<96xf32, #tpu.memory_space<smem>>
    %1107 = vector.broadcast %1106 : f32 to vector<8x128xf32>
    %1108 = arith.mulf %1107, %1100 : vector<8x128xf32>
    %c16_248 = arith.constant 16 : index
    %1109 = memref.load %arg4[%c16_248] : memref<96xf32, #tpu.memory_space<smem>>
    %1110 = vector.broadcast %1109 : f32 to vector<8x128xf32>
    %1111 = arith.mulf %1110, %759 : vector<8x128xf32>
    %1112 = arith.addf %1108, %1111 : vector<8x128xf32>
    %c17_249 = arith.constant 17 : index
    %1113 = memref.load %arg4[%c17_249] : memref<96xf32, #tpu.memory_space<smem>>
    %1114 = vector.broadcast %1113 : f32 to vector<8x128xf32>
    %1115 = arith.mulf %1114, %1105 : vector<8x128xf32>
    %1116 = arith.addf %1112, %1115 : vector<8x128xf32>
    %1117 = arith.addf %1059, %1116 : vector<8x128xf32>
    %c39_250 = arith.constant 39 : index
    %1118 = memref.load %arg4[%c39_250] : memref<96xf32, #tpu.memory_space<smem>>
    %1119 = vector.broadcast %1118 : f32 to vector<8x128xf32>
    %1120 = arith.mulf %1119, %1100 : vector<8x128xf32>
    %c40_251 = arith.constant 40 : index
    %1121 = memref.load %arg4[%c40_251] : memref<96xf32, #tpu.memory_space<smem>>
    %1122 = vector.broadcast %1121 : f32 to vector<8x128xf32>
    %1123 = arith.mulf %1122, %759 : vector<8x128xf32>
    %1124 = arith.addf %1120, %1123 : vector<8x128xf32>
    %c41_252 = arith.constant 41 : index
    %1125 = memref.load %arg4[%c41_252] : memref<96xf32, #tpu.memory_space<smem>>
    %1126 = vector.broadcast %1125 : f32 to vector<8x128xf32>
    %1127 = arith.mulf %1126, %1105 : vector<8x128xf32>
    %1128 = arith.addf %1124, %1127 : vector<8x128xf32>
    %1129 = arith.addf %1071, %1128 : vector<8x128xf32>
    %c63_253 = arith.constant 63 : index
    %1130 = memref.load %arg4[%c63_253] : memref<96xf32, #tpu.memory_space<smem>>
    %1131 = vector.broadcast %1130 : f32 to vector<8x128xf32>
    %1132 = arith.mulf %1131, %1100 : vector<8x128xf32>
    %c64_254 = arith.constant 64 : index
    %1133 = memref.load %arg4[%c64_254] : memref<96xf32, #tpu.memory_space<smem>>
    %1134 = vector.broadcast %1133 : f32 to vector<8x128xf32>
    %1135 = arith.mulf %1134, %759 : vector<8x128xf32>
    %1136 = arith.addf %1132, %1135 : vector<8x128xf32>
    %c65_255 = arith.constant 65 : index
    %1137 = memref.load %arg4[%c65_255] : memref<96xf32, #tpu.memory_space<smem>>
    %1138 = vector.broadcast %1137 : f32 to vector<8x128xf32>
    %1139 = arith.mulf %1138, %1105 : vector<8x128xf32>
    %1140 = arith.addf %1136, %1139 : vector<8x128xf32>
    %1141 = arith.addf %1083, %1140 : vector<8x128xf32>
    %c87_256 = arith.constant 87 : index
    %1142 = memref.load %arg4[%c87_256] : memref<96xf32, #tpu.memory_space<smem>>
    %1143 = vector.broadcast %1142 : f32 to vector<8x128xf32>
    %1144 = arith.mulf %1143, %1100 : vector<8x128xf32>
    %c88_257 = arith.constant 88 : index
    %1145 = memref.load %arg4[%c88_257] : memref<96xf32, #tpu.memory_space<smem>>
    %1146 = vector.broadcast %1145 : f32 to vector<8x128xf32>
    %1147 = arith.mulf %1146, %759 : vector<8x128xf32>
    %1148 = arith.addf %1144, %1147 : vector<8x128xf32>
    %c89_258 = arith.constant 89 : index
    %1149 = memref.load %arg4[%c89_258] : memref<96xf32, #tpu.memory_space<smem>>
    %1150 = vector.broadcast %1149 : f32 to vector<8x128xf32>
    %1151 = arith.mulf %1150, %1105 : vector<8x128xf32>
    %1152 = arith.addf %1148, %1151 : vector<8x128xf32>
    %1153 = arith.addf %1095, %1152 : vector<8x128xf32>
    %c0_i32_259 = arith.constant 0 : i32
    %1154 = vector.broadcast %c0_i32_259 : i32 to vector<8x128xi32>
    %1155 = arith.cmpi sgt, %39, %1154 : vector<8x128xi32>
    %c1_i32_260 = arith.constant 1 : i32
    %1156 = tpu.dynamic_rotate %784 by %c1_i32_260 dim 1 : vector<8x128xf32>, i32 -> vector<8x128xf32>
    %cst_261 = arith.constant 0.000000e+00 : f32
    %1157 = vector.broadcast %cst_261 : f32 to vector<8x128xf32>
    %1158 = arith.select %1155, %1156, %1157 : vector<8x128xi1>, vector<8x128xf32>
    %c127_i32_262 = arith.constant 127 : i32
    %1159 = vector.broadcast %c127_i32_262 : i32 to vector<8x128xi32>
    %1160 = arith.cmpi slt, %39, %1159 : vector<8x128xi32>
    %c127_i32_263 = arith.constant 127 : i32
    %1161 = tpu.dynamic_rotate %784 by %c127_i32_263 dim 1 : vector<8x128xf32>, i32 -> vector<8x128xf32>
    %cst_264 = arith.constant 0.000000e+00 : f32
    %1162 = vector.broadcast %cst_264 : f32 to vector<8x128xf32>
    %1163 = arith.select %1160, %1161, %1162 : vector<8x128xi1>, vector<8x128xf32>
    %c18_265 = arith.constant 18 : index
    %1164 = memref.load %arg4[%c18_265] : memref<96xf32, #tpu.memory_space<smem>>
    %1165 = vector.broadcast %1164 : f32 to vector<8x128xf32>
    %1166 = arith.mulf %1165, %1158 : vector<8x128xf32>
    %c19_266 = arith.constant 19 : index
    %1167 = memref.load %arg4[%c19_266] : memref<96xf32, #tpu.memory_space<smem>>
    %1168 = vector.broadcast %1167 : f32 to vector<8x128xf32>
    %1169 = arith.mulf %1168, %784 : vector<8x128xf32>
    %1170 = arith.addf %1166, %1169 : vector<8x128xf32>
    %c20_267 = arith.constant 20 : index
    %1171 = memref.load %arg4[%c20_267] : memref<96xf32, #tpu.memory_space<smem>>
    %1172 = vector.broadcast %1171 : f32 to vector<8x128xf32>
    %1173 = arith.mulf %1172, %1163 : vector<8x128xf32>
    %1174 = arith.addf %1170, %1173 : vector<8x128xf32>
    %1175 = arith.addf %1117, %1174 : vector<8x128xf32>
    %c42_268 = arith.constant 42 : index
    %1176 = memref.load %arg4[%c42_268] : memref<96xf32, #tpu.memory_space<smem>>
    %1177 = vector.broadcast %1176 : f32 to vector<8x128xf32>
    %1178 = arith.mulf %1177, %1158 : vector<8x128xf32>
    %c43_269 = arith.constant 43 : index
    %1179 = memref.load %arg4[%c43_269] : memref<96xf32, #tpu.memory_space<smem>>
    %1180 = vector.broadcast %1179 : f32 to vector<8x128xf32>
    %1181 = arith.mulf %1180, %784 : vector<8x128xf32>
    %1182 = arith.addf %1178, %1181 : vector<8x128xf32>
    %c44_270 = arith.constant 44 : index
    %1183 = memref.load %arg4[%c44_270] : memref<96xf32, #tpu.memory_space<smem>>
    %1184 = vector.broadcast %1183 : f32 to vector<8x128xf32>
    %1185 = arith.mulf %1184, %1163 : vector<8x128xf32>
    %1186 = arith.addf %1182, %1185 : vector<8x128xf32>
    %1187 = arith.addf %1129, %1186 : vector<8x128xf32>
    %c66_271 = arith.constant 66 : index
    %1188 = memref.load %arg4[%c66_271] : memref<96xf32, #tpu.memory_space<smem>>
    %1189 = vector.broadcast %1188 : f32 to vector<8x128xf32>
    %1190 = arith.mulf %1189, %1158 : vector<8x128xf32>
    %c67_272 = arith.constant 67 : index
    %1191 = memref.load %arg4[%c67_272] : memref<96xf32, #tpu.memory_space<smem>>
    %1192 = vector.broadcast %1191 : f32 to vector<8x128xf32>
    %1193 = arith.mulf %1192, %784 : vector<8x128xf32>
    %1194 = arith.addf %1190, %1193 : vector<8x128xf32>
    %c68_273 = arith.constant 68 : index
    %1195 = memref.load %arg4[%c68_273] : memref<96xf32, #tpu.memory_space<smem>>
    %1196 = vector.broadcast %1195 : f32 to vector<8x128xf32>
    %1197 = arith.mulf %1196, %1163 : vector<8x128xf32>
    %1198 = arith.addf %1194, %1197 : vector<8x128xf32>
    %1199 = arith.addf %1141, %1198 : vector<8x128xf32>
    %c90_274 = arith.constant 90 : index
    %1200 = memref.load %arg4[%c90_274] : memref<96xf32, #tpu.memory_space<smem>>
    %1201 = vector.broadcast %1200 : f32 to vector<8x128xf32>
    %1202 = arith.mulf %1201, %1158 : vector<8x128xf32>
    %c91_275 = arith.constant 91 : index
    %1203 = memref.load %arg4[%c91_275] : memref<96xf32, #tpu.memory_space<smem>>
    %1204 = vector.broadcast %1203 : f32 to vector<8x128xf32>
    %1205 = arith.mulf %1204, %784 : vector<8x128xf32>
    %1206 = arith.addf %1202, %1205 : vector<8x128xf32>
    %c92_276 = arith.constant 92 : index
    %1207 = memref.load %arg4[%c92_276] : memref<96xf32, #tpu.memory_space<smem>>
    %1208 = vector.broadcast %1207 : f32 to vector<8x128xf32>
    %1209 = arith.mulf %1208, %1163 : vector<8x128xf32>
    %1210 = arith.addf %1206, %1209 : vector<8x128xf32>
    %1211 = arith.addf %1153, %1210 : vector<8x128xf32>
    %c0_i32_277 = arith.constant 0 : i32
    %1212 = vector.broadcast %c0_i32_277 : i32 to vector<8x128xi32>
    %1213 = arith.cmpi sgt, %39, %1212 : vector<8x128xi32>
    %c1_i32_278 = arith.constant 1 : i32
    %1214 = tpu.dynamic_rotate %809 by %c1_i32_278 dim 1 : vector<8x128xf32>, i32 -> vector<8x128xf32>
    %cst_279 = arith.constant 0.000000e+00 : f32
    %1215 = vector.broadcast %cst_279 : f32 to vector<8x128xf32>
    %1216 = arith.select %1213, %1214, %1215 : vector<8x128xi1>, vector<8x128xf32>
    %c127_i32_280 = arith.constant 127 : i32
    %1217 = vector.broadcast %c127_i32_280 : i32 to vector<8x128xi32>
    %1218 = arith.cmpi slt, %39, %1217 : vector<8x128xi32>
    %c127_i32_281 = arith.constant 127 : i32
    %1219 = tpu.dynamic_rotate %809 by %c127_i32_281 dim 1 : vector<8x128xf32>, i32 -> vector<8x128xf32>
    %cst_282 = arith.constant 0.000000e+00 : f32
    %1220 = vector.broadcast %cst_282 : f32 to vector<8x128xf32>
    %1221 = arith.select %1218, %1219, %1220 : vector<8x128xi1>, vector<8x128xf32>
    %c21_283 = arith.constant 21 : index
    %1222 = memref.load %arg4[%c21_283] : memref<96xf32, #tpu.memory_space<smem>>
    %1223 = vector.broadcast %1222 : f32 to vector<8x128xf32>
    %1224 = arith.mulf %1223, %1216 : vector<8x128xf32>
    %c22_284 = arith.constant 22 : index
    %1225 = memref.load %arg4[%c22_284] : memref<96xf32, #tpu.memory_space<smem>>
    %1226 = vector.broadcast %1225 : f32 to vector<8x128xf32>
    %1227 = arith.mulf %1226, %809 : vector<8x128xf32>
    %1228 = arith.addf %1224, %1227 : vector<8x128xf32>
    %c23_285 = arith.constant 23 : index
    %1229 = memref.load %arg4[%c23_285] : memref<96xf32, #tpu.memory_space<smem>>
    %1230 = vector.broadcast %1229 : f32 to vector<8x128xf32>
    %1231 = arith.mulf %1230, %1221 : vector<8x128xf32>
    %1232 = arith.addf %1228, %1231 : vector<8x128xf32>
    %1233 = arith.addf %1175, %1232 : vector<8x128xf32>
    %c45_286 = arith.constant 45 : index
    %1234 = memref.load %arg4[%c45_286] : memref<96xf32, #tpu.memory_space<smem>>
    %1235 = vector.broadcast %1234 : f32 to vector<8x128xf32>
    %1236 = arith.mulf %1235, %1216 : vector<8x128xf32>
    %c46_287 = arith.constant 46 : index
    %1237 = memref.load %arg4[%c46_287] : memref<96xf32, #tpu.memory_space<smem>>
    %1238 = vector.broadcast %1237 : f32 to vector<8x128xf32>
    %1239 = arith.mulf %1238, %809 : vector<8x128xf32>
    %1240 = arith.addf %1236, %1239 : vector<8x128xf32>
    %c47_288 = arith.constant 47 : index
    %1241 = memref.load %arg4[%c47_288] : memref<96xf32, #tpu.memory_space<smem>>
    %1242 = vector.broadcast %1241 : f32 to vector<8x128xf32>
    %1243 = arith.mulf %1242, %1221 : vector<8x128xf32>
    %1244 = arith.addf %1240, %1243 : vector<8x128xf32>
    %1245 = arith.addf %1187, %1244 : vector<8x128xf32>
    %c69_289 = arith.constant 69 : index
    %1246 = memref.load %arg4[%c69_289] : memref<96xf32, #tpu.memory_space<smem>>
    %1247 = vector.broadcast %1246 : f32 to vector<8x128xf32>
    %1248 = arith.mulf %1247, %1216 : vector<8x128xf32>
    %c70_290 = arith.constant 70 : index
    %1249 = memref.load %arg4[%c70_290] : memref<96xf32, #tpu.memory_space<smem>>
    %1250 = vector.broadcast %1249 : f32 to vector<8x128xf32>
    %1251 = arith.mulf %1250, %809 : vector<8x128xf32>
    %1252 = arith.addf %1248, %1251 : vector<8x128xf32>
    %c71_291 = arith.constant 71 : index
    %1253 = memref.load %arg4[%c71_291] : memref<96xf32, #tpu.memory_space<smem>>
    %1254 = vector.broadcast %1253 : f32 to vector<8x128xf32>
    %1255 = arith.mulf %1254, %1221 : vector<8x128xf32>
    %1256 = arith.addf %1252, %1255 : vector<8x128xf32>
    %1257 = arith.addf %1199, %1256 : vector<8x128xf32>
    %c93_292 = arith.constant 93 : index
    %1258 = memref.load %arg4[%c93_292] : memref<96xf32, #tpu.memory_space<smem>>
    %1259 = vector.broadcast %1258 : f32 to vector<8x128xf32>
    %1260 = arith.mulf %1259, %1216 : vector<8x128xf32>
    %c94_293 = arith.constant 94 : index
    %1261 = memref.load %arg4[%c94_293] : memref<96xf32, #tpu.memory_space<smem>>
    %1262 = vector.broadcast %1261 : f32 to vector<8x128xf32>
    %1263 = arith.mulf %1262, %809 : vector<8x128xf32>
    %1264 = arith.addf %1260, %1263 : vector<8x128xf32>
    %c95_294 = arith.constant 95 : index
    %1265 = memref.load %arg4[%c95_294] : memref<96xf32, #tpu.memory_space<smem>>
    %1266 = vector.broadcast %1265 : f32 to vector<8x128xf32>
    %1267 = arith.mulf %1266, %1221 : vector<8x128xf32>
    %1268 = arith.addf %1264, %1267 : vector<8x128xf32>
    %1269 = arith.addf %1211, %1268 : vector<8x128xf32>
    %1270 = vector.shape_cast %1233 : vector<8x128xf32> to vector<1x8x128xf32>
    %cst_295 = arith.constant dense<0.000000e+00> : vector<1xf32>
    %1271 = vector.multi_reduction <add>, %1270, %cst_295 [1, 2] : vector<1x8x128xf32> to vector<1xf32>
    %1272 = vector.shape_cast %1271 : vector<1xf32> to vector<1x1x1xf32>
    %1273 = vector.extract %1272[0, 0, 0] : f32 from vector<1x1x1xf32>
    %1274 = arith.mulf %1233, %1233 : vector<8x128xf32>
    %1275 = vector.shape_cast %1274 : vector<8x128xf32> to vector<1x8x128xf32>
    %cst_296 = arith.constant dense<0.000000e+00> : vector<1xf32>
    %1276 = vector.multi_reduction <add>, %1275, %cst_296 [1, 2] : vector<1x8x128xf32> to vector<1xf32>
    %1277 = vector.shape_cast %1276 : vector<1xf32> to vector<1x1x1xf32>
    %1278 = vector.extract %1277[0, 0, 0] : f32 from vector<1x1x1xf32>
    %cst_297 = arith.constant 9.765625E-4 : f32
    %1279 = arith.mulf %1273, %cst_297 : f32
    %cst_298 = arith.constant 9.765625E-4 : f32
    %1280 = arith.mulf %1278, %cst_298 : f32
    %1281 = arith.mulf %1279, %1279 : f32
    %1282 = arith.subf %1280, %1281 : f32
    %cst_299 = arith.constant 0.000000e+00 : f32
    %1283 = arith.maximumf %1282, %cst_299 : f32
    %1284 = vector.broadcast %1279 : f32 to vector<8x128xf32>
    %1285 = arith.subf %1233, %1284 : vector<8x128xf32>
    %cst_300 = arith.constant 9.99999974E-6 : f32
    %1286 = arith.addf %1283, %cst_300 : f32
    %1287 = math.rsqrt %1286 : f32
    %1288 = vector.broadcast %1287 : f32 to vector<8x128xf32>
    %1289 = arith.mulf %1285, %1288 : vector<8x128xf32>
    %cst_301 = arith.constant 0.000000e+00 : f32
    %1290 = vector.broadcast %cst_301 : f32 to vector<8x128xf32>
    %1291 = arith.cmpf ogt, %1289, %1290 : vector<8x128xf32>
    %cst_302 = arith.constant 0.00999999977 : f32
    %1292 = vector.broadcast %cst_302 : f32 to vector<8x128xf32>
    %1293 = arith.mulf %1292, %1289 : vector<8x128xf32>
    %1294 = arith.select %1291, %1289, %1293 : vector<8x128xi1>, vector<8x128xf32>
    %1295 = vector.shape_cast %1245 : vector<8x128xf32> to vector<1x8x128xf32>
    %cst_303 = arith.constant dense<0.000000e+00> : vector<1xf32>
    %1296 = vector.multi_reduction <add>, %1295, %cst_303 [1, 2] : vector<1x8x128xf32> to vector<1xf32>
    %1297 = vector.shape_cast %1296 : vector<1xf32> to vector<1x1x1xf32>
    %1298 = vector.extract %1297[0, 0, 0] : f32 from vector<1x1x1xf32>
    %1299 = arith.mulf %1245, %1245 : vector<8x128xf32>
    %1300 = vector.shape_cast %1299 : vector<8x128xf32> to vector<1x8x128xf32>
    %cst_304 = arith.constant dense<0.000000e+00> : vector<1xf32>
    %1301 = vector.multi_reduction <add>, %1300, %cst_304 [1, 2] : vector<1x8x128xf32> to vector<1xf32>
    %1302 = vector.shape_cast %1301 : vector<1xf32> to vector<1x1x1xf32>
    %1303 = vector.extract %1302[0, 0, 0] : f32 from vector<1x1x1xf32>
    %cst_305 = arith.constant 9.765625E-4 : f32
    %1304 = arith.mulf %1298, %cst_305 : f32
    %cst_306 = arith.constant 9.765625E-4 : f32
    %1305 = arith.mulf %1303, %cst_306 : f32
    %1306 = arith.mulf %1304, %1304 : f32
    %1307 = arith.subf %1305, %1306 : f32
    %cst_307 = arith.constant 0.000000e+00 : f32
    %1308 = arith.maximumf %1307, %cst_307 : f32
    %1309 = vector.broadcast %1304 : f32 to vector<8x128xf32>
    %1310 = arith.subf %1245, %1309 : vector<8x128xf32>
    %cst_308 = arith.constant 9.99999974E-6 : f32
    %1311 = arith.addf %1308, %cst_308 : f32
    %1312 = math.rsqrt %1311 : f32
    %1313 = vector.broadcast %1312 : f32 to vector<8x128xf32>
    %1314 = arith.mulf %1310, %1313 : vector<8x128xf32>
    %cst_309 = arith.constant 0.000000e+00 : f32
    %1315 = vector.broadcast %cst_309 : f32 to vector<8x128xf32>
    %1316 = arith.cmpf ogt, %1314, %1315 : vector<8x128xf32>
    %cst_310 = arith.constant 0.00999999977 : f32
    %1317 = vector.broadcast %cst_310 : f32 to vector<8x128xf32>
    %1318 = arith.mulf %1317, %1314 : vector<8x128xf32>
    %1319 = arith.select %1316, %1314, %1318 : vector<8x128xi1>, vector<8x128xf32>
    %1320 = vector.shape_cast %1257 : vector<8x128xf32> to vector<1x8x128xf32>
    %cst_311 = arith.constant dense<0.000000e+00> : vector<1xf32>
    %1321 = vector.multi_reduction <add>, %1320, %cst_311 [1, 2] : vector<1x8x128xf32> to vector<1xf32>
    %1322 = vector.shape_cast %1321 : vector<1xf32> to vector<1x1x1xf32>
    %1323 = vector.extract %1322[0, 0, 0] : f32 from vector<1x1x1xf32>
    %1324 = arith.mulf %1257, %1257 : vector<8x128xf32>
    %1325 = vector.shape_cast %1324 : vector<8x128xf32> to vector<1x8x128xf32>
    %cst_312 = arith.constant dense<0.000000e+00> : vector<1xf32>
    %1326 = vector.multi_reduction <add>, %1325, %cst_312 [1, 2] : vector<1x8x128xf32> to vector<1xf32>
    %1327 = vector.shape_cast %1326 : vector<1xf32> to vector<1x1x1xf32>
    %1328 = vector.extract %1327[0, 0, 0] : f32 from vector<1x1x1xf32>
    %cst_313 = arith.constant 9.765625E-4 : f32
    %1329 = arith.mulf %1323, %cst_313 : f32
    %cst_314 = arith.constant 9.765625E-4 : f32
    %1330 = arith.mulf %1328, %cst_314 : f32
    %1331 = arith.mulf %1329, %1329 : f32
    %1332 = arith.subf %1330, %1331 : f32
    %cst_315 = arith.constant 0.000000e+00 : f32
    %1333 = arith.maximumf %1332, %cst_315 : f32
    %1334 = vector.broadcast %1329 : f32 to vector<8x128xf32>
    %1335 = arith.subf %1257, %1334 : vector<8x128xf32>
    %cst_316 = arith.constant 9.99999974E-6 : f32
    %1336 = arith.addf %1333, %cst_316 : f32
    %1337 = math.rsqrt %1336 : f32
    %1338 = vector.broadcast %1337 : f32 to vector<8x128xf32>
    %1339 = arith.mulf %1335, %1338 : vector<8x128xf32>
    %cst_317 = arith.constant 0.000000e+00 : f32
    %1340 = vector.broadcast %cst_317 : f32 to vector<8x128xf32>
    %1341 = arith.cmpf ogt, %1339, %1340 : vector<8x128xf32>
    %cst_318 = arith.constant 0.00999999977 : f32
    %1342 = vector.broadcast %cst_318 : f32 to vector<8x128xf32>
    %1343 = arith.mulf %1342, %1339 : vector<8x128xf32>
    %1344 = arith.select %1341, %1339, %1343 : vector<8x128xi1>, vector<8x128xf32>
    %1345 = vector.shape_cast %1269 : vector<8x128xf32> to vector<1x8x128xf32>
    %cst_319 = arith.constant dense<0.000000e+00> : vector<1xf32>
    %1346 = vector.multi_reduction <add>, %1345, %cst_319 [1, 2] : vector<1x8x128xf32> to vector<1xf32>
    %1347 = vector.shape_cast %1346 : vector<1xf32> to vector<1x1x1xf32>
    %1348 = vector.extract %1347[0, 0, 0] : f32 from vector<1x1x1xf32>
    %1349 = arith.mulf %1269, %1269 : vector<8x128xf32>
    %1350 = vector.shape_cast %1349 : vector<8x128xf32> to vector<1x8x128xf32>
    %cst_320 = arith.constant dense<0.000000e+00> : vector<1xf32>
    %1351 = vector.multi_reduction <add>, %1350, %cst_320 [1, 2] : vector<1x8x128xf32> to vector<1xf32>
    %1352 = vector.shape_cast %1351 : vector<1xf32> to vector<1x1x1xf32>
    %1353 = vector.extract %1352[0, 0, 0] : f32 from vector<1x1x1xf32>
    %cst_321 = arith.constant 9.765625E-4 : f32
    %1354 = arith.mulf %1348, %cst_321 : f32
    %cst_322 = arith.constant 9.765625E-4 : f32
    %1355 = arith.mulf %1353, %cst_322 : f32
    %1356 = arith.mulf %1354, %1354 : f32
    %1357 = arith.subf %1355, %1356 : f32
    %cst_323 = arith.constant 0.000000e+00 : f32
    %1358 = arith.maximumf %1357, %cst_323 : f32
    %1359 = vector.broadcast %1354 : f32 to vector<8x128xf32>
    %1360 = arith.subf %1269, %1359 : vector<8x128xf32>
    %cst_324 = arith.constant 9.99999974E-6 : f32
    %1361 = arith.addf %1358, %cst_324 : f32
    %1362 = math.rsqrt %1361 : f32
    %1363 = vector.broadcast %1362 : f32 to vector<8x128xf32>
    %1364 = arith.mulf %1360, %1363 : vector<8x128xf32>
    %cst_325 = arith.constant 0.000000e+00 : f32
    %1365 = vector.broadcast %cst_325 : f32 to vector<8x128xf32>
    %1366 = arith.cmpf ogt, %1364, %1365 : vector<8x128xf32>
    %cst_326 = arith.constant 0.00999999977 : f32
    %1367 = vector.broadcast %cst_326 : f32 to vector<8x128xf32>
    %1368 = arith.mulf %1367, %1364 : vector<8x128xf32>
    %1369 = arith.select %1366, %1364, %1368 : vector<8x128xi1>, vector<8x128xf32>
    %1370 = tpu.concatenate %1294, %1319, %1344, %1369 in 1 : vector<8x128xf32>, vector<8x128xf32>, vector<8x128xf32>, vector<8x128xf32> -> vector<8x512xf32>
    %c0_327 = arith.constant 0 : index
    %c0_328 = arith.constant 0 : index
    %1371 = vector.load %arg5[%c0_327, %c0_328] : memref<512x128xf32, #tpu.memory_space<vmem>>, vector<512x128xf32>
    %cst_329 = arith.constant dense<0.000000e+00> : vector<8x128xf32>
    %1372 = tpu.matmul %1370, %1371, %cst_329 {dimension_numbers = #tpu.dot_dimension_numbers<[1], [0], [0], [1], [0, 0, 1, 1], [], []>} : vector<8x512xf32>, vector<512x128xf32>, vector<8x128xf32> -> vector<8x128xf32>
    %c0_330 = arith.constant 0 : index
    %c0_331 = arith.constant 0 : index
    %1373 = vector.load %arg6[%c0_330, %c0_331] : memref<1x128xf32, #tpu.memory_space<vmem>>, vector<1x128xf32>
    %1374 = vector.broadcast %1373 : vector<1x128xf32> to vector<8x128xf32>
    %1375 = arith.addf %1372, %1374 : vector<8x128xf32>
    %1376 = arith.mulf %36, %1375 : vector<8x128xf32>
    %cst_332 = arith.constant 1.000000e+00 : f32
    %1377 = vector.broadcast %cst_332 : f32 to vector<8x128xf32>
    %1378 = arith.subf %1377, %36 : vector<8x128xf32>
    %1379 = arith.mulf %1378, %0 : vector<8x128xf32>
    %1380 = arith.addf %1376, %1379 : vector<8x128xf32>
    %c0_333 = arith.constant 0 : index
    %c0_334 = arith.constant 0 : index
    %1381 = vector.load %arg7[%c0_333, %c0_334] : memref<8x128xf32, #tpu.memory_space<vmem>>, vector<8x128xf32>
    tpu.vector_store %arg7[%c0_333, %c0_334], %1380 {strides = array<i32>} : memref<8x128xf32, #tpu.memory_space<vmem>>, vector<8x128xf32>,
    return
  }
}

</mosaic_0001>

<bundles_post_ra>
// kernel: anchor_net_forward.1
= control target key start
LH: loop header
LB: loop body
LE: loop exit
PB: predicated region body
PF: predicated region fallthrough
CT: control target
= control target key end

     0   :  { %s3441_s0 = inlined_call_operand.vmem [shape: f32[8,128], index: 0, kind: input, shape index: {}]   ;;  %s3442_s1 = inlined_call_operand.vmem [shape: f32[8,128], index: 1, kind: input, shape index: {}]   ;;  %s3443_s2 = inlined_call_operand.vmem [shape: f32[12], index: 2, kind: input, shape index: {}]   ;;  %s3444_s3 = inlined_call_operand.vmem [shape: f32[96], index: 3, kind: input, shape index: {}]   ;;  %s3445_s4 = inlined_call_operand.vmem [shape: f32[96], index: 4, kind: input, shape index: {}]   ;;  %s3446_s5 = inlined_call_operand.vmem [shape: f32[512,128], index: 5, kind: input, shape index: {}]   ;;  %s3447_s6 = inlined_call_operand.vmem [shape: f32[1,128], index: 6, kind: input, shape index: {}]   ;;  %s3448_s7 = inlined_call_operand.hbm [shape: f32[8,128], index: 7, kind: output, shape index: {0}]   ;;  %s3449_s8 = inlined_call_operand.hbm [shape: f32[8,128], index: 8, kind: output, shape index: {1}]  }
   0x1   :  { %3464 = sst [smem:[#allocation32_spill]] %s3441_s0 }
   0x2   :  { %3465 = sst [smem:[#allocation33_spill]] %s3446_s5 }
   0x3   :  { %3466 = sst [smem:[#allocation34_spill]] %s3447_s6 }
   0x4   :  { %3467 = sst [smem:[#allocation35_spill]] %s3448_s7 }
   0x5   :  { %3468 = sst [smem:[#allocation36_spill]] %s3449_s8 }
   0x6   :  { %14 = vsyncpa [#allocation4], 0 }
   0x7   :  { %15 = vsyncpa [#allocation6], 0 }
   0x8   :  { %16 = vsyncpa [#allocation3], 0  ;;  %s38_s29 = sshll.u32 %s3444_s3, 4  ;;  %s39_s29 = int_to_ptr.vmem [resolvable:$true] %s38_s29 }
   0x9   :  { %17 = vsyncpa [#allocation10], 0  ;;  %s28_s10 = sshll.u32 %s3443_s2, 4  ;;  %s2209_s11 = scalar_lea.vmem %s39_s29, 16  ;;  %s29_s10 = int_to_ptr.vmem [resolvable:$true] %s28_s10 }
   0xa   :  { %p2210_p0 = scmp.ne.s32.totalorder %s39_s29, %s2209_s11  ;;  %p2214_p1 = scmp.lt.s32.totalorder %s39_s29, %s39_s29 }
   0xb   :  { %p2215_p2 = scmp.lt.s32.totalorder %s2209_s11, %s2209_s11 }
   0xd   :  { %p2216_p3 = por %p2215_p2, %p2214_p1 }
   0xf   :  { %p2217_p4 = pnand %p2216_p3, %p2210_p0 }
  0x11   :  { %2220 = shalt.err (!%p2217_p4)
}
  0x12   :  { %s2293_s12 = smov [#allocation5]   ;;  %s2221_s13 = scalar_lea.vmem %s29_s10, 16 }
  0x13   :  { %41 = dma.vmem_to_smem %s39_s29, 16, %s2293_s12, [#allocation6]  }
  0x14   :  { %p2222_p5 = scmp.ne.s32.totalorder %s29_s10, %s2221_s13  ;;  %p2226_p6 = scmp.lt.s32.totalorder %s29_s10, %s29_s10 }
  0x15   :  { %p2227_p7 = scmp.lt.s32.totalorder %s2221_s13, %s2221_s13 }
  0x17   :  { %p2228_p8 = por %p2227_p7, %p2226_p6 }
  0x19   :  { %p2229_p9 = pnand %p2228_p8, %p2222_p5 }
  0x1b   :  { %2232 = shalt.err (!%p2229_p9)
}
  0x1c   :  { %s2294_s3 = smov [#allocation2]   ;;  %s48_s15 = sshll.u32 %s3445_s4, 4  ;;  %s49_s15 = int_to_ptr.vmem [resolvable:$true] %s48_s15 }
  0x1d   :  { %31 = dma.vmem_to_smem %s29_s10, 16, %s2294_s3, [#allocation4]  }
  0x1e   :  { %s2233_s16 = scalar_lea.vmem %s49_s15, 16  ;;  %p2238_p11 = scmp.lt.s32.totalorder %s49_s15, %s49_s15 }
  0x1f   :  { %p2234_p10 = scmp.ne.s32.totalorder %s49_s15, %s2233_s16  ;;  %p2239_p12 = scmp.lt.s32.totalorder %s2233_s16, %s2233_s16 }
  0x21   :  { %p2240_p13 = por %p2239_p12, %p2238_p11 }
  0x23   :  { %p2241_p0 = pnand %p2240_p13, %p2234_p10 }
  0x25   :  { %2244 = shalt.err (!%p2241_p0)
}
  0x26   :  { %s2295_s17 = smov [#allocation7]  }
  0x27   :  { %51 = dma.vmem_to_smem %s49_s15, 16, %s2295_s17, [#allocation6]  }
  0x28   :  { %2285 = dma.done.wait [#allocation4], 16  }
  0x29   :  { %2286 = vsyncadd [#allocation4], 4294967280 }
  0x2a   :  { %2287 = dma.done.wait [#allocation6], 32  }
  0x2b   :  { %2288 = vsyncadd [#allocation6], 4294967264 }
  0x2c   :  { %65 = sfence }
  0x2d   :  { %v67_v0 = vld [vmem:[%s3442_s1] sm:$0xff]  ;;  %s3454_s20 = smov 1   ;;  %s3450_s21 = smov 127   ;;  %v103_v36 = vlaneseq }
  0x2e   :  { %v68_v1 = vrot.slane %v67_v0, 4  ;;  %v74_v2 = vmul.f32 %v67_v0, %v67_v0  ;;  %v66_v33 = vld [vmem:[%s3441_s0] sm:$0xff]  ;;  %s113_s22 = sld [smem:[#allocation2]]  ;;  %s3452_s16 = smov 0.0  }
  0x2f   :  { %s1794_s23 = sld [smem:[#allocation2 + $0x3]]  ;;  %v2367_v37 = vand.u32 127, %v103_v36  ;;  %s3476_s6 = smov 1  }
  0x30   :  { %v69_v3 = vadd.f32 %v68_v1, %v67_v0  ;;  %v75_v4 = vrot.slane %v74_v2, 4  ;;  %s1795_s24 = sld [smem:[#allocation2 + $0x4]]  ;;  %s3477_s8 = smov 0.0  }
  0x31   :  { %s1792_s25 = sld [smem:[#allocation2 + $0x1]]  ;;  %vm105_vm0 = vcmp.gt.s32.totalorder %v2367_v37, 0  ;;  %vm109_vm1 = vcmp.lt.s32.totalorder %v2367_v37, 127 }
  0x32   :  { %v70_v5 = vrot.slane %v69_v3, 2  ;;  %v76_v6 = vadd.f32 %v75_v4, %v74_v2  ;;  %s1793_s26 = sld [smem:[#allocation2 + $0x2]] }
  0x33   :  { %s1796_s27 = sld [smem:[#allocation2 + $0x5]] }
  0x34   :  { %v71_v7 = vadd.f32 %v70_v5, %v69_v3  ;;  %v77_v8 = vrot.slane %v76_v6, 2  ;;  %v114_v38 = vstv %s113_s22  ;;  %s1797_s28 = sld [smem:[#allocation2 + $0x6]] }
  0x35   :  { %v125_v39 = vstv %s1794_s23  ;;  %s1798_s29 = sld [smem:[#allocation2 + $0x7]] }
  0x36   :  { %v72_v9 = vrot.slane %v71_v7, 1  ;;  %v78_v10 = vadd.f32 %v77_v8, %v76_v6  ;;  %v128_v40 = vstv %s1795_s24  ;;  %s1799_s30 = sld [smem:[#allocation2 + $0x8]] }
  0x37   :  { %v117_v41 = vstv %s1792_s25  ;;  %s1800_s9 = sld [smem:[#allocation2 + $0x9]] }
  0x38   :  { %v73_v11 = vadd.f32 %v72_v9, %v71_v7  ;;  %v79_v12 = vrot.slane %v78_v10, 1  ;;  %v121_v48 = vstv %s1793_s26  ;;  %s1801_s10 = sld [smem:[#allocation2 + $0xa]] }
  0x39   :  { %v132_v49 = vstv %s1796_s27  ;;  %s1802_s11 = sld [smem:[#allocation2 + $0xb]] }
  0x3a   :  { %v80_v13 = vadd.f32 %v79_v12, %v78_v10  ;;  %v81_v14 = vmul.f32 0.125, %v73_v11  ;;  %v136_v58 = vstv %s1797_s28  ;;  %s2467_s7 = sld [smem:[#allocation5 + $0x2]] }
  0x3b   :  { %v139_v59 = vstv %s1798_s29  ;;  %s2469_s0 = sld [smem:[#allocation5 + $0xe]] }
  0x3c   :  { %v82_v15 = vmul.f32 0.125, %v80_v13  ;;  %v83_v16 = vmul.f32 %v81_v14, %v81_v14  ;;  %v86_v20 = vsub.f32 %v67_v0, %v81_v14  ;;  %v143_v61 = vstv %s1799_s30  ;;  %s2478_s5 = sld [smem:[#allocation5 + $0x26]] }
  0x3d   :  { %v147_v3 = vstv %s1800_s9 }
  0x3e   :  { %v84_v17 = vsub.f32 %v82_v15, %v83_v16  ;;  %v150_v4 = vstv %s1801_s10 }
  0x3f   :  { %v154_v6 = vstv %s1802_s11 }
  0x40   :  { %v85_v18 = vmax.f32 %v84_v17, 0.0 }
  0x41   :  { %3474 = sst [smem:[#allocation20_spill]] %s2469_s0 }
  0x42   :  { %v87_v19 = vadd.f32 1e-05, %v85_v18  ;;  %s2484_s0 = sld [smem:[#allocation5 + $0x32]] }
  0x44   :  { %2168 = vrsqrt.f32 %v87_v19 }
  0x51   :  { %v2169_v21 = vpop.eup %2168 }
  0x52   :  { %v89_v22 = vmul.f32 %v2169_v21, %v86_v20 }
  0x54   :  { %v90_v23 = vsub.f32 0.0, %v89_v22 }
  0x56   :  { %v91_v24 = vmul.f32 1.442695, %v90_v23 }
  0x58   :  { %2170 = vpow2.f32 %v91_v24 }
  0x65   :  { %v2171_v25 = vpop.eup %2170 }
  0x66   :  { %v93_v26 = vadd.f32 1.0, %v2171_v25 }
  0x68   :  { %2172 = vrcp.f32 %v93_v26 }
  0x75   :  { %v2173_v27 = vpop.eup %2172 }
  0x76   :  { %v1791_v28 = vadd.f32 -0.5, %v2173_v27 }
  0x78   :  { %v96_v29 = vand.u32 2147483647, %v1791_v28 }
  0x7a   :  { %v97_v30 = vadd.f32 1.0, %v96_v29 }
  0x7c   :  { %2174 = vrcp.f32 %v97_v30 }
  0x89   :  { %v2175_v31 = vpop.eup %2174 }
  0x8a   :  { %v99_v32 = vmul.f32 %v2175_v31, %v1791_v28 }
  0x8c   :  { %v2361_v34 = vmax.f32 %v99_v32, 0.0 }
  0x8e   :  { %3469 = vst [vmem:[#allocation15_spill] sm:$0xff] %v2361_v34  ;;  %v102_v35 = vmul.f32 %v2361_v34, %v66_v33  ;;  %101 = vst [vmem:[#allocation9] sm:$0xff] %v2361_v34 }
  0x90   :  { %106 = vrot.lane.b32.xlu0 %v102_v35, %s3454_s20  ;;  %v129_v46 = vmul.f32 %v128_v40, %v102_v35  ;;  %v118_v47 = vmul.f32 %v117_v41, %v102_v35  ;;  %v140_v63 = vmul.f32 %v139_v59, %v102_v35  ;;  %v151_v8 = vmul.f32 %v150_v4, %v102_v35 }
  0x94   :  { %110 = vrot.lane.b32.xlu0 %v102_v35, %s3450_s21 }
 0x102   :  { %v107_v42 = vpop.permute.xlu0 %106 }
 0x103   :  { %v108_v43 = vsel %vm105_vm0, %v107_v42, 0.0 }
 0x104   :  { %v115_v44 = vmul.f32 %v114_v38, %v108_v43  ;;  %v126_v45 = vmul.f32 %v125_v39, %v108_v43  ;;  %v137_v62 = vmul.f32 %v136_v58, %v108_v43  ;;  %v148_v7 = vmul.f32 %v147_v3, %v108_v43 }
 0x106   :  { %v111_v50 = vpop.permute.xlu0 %110  ;;  %v130_v54 = vadd.f32 %v129_v46, %v126_v45  ;;  %v119_v55 = vadd.f32 %v118_v47, %v115_v44  ;;  %v141_v2 = vadd.f32 %v140_v63, %v137_v62  ;;  %v152_v11 = vadd.f32 %v151_v8, %v148_v7 }
 0x107   :  { %v112_v51 = vsel %vm109_vm1, %v111_v50, 0.0 }
 0x108   :  { %v122_v52 = vmul.f32 %v121_v48, %v112_v51  ;;  %v133_v53 = vmul.f32 %v132_v49, %v112_v51  ;;  %v144_v0 = vmul.f32 %v143_v61, %v112_v51  ;;  %v155_v9 = vmul.f32 %v154_v6, %v112_v51 }
 0x10a   :  { %v2375_v56 = vadd.f32 %v133_v53, %v130_v54  ;;  %v2377_v57 = vadd.f32 %v122_v52, %v119_v55  ;;  %v2385_v5 = vadd.f32 %v144_v0, %v141_v2  ;;  %v2390_v12 = vadd.f32 %v155_v9, %v152_v11 }
 0x10c   :  { %192 = vadd.xlane.f32.xlu0 %v2375_v56  ;;  %157 = vadd.xlane.f32.xlu1 %v2377_v57  ;;  %v166_v60 = vmul.f32 %v2377_v57, %v2377_v57  ;;  %v201_v1 = vmul.f32 %v2375_v56, %v2375_v56  ;;  %v236_v10 = vmul.f32 %v2385_v5, %v2385_v5 }
 0x10d   :  { %3470 = vst [vmem:[#allocation16_spill] sm:$0xff] %v2390_v12  ;;  %v271_v13 = vmul.f32 %v2390_v12, %v2390_v12 }
 0x110   :  { %167 = vadd.xlane.f32.xlu1 %v166_v60 }
 0x114   :  { %202 = vadd.xlane.f32.xlu1 %v201_v1 }
 0x118   :  { %227 = vadd.xlane.f32.xlu1 %v2385_v5 }
 0x11c   :  { %237 = vadd.xlane.f32.xlu1 %v236_v10 }
 0x120   :  { %262 = vadd.xlane.f32.xlu1 %v2390_v12 }
 0x124   :  { %272 = vadd.xlane.f32.xlu1 %v271_v13 }
 0x195   :  { %v158_v14 = vpop.xlane.xlu1 %157  ;;  %v193_v28 = vpop.xlane.xlu0 %192 }
 0x196   :  { %v159_v15 = vrot.slane %v158_v14, 4  ;;  %v194_v30 = vrot.slane %v193_v28, 4 }
 0x198   :  { %v160_v16 = vadd.f32 %v159_v15, %v158_v14  ;;  %v195_v32 = vadd.f32 %v194_v30, %v193_v28 }
 0x199   :  { %v168_v17 = vpop.xlane.xlu1 %167 }
 0x19a   :  { %v161_v18 = vrot.slane %v160_v16, 2  ;;  %v169_v19 = vrot.slane %v168_v17, 4  ;;  %v196_v36 = vrot.slane %v195_v32, 2 }
 0x19c   :  { %v170_v20 = vadd.f32 %v169_v19, %v168_v17  ;;  %v162_v21 = vadd.f32 %v161_v18, %v160_v16  ;;  %v197_v39 = vadd.f32 %v196_v36, %v195_v32 }
 0x19d   :  { %v203_v29 = vpop.xlane.xlu1 %202 }
 0x19e   :  { %v171_v22 = vrot.slane %v170_v20, 2  ;;  %v163_v23 = vrot.slane %v162_v21, 1  ;;  %v204_v31 = vrot.slane %v203_v29, 4  ;;  %v198_v41 = vrot.slane %v197_v39, 1 }
 0x1a0   :  { %v164_v24 = vadd.f32 %v163_v23, %v162_v21  ;;  %v172_v25 = vadd.f32 %v171_v22, %v170_v20  ;;  %v205_v33 = vadd.f32 %v204_v31, %v203_v29  ;;  %v199_v44 = vadd.f32 %v198_v41, %v197_v39 }
 0x1a1   :  { %v228_v46 = vpop.xlane.xlu1 %227 }
 0x1a2   :  { %2064 = vpush %v164_v24  ;;  %v173_v26 = vrot.slane %v172_v25, 1  ;;  %v206_v38 = vrot.slane %v205_v33, 2  ;;  %v229_v53 = vrot.slane %v228_v46, 4 }
 0x1a4   :  { %v174_v27 = vadd.f32 %v173_v26, %v172_v25  ;;  %v207_v40 = vadd.f32 %v206_v38, %v205_v33 }
 0x1a5   :  { %v238_v51 = vpop.xlane.xlu1 %237 }
 0x1a6   :  { %2066 = vpush %v174_v27  ;;  %v208_v42 = vrot.slane %v207_v40, 1  ;;  %v239_v54 = vrot.slane %v238_v51, 4 }
 0x1a8   :  { %v209_v45 = vadd.f32 %v208_v42, %v207_v40  ;;  %v240_v58 = vadd.f32 %v239_v54, %v238_v51  ;;  %v311_v54 = vstv %s2467_s7 }
 0x1a9   :  { %v263_v6 = vpop.xlane.xlu1 %262 }
 0x1aa   :  { %v241_v61 = vrot.slane %v240_v58, 2  ;;  %v264_v14 = vrot.slane %v263_v6, 4 }
 0x1ac   :  { %v242_v63 = vadd.f32 %v241_v61, %v240_v58 }
 0x1ad   :  { %v273_v11 = vpop.xlane.xlu1 %272 }
 0x1ae   :  { %v243_v1 = vrot.slane %v242_v63, 1  ;;  %v274_v15 = vrot.slane %v273_v11, 4 }
 0x1b0   :  { %v244_v4 = vadd.f32 %v243_v1, %v242_v63  ;;  %v275_v17 = vadd.f32 %v274_v15, %v273_v11  ;;  %v344_v63 = vstv %s2478_s5 }
 0x1b2   :  { %v276_v20 = vrot.slane %v275_v17, 2 }
 0x1b4   :  { %v277_v22 = vadd.f32 %v276_v20, %v275_v17 }
 0x1b6   :  { %v278_v24 = vrot.slane %v277_v22, 1 }
 0x1b8   :  { %v279_v27 = vadd.f32 %v278_v24, %v277_v22 }
 0x1d3   :  { %s2065_s12 = spop %2064 }
 0x1d4   :  { %s176_s13 = smul.f32 0.0009765625, %s2065_s12 }
 0x1d6   :  { %s178_s3 = smul.f32 %s176_s13, %s176_s13  ;;  %v181_v47 = vstv %s176_s13 }
 0x1d7   :  { %s2067_s2 = spop %2066  ;;  %v182_v48 = vsub.f32 %v2377_v57, %v181_v47  ;;  %v230_v57 = vadd.f32 %v229_v53, %v228_v46 }
 0x1d8   :  { %s177_s14 = smul.f32 0.0009765625, %s2067_s2  ;;  %s2421_s2 = sld [smem:[#allocation5 + $0x1]] }
 0x1d9   :  { %v231_v60 = vrot.slane %v230_v57, 2 }
 0x1da   :  { %s179_s15 = ssub.f32 %s177_s14, %s178_s3 }
 0x1db   :  { %v232_v62 = vadd.f32 %v231_v60, %v230_v57  ;;  %s2423_s14 = sld [smem:[#allocation5 + $0xd]] }
 0x1dc   :  { %s180_s17 = smax.f32 %s3452_s16, %s179_s15  ;;  %s2425_s15 = sld [smem:[#allocation5 + $0x19]] }
 0x1dd   :  { %s183_s18 = sadd.f32 1e-05, %s180_s17  ;;  %v233_v0 = vrot.slane %v232_v62, 1 }
 0x1de   :  { %s2427_s17 = sld [smem:[#allocation5 + $0x25]] }
 0x1df   :  { %v184_v35 = vstv %s183_s18  ;;  %v234_v3 = vadd.f32 %v233_v0, %v232_v62  ;;  %s2429_s18 = sld [smem:[#allocation5 + $0x31]] }
 0x1e0   :  { %2176 = vrsqrt.f32 %v184_v35  ;;  %v307_v35 = vstv %s2421_s2 }
 0x1e1   :  { %v318_v36 = vstv %s2423_s14 }
 0x1e2   :  { %v329_v38 = vstv %s2425_s15  ;;  %s3487_s15 = sld [smem:[#allocation20_spill]] }
 0x1e4   :  { %v340_v39 = vstv %s2427_s17  ;;  %s2526_s17 = sld [smem:[#allocation5 + $0x33]] }
 0x1e5   :  { %v351_v40 = vstv %s2429_s18  ;;  %s2530_s18 = sld [smem:[#allocation5 + $0x35]] }
 0x1e8   :  { %v322_v61 = vstv %s3487_s15  ;;  %s2664_s15 = sld [smem:[#allocation5 + $0x8]] }
 0x1ed   :  { %v2177_v43 = vpop.eup %2176 }
 0x1ee   :  { %2068 = vpush %v2177_v43 }
 0x1ef   :  { %2070 = vpush %v199_v44 }
 0x1f0   :  { %2072 = vpush %v209_v45 }
 0x21f   :  { %s2069_s19 = spop %2068 }
 0x220   :  { %v187_v49 = vstv %s2069_s19  ;;  %s2071_s1 = spop %2070  ;;  %s2431_s19 = sld [smem:[#allocation5 + $0x3d]] }
 0x221   :  { %v188_v50 = vmul.f32 %v187_v49, %v182_v48  ;;  %s2397_s4 = smul.f32 0.0009765625, %s2071_s1  ;;  %s2073_s22 = spop %2072 }
 0x222   :  { %s212_s23 = smul.f32 0.0009765625, %s2073_s22  ;;  %s2433_s1 = sld [smem:[#allocation5 + $0x49]] }
 0x223   :  { %vm189_vm2 = vcmp.gt.f32.partialorder %v188_v50, 0.0  ;;  %v190_v52 = vmul.f32 0.01, %v188_v50  ;;  %s213_s24 = smul.f32 %s2397_s4, %s2397_s4  ;;  %v216_v7 = vstv %s2397_s4  ;;  %s2435_s4 = sld [smem:[#allocation5 + $0x55]] }
 0x224   :  { %v217_v8 = vsub.f32 %v2375_v56, %v216_v7  ;;  %v265_v56 = vadd.f32 %v264_v14, %v263_v6  ;;  %s2437_s22 = sld [smem:[#allocation5 + $0x4]]  ;;  %v355_v7 = vstv %s2484_s0 }
 0x225   :  { %v2401_v55 = vsel %vm189_vm2, %v188_v50, %v190_v52  ;;  %s214_s25 = ssub.f32 %s212_s23, %s213_s24 }
 0x226   :  { %297 = vrot.lane.b32.xlu1 %v2401_v55, %s3454_s20  ;;  %v266_v19 = vrot.slane %v265_v56, 2  ;;  %s2439_s23 = sld [smem:[#allocation5 + $0x10]]  ;;  %v362_v43 = vstv %s2431_s19  ;;  %v308_v1 = vmul.f32 %v307_v35, %v2401_v55  ;;  %v352_v6 = vmul.f32 %v351_v40, %v2401_v55 }
 0x227   :  { %s215_s26 = smax.f32 %s3452_s16, %s214_s25  ;;  %s2441_s24 = sld [smem:[#allocation5 + $0x1c]] }
 0x228   :  { %s218_s27 = sadd.f32 1e-05, %s215_s26  ;;  %v267_v21 = vadd.f32 %v266_v19, %v265_v56  ;;  %v373_v44 = vstv %s2433_s1 }
 0x229   :  { %s2443_s25 = sld [smem:[#allocation5 + $0x28]]  ;;  %v384_v45 = vstv %s2435_s4 }
 0x22a   :  { %v219_v59 = vstv %s218_s27  ;;  %300 = vrot.lane.b32.xlu1 %v2401_v55, %s3450_s21  ;;  %v268_v23 = vrot.slane %v267_v21, 1  ;;  %s2445_s26 = sld [smem:[#allocation5 + $0x34]]  ;;  %v401_v42 = vstv %s2437_s22  ;;  %v2563_v14 = vmul.f32 %v384_v45, %v2401_v55 }
 0x22b   :  { %2178 = vrsqrt.f32 %v219_v59  ;;  %s2447_s27 = sld [smem:[#allocation5 + $0x40]] }
 0x22c   :  { %v269_v26 = vadd.f32 %v268_v23, %v267_v21  ;;  %v413_v46 = vstv %s2439_s23  ;;  %s2539_s19 = sld [smem:[#allocation5 + $0x3f]]  ;;  %3494 = vst [vmem:[#allocation28_spill] sm:$0xff] %v2563_v14 }
 0x22d   :  { %v425_v47 = vstv %s2441_s24  ;;  %s2545_s23 = sld [smem:[#allocation5 + $0x41]] }
 0x22e   :  { %s2569_s0 = sld [smem:[#allocation5 + $0x57]] }
 0x22f   :  { %v437_v48 = vstv %s2443_s25  ;;  %s2551_s25 = sld [smem:[#allocation5 + $0x4b]] }
 0x230   :  { %v449_v49 = vstv %s2445_s26  ;;  %s2557_s26 = sld [smem:[#allocation5 + $0x4d]] }
 0x231   :  { %v461_v51 = vstv %s2447_s27  ;;  %s2579_s27 = sld [smem:[#allocation5 + $0x59]] }
 0x232   :  { %v458_v35 = vstv %s2539_s19  ;;  %s2670_s19 = sld [smem:[#allocation5 + $0x2c]] }
 0x238   :  { %v2179_v2 = vpop.eup %2178 }
 0x239   :  { %2074 = vpush %v2179_v2  ;;  %v319_v2 = vmul.f32 %v318_v36, %v2401_v55 }
 0x23a   :  { %2076 = vpush %v234_v3  ;;  %v330_v3 = vmul.f32 %v329_v38, %v2401_v55 }
 0x23b   :  { %2078 = vpush %v244_v4  ;;  %v341_v4 = vmul.f32 %v340_v39, %v2401_v55  ;;  %v465_v39 = vstv %s2545_s23  ;;  %s2678_s23 = sld [smem:[#allocation5 + $0x44]] }
 0x26a   :  { %s2075_s28 = spop %2074 }
 0x26b   :  { %v222_v9 = vstv %s2075_s28  ;;  %s2077_s29 = spop %2076  ;;  %s2450_s28 = sld [smem:[#allocation5 + $0x4c]] }
 0x26c   :  { %v223_v10 = vmul.f32 %v222_v9, %v217_v8  ;;  %s2410_s30 = smul.f32 0.0009765625, %s2077_s29  ;;  %s2079_s9 = spop %2078  ;;  %v363_v8 = vmul.f32 %v362_v43, %v2401_v55  ;;  %v374_v9 = vmul.f32 %v373_v44, %v2401_v55  ;;  %v446_v55 = vstv %s2526_s17 }
 0x26d   :  { %s247_s10 = smul.f32 0.0009765625, %s2079_s9  ;;  %s2452_s29 = sld [smem:[#allocation5 + $0x58]]  ;;  %v477_v43 = vstv %s2557_s26 }
 0x26e   :  { %vm224_vm3 = vcmp.gt.f32.partialorder %v223_v10, 0.0  ;;  %v225_v13 = vmul.f32 0.01, %v223_v10  ;;  %s248_s11 = smul.f32 %s2410_s30, %s2410_s30  ;;  %v251_v28 = vstv %s2410_s30  ;;  %s2454_s9 = sld [smem:[#allocation5]] }
 0x26f   :  { %v252_v29 = vsub.f32 %v2385_v5, %v251_v28  ;;  %s2666_s17 = sld [smem:[#allocation5 + $0x14]] }
 0x270   :  { %v2414_v16 = vsel %vm224_vm3, %v223_v10, %v225_v13  ;;  %s249_s12 = ssub.f32 %s247_s10, %s248_s11 }
 0x271   :  { %394 = vrot.lane.b32.xlu1 %v2414_v16, %s3450_s21  ;;  %391 = vrot.lane.b32.xlu0 %v2414_v16, %s3454_s20  ;;  %s2457_s11 = sld [smem:[#allocation5 + $0xc]]  ;;  %v473_v52 = vstv %s2450_s28  ;;  %v402_v28 = vmul.f32 %v401_v42, %v2414_v16  ;;  %v2593_v38 = vmul.f32 %v461_v51, %v2414_v16  ;;  %v470_v42 = vstv %s2551_s25  ;;  %s3505_s28 = smov 127  }
 0x272   :  { %s250_s13 = smax.f32 %s3452_s16, %s249_s12  ;;  %s2463_s16 = sld [smem:[#allocation5 + $0x24]]  ;;  %v2597_v40 = vmul.f32 %v473_v52, %v2414_v16  ;;  %v482_v51 = vstv %s2569_s0 }
 0x273   :  { %s253_s3 = sadd.f32 1e-05, %s250_s13  ;;  %v485_v53 = vstv %s2452_s29  ;;  %3495 = vst [vmem:[#allocation29_spill] sm:$0xff] %v2593_v38  ;;  %s3506_s29 = smov 1  }
 0x274   :  { %s2459_s13 = sld [smem:[#allocation5 + $0x18]]  ;;  %v304_v50 = vstv %s2454_s9  ;;  %3496 = vst [vmem:[#allocation30_spill] sm:$0xff] %v2597_v40  ;;  %v2602_v44 = vmul.f32 %v485_v53, %v2414_v16  ;;  %v489_v40 = vstv %s2579_s27 }
 0x275   :  { %v254_v18 = vstv %s253_s3  ;;  %s2640_s9 = sld [smem:[#allocation5 + $0x7]] }
 0x276   :  { %2180 = vrsqrt.f32 %v254_v18  ;;  %3497 = vst [vmem:[#allocation31_spill] sm:$0xff] %v2602_v44  ;;  %s2684_s25 = sld [smem:[#allocation5 + $0x5a]] }
 0x277   :  { %v315_v57 = vstv %s2457_s11  ;;  %s2642_s11 = sld [smem:[#allocation5 + $0x13]] }
 0x278   :  { %3473 = sst [smem:[#allocation19_spill]] %s2463_s16 }
 0x279   :  { %s3486_s14 = sld [smem:[#allocation19_spill]] }
 0x27a   :  { %3471 = sst [smem:[#allocation17_spill]] %s2459_s13 }
 0x27b   :  { %s2480_s13 = sld [smem:[#allocation5 + $0x30]] }
 0x27c   :  { %s3485_s2 = sld [smem:[#allocation17_spill]] }
 0x27d   :  { %s2748_s26 = sld [smem:[#allocation5 + $0xa]] }
 0x27e   :  { %s2750_s0 = sld [smem:[#allocation5 + $0x16]] }
 0x27f   :  { %v337_v59 = vstv %s3486_s14  ;;  %s2662_s14 = sld [smem:[#allocation5 + $0x2a]] }
 0x280   :  { %s2752_s27 = sld [smem:[#allocation5 + $0x22]] }
 0x281   :  { %v348_v0 = vstv %s2480_s13  ;;  %s2644_s13 = sld [smem:[#allocation5 + $0x1f]] }
 0x282   :  { %v326_v58 = vstv %s3485_s2  ;;  %s2660_s2 = sld [smem:[#allocation5 + $0x1e]] }
 0x283   :  { %v2181_v25 = vpop.eup %2180 }
 0x284   :  { %2080 = vpush %v2181_v25 }
 0x285   :  { %2082 = vpush %v269_v26 }
 0x286   :  { %2084 = vpush %v279_v27 }
 0x298   :  { %v298_v60 = vpop.permute.xlu1 %297 }
 0x299   :  { %v299_v27 = vsel %vm105_vm0, %v298_v60, 0.0 }
 0x29a   :  { %v316_v45 = vmul.f32 %v315_v57, %v299_v27 }
 0x29c   :  { %v301_v23 = vpop.permute.xlu1 %300  ;;  %v320_v38 = vadd.f32 %v319_v2, %v316_v45 }
 0x29d   :  { %v302_v36 = vsel %vm109_vm1, %v301_v23, 0.0 }
 0x29e   :  { %v323_v15 = vmul.f32 %v322_v61, %v302_v36  ;;  %v356_v52 = vmul.f32 %v355_v7, %v302_v36 }
 0x2a0   :  { %v324_v44 = vadd.f32 %v323_v15, %v320_v38 }
 0x2b5   :  { %s2081_s10 = spop %2080 }
 0x2b6   :  { %v257_v30 = vstv %s2081_s10  ;;  %s2083_s12 = spop %2082 }
 0x2b7   :  { %v258_v31 = vmul.f32 %v257_v30, %v252_v29  ;;  %s2461_s3 = smul.f32 0.0009765625, %s2083_s12  ;;  %s2085_s30 = spop %2084  ;;  %v414_v29 = vmul.f32 %v413_v46, %v2414_v16  ;;  %v453_v30 = vstv %s2530_s18  ;;  %v327_v46 = vmul.f32 %v326_v58, %v299_v27 }
 0x2b8   :  { %s282_s21 = smul.f32 0.0009765625, %s2085_s30  ;;  %s2475_s12 = sld [smem:[#allocation5 + $0x1a]] }
 0x2b9   :  { %3472 = sst [smem:[#allocation18_spill]] %s2461_s3  ;;  %vm259_vm4 = vcmp.gt.f32.partialorder %v258_v31, 0.0  ;;  %v260_v32 = vmul.f32 0.01, %v258_v31  ;;  %s283_s20 = smul.f32 %s2461_s3, %s2461_s3 }
 0x2ba   :  { %s3478_s3 = smov 127   ;;  %s2668_s18 = sld [smem:[#allocation5 + $0x20]] }
 0x2bb   :  { %v2471_v5 = vsel %vm259_vm4, %v258_v31, %v260_v32  ;;  %s284_s10 = ssub.f32 %s282_s21, %s283_s20  ;;  %v426_v31 = vmul.f32 %v425_v47, %v2414_v16  ;;  %v438_v32 = vmul.f32 %v437_v48, %v2414_v16  ;;  %v338_v47 = vmul.f32 %v337_v59, %v299_v27 }
 0x2bc   :  { %3475 = vst [vmem:[#allocation21_spill] sm:$0xff] %v2471_v5  ;;  %493 = vrot.lane.b32.xlu1 %v2471_v5, %s3476_s6  ;;  %s2486_s20 = sld [smem:[#allocation5 + $0x3c]]  ;;  %v349_v48 = vmul.f32 %v348_v0, %v299_v27 }
 0x2bd   :  { %s285_s30 = smax.f32 %s3477_s8, %s284_s10  ;;  %s2488_s21 = sld [smem:[#allocation5 + $0x3e]]  ;;  %v342_v53 = vadd.f32 %v341_v4, %v338_v47 }
 0x2be   :  { %s288_s16 = sadd.f32 1e-05, %s285_s30  ;;  %v333_v62 = vstv %s2475_s12  ;;  %v353_v57 = vadd.f32 %v352_v6, %v349_v48 }
 0x2bf   :  { %s2490_s10 = sld [smem:[#allocation5 + $0x48]]  ;;  %v334_v34 = vmul.f32 %v333_v62, %v302_v36 }
 0x2c0   :  { %v289_v33 = vstv %s288_s16  ;;  %496 = vrot.lane.b32.xlu1 %v2471_v5, %s3478_s3  ;;  %s2492_s30 = sld [smem:[#allocation5 + $0x4a]]  ;;  %v345_v5 = vmul.f32 %v344_v63, %v302_v36  ;;  %v357_v63 = vadd.f32 %v356_v52, %v353_v57 }
 0x2c1   :  { %2182 = vrsqrt.f32 %v289_v33  ;;  %s2494_s16 = sld [smem:[#allocation5 + $0x54]]  ;;  %v450_v33 = vmul.f32 %v449_v49, %v2414_v16  ;;  %v312_v49 = vmul.f32 %v311_v54, %v302_v36  ;;  %v331_v16 = vadd.f32 %v330_v3, %v327_v46 }
 0x2c2   :  { %3479 = sst [smem:[#allocation22_spill]] %s2486_s20  ;;  %v346_v62 = vadd.f32 %v345_v5, %v342_v53 }
 0x2c3   :  { %3480 = sst [smem:[#allocation23_spill]] %s2488_s21  ;;  %v335_v61 = vadd.f32 %v334_v34, %v331_v16 }
 0x2c4   :  { %s2496_s8 = sld [smem:[#allocation5 + $0x56]] }
 0x2c5   :  { %3481 = sst [smem:[#allocation24_spill]] %s2490_s10 }
 0x2c6   :  { %s2498_s6 = sld [smem:[#allocation5 + $0x3]]  ;;  %v377_v56 = vstv %s2492_s30 }
 0x2c7   :  { %3482 = sst [smem:[#allocation25_spill]] %s2494_s16  ;;  %v378_v54 = vmul.f32 %v377_v56, %v302_v36 }
 0x2c8   :  { %s2500_s3 = sld [smem:[#allocation5 + $0x5]] }
 0x2c9   :  { %s2502_s20 = sld [smem:[#allocation5 + $0xf]] }
 0x2ca   :  { %3483 = sst [smem:[#allocation26_spill]] %s2496_s8 }
 0x2cb   :  { %s2504_s21 = sld [smem:[#allocation5 + $0x11]] }
 0x2cc   :  { %s2506_s10 = sld [smem:[#allocation5 + $0x1b]]  ;;  %v3498_v7 = vstv %s2498_s6 }
 0x2cd   :  { %s2509_s16 = sld [smem:[#allocation5 + $0x1d]] }
 0x2ce   :  { %s2514_s8 = sld [smem:[#allocation5 + $0x27]]  ;;  %v2183_v41 = vpop.eup %2182  ;;  %v405_v19 = vstv %s2500_s3 }
 0x2cf   :  { %2086 = vpush %v2183_v41  ;;  %s3488_s1 = sld [smem:[#allocation22_spill]]  ;;  %v410_v20 = vstv %s2502_s20  ;;  %v305_v41 = vmul.f32 %v304_v50, %v299_v27 }
 0x2d0   :  { %s3489_s4 = sld [smem:[#allocation23_spill]] }
 0x2d1   :  { %s3490_s22 = sld [smem:[#allocation24_spill]]  ;;  %v417_v21 = vstv %s2504_s21  ;;  %v309_v12 = vadd.f32 %v308_v1, %v305_v41 }
 0x2d2   :  { %3484 = sst [smem:[#allocation27_spill]] %s2506_s10 }
 0x2d3   :  { %s2518_s10 = sld [smem:[#allocation5 + $0x29]]  ;;  %v429_v24 = vstv %s2509_s16  ;;  %v313_v58 = vadd.f32 %v312_v49, %v309_v12 }
 0x2d4   :  { %s3491_s7 = sld [smem:[#allocation25_spill]]  ;;  %v434_v25 = vstv %s2514_s8 }
 0x2d5   :  { %s3492_s24 = sld [smem:[#allocation26_spill]]  ;;  %v359_v10 = vstv %s3488_s1 }
 0x2d6   :  { %s3493_s5 = sld [smem:[#allocation27_spill]]  ;;  %v366_v11 = vstv %s3489_s4  ;;  %v360_v60 = vmul.f32 %v359_v10, %v299_v27 }
 0x2d7   :  { %v370_v13 = vstv %s3490_s22  ;;  %v367_v50 = vmul.f32 %v366_v11, %v302_v36  ;;  %s3501_s6 = sld [smem:[#allocation18_spill]] }
 0x2d8   :  { %v371_v23 = vmul.f32 %v370_v13, %v299_v27  ;;  %v364_v59 = vadd.f32 %v363_v8, %v360_v60  ;;  %s2646_s3 = sld [smem:[#allocation5 + $0x2b]] }
 0x2d9   :  { %v441_v26 = vstv %s2518_s10  ;;  %s2648_s12 = sld [smem:[#allocation5 + $0x37]] }
 0x2da   :  { %v381_v17 = vstv %s3491_s7  ;;  %v375_v0 = vadd.f32 %v374_v9, %v371_v23  ;;  %v368_v3 = vadd.f32 %v367_v50, %v364_v59  ;;  %s2650_s20 = sld [smem:[#allocation5 + $0x43]] }
 0x2db   :  { %v388_v18 = vstv %s3492_s24  ;;  %v382_v14 = vmul.f32 %v381_v17, %v299_v27  ;;  %s2652_s21 = sld [smem:[#allocation5 + $0x4f]] }
 0x2dc   :  { %v422_v22 = vstv %s3493_s5  ;;  %v389_v4 = vmul.f32 %v388_v18, %v302_v36  ;;  %s2654_s10 = sld [smem:[#allocation5 + $0x5b]] }
 0x2dd   :  { %v286_v59 = vstv %s3501_s6  ;;  %s2656_s30 = sld [smem:[#allocation5 + $0x6]] }
 0x2de   :  { %s2658_s16 = sld [smem:[#allocation5 + $0x12]] }
 0x2df   :  { %s2672_s1 = sld [smem:[#allocation5 + $0x36]] }
 0x2e0   :  { %s2674_s4 = sld [smem:[#allocation5 + $0x38]] }
 0x2e1   :  { %s2676_s22 = sld [smem:[#allocation5 + $0x42]] }
 0x2e2   :  { %s2680_s7 = sld [smem:[#allocation5 + $0x4e]] }
 0x2e3   :  { %v392_v10 = vpop.permute.xlu0 %391  ;;  %v395_v13 = vpop.permute.xlu1 %394  ;;  %s2682_s24 = sld [smem:[#allocation5 + $0x50]] }
 0x2e4   :  { %v393_v1 = vsel %vm105_vm0, %v392_v10, 0.0  ;;  %v396_v2 = vsel %vm109_vm1, %v395_v13, 0.0  ;;  %v3504_v10 = vld [vmem:[#allocation16_spill] sm:$0xff]  ;;  %s2687_s5 = sld [smem:[#allocation5 + $0x5c]] }
 0x2e5   :  { %v399_v6 = vmul.f32 %v3498_v7, %v393_v1  ;;  %v406_v12 = vmul.f32 %v405_v19, %v396_v2  ;;  %v411_v8 = vmul.f32 %v410_v20, %v393_v1  ;;  %v418_v9 = vmul.f32 %v417_v21, %v396_v2  ;;  %v3499_v20 = vld [vmem:[#allocation29_spill] sm:$0xff]  ;;  %s2754_s6 = sld [smem:[#allocation5 + $0x2e]] }
 0x2e6   :  { %v423_v11 = vmul.f32 %v422_v22, %v393_v1  ;;  %v430_v56 = vmul.f32 %v429_v24, %v396_v2  ;;  %v435_v17 = vmul.f32 %v434_v25, %v393_v1  ;;  %v442_v15 = vmul.f32 %v441_v26, %v396_v2 }
 0x2e7   :  { %v403_v34 = vadd.f32 %v402_v28, %v399_v6  ;;  %v415_v5 = vadd.f32 %v414_v29, %v411_v8  ;;  %v447_v27 = vmul.f32 %v446_v55, %v393_v1  ;;  %v454_v38 = vmul.f32 %v453_v30, %v396_v2  ;;  %v3500_v55 = vld [vmem:[#allocation30_spill] sm:$0xff] }
 0x2e8   :  { %v427_v41 = vadd.f32 %v426_v31, %v423_v11  ;;  %v439_v45 = vadd.f32 %v438_v32, %v435_v17  ;;  %v459_v46 = vmul.f32 %v458_v35, %v393_v1  ;;  %v466_v47 = vmul.f32 %v465_v39, %v396_v2 }
 0x2e9   :  { %v407_v48 = vadd.f32 %v406_v12, %v403_v34  ;;  %v419_v49 = vadd.f32 %v418_v9, %v415_v5  ;;  %v451_v18 = vadd.f32 %v450_v33, %v447_v27  ;;  %v471_v36 = vmul.f32 %v470_v42, %v393_v1  ;;  %v3507_v34 = vld [vmem:[#allocation21_spill] sm:$0xff] }
 0x2ea   :  { %v431_v60 = vadd.f32 %v430_v56, %v427_v41  ;;  %v443_v19 = vadd.f32 %v442_v15, %v439_v45  ;;  %v463_v21 = vadd.f32 %v3499_v20, %v459_v46  ;;  %v478_v22 = vmul.f32 %v477_v43, %v396_v2  ;;  %v3502_v43 = vld [vmem:[#allocation28_spill] sm:$0xff] }
 0x2eb   :  { %v2613_v24 = vadd.f32 %v407_v48, %v313_v58  ;;  %v2615_v25 = vadd.f32 %v419_v49, %v324_v44  ;;  %v455_v26 = vadd.f32 %v454_v38, %v451_v18  ;;  %v475_v28 = vadd.f32 %v3500_v55, %v471_v36  ;;  %v3503_v44 = vld [vmem:[#allocation31_spill] sm:$0xff] }
 0x2ec   :  { %v2618_v29 = vadd.f32 %v431_v60, %v335_v61  ;;  %v2620_v30 = vadd.f32 %v443_v19, %v346_v62  ;;  %v467_v31 = vadd.f32 %v466_v47, %v463_v21  ;;  %v483_v32 = vmul.f32 %v482_v51, %v393_v1 }
 0x2ed   :  { %v2622_v33 = vadd.f32 %v455_v26, %v357_v63  ;;  %v379_v35 = vadd.f32 %v378_v54, %v375_v0  ;;  %v479_v39 = vadd.f32 %v478_v22, %v475_v28  ;;  %v386_v23 = vadd.f32 %v3502_v43, %v382_v14 }
 0x2ee   :  { %v2624_v42 = vadd.f32 %v467_v31, %v368_v3  ;;  %v487_v52 = vadd.f32 %v3503_v44, %v483_v32  ;;  %v490_v50 = vmul.f32 %v489_v40, %v396_v2  ;;  %v287_v51 = vsub.f32 %v3504_v10, %v286_v59 }
 0x2ef   :  { %v2628_v16 = vadd.f32 %v479_v39, %v379_v35  ;;  %v390_v53 = vadd.f32 %v389_v4, %v386_v23  ;;  %v503_v14 = vstv %s2640_s9  ;;  %v515_v40 = vstv %s2642_s11  ;;  %s2758_s9 = sld [smem:[#allocation5 + $0x46]] }
 0x2f0   :  { %v491_v57 = vadd.f32 %v490_v50, %v487_v52  ;;  %v527_v62 = vstv %s2644_s13  ;;  %v539_v63 = vstv %s2646_s3  ;;  %v551_v1 = vstv %s2648_s12  ;;  %s2760_s11 = sld [smem:[#allocation5 + $0x52]] }
 0x2f1   :  { %v500_v2 = vstv %s2656_s30  ;;  %v563_v3 = vstv %s2650_s20  ;;  %v575_v4 = vstv %s2652_s21  ;;  %v587_v7 = vstv %s2654_s10  ;;  %s2762_s13 = sld [smem:[#allocation5 + $0x5e]] }
 0x2f2   :  { %v2630_v58 = vadd.f32 %v491_v57, %v390_v53  ;;  %v507_v6 = vstv %s2664_s15  ;;  %v512_v12 = vstv %s2658_s16  ;;  %v524_v8 = vstv %s2660_s2  ;;  %s2764_s3 = sld [smem:[#allocation5 + $0x9]] }
 0x2f3   :  { %v536_v9 = vstv %s2662_s14  ;;  %v519_v11 = vstv %s2666_s17  ;;  %v531_v56 = vstv %s2668_s18  ;;  %v543_v17 = vstv %s2670_s19  ;;  %s2766_s12 = sld [smem:[#allocation5 + $0xb]] }
 0x2f4   :  { %v548_v15 = vstv %s2672_s1  ;;  %v504_v5 = vmul.f32 %v503_v14, %v3507_v34  ;;  %v516_v27 = vmul.f32 %v515_v40, %v3507_v34  ;;  %v555_v38 = vstv %s2674_s4  ;;  %s2768_s20 = sld [smem:[#allocation5 + $0x15]] }
 0x2f5   :  { %v560_v41 = vstv %s2676_s22  ;;  %v528_v45 = vmul.f32 %v527_v62, %v3507_v34  ;;  %v540_v46 = vmul.f32 %v539_v63, %v3507_v34  ;;  %v552_v47 = vmul.f32 %v551_v1, %v3507_v34  ;;  %s2770_s21 = sld [smem:[#allocation5 + $0x17]] }
 0x2f6   :  { %v564_v48 = vmul.f32 %v563_v3, %v3507_v34  ;;  %v567_v18 = vstv %s2678_s23  ;;  %v572_v36 = vstv %s2680_s7  ;;  %v576_v60 = vmul.f32 %v575_v4, %v3507_v34  ;;  %s2772_s10 = sld [smem:[#allocation5 + $0x21]] }
 0x2f7   :  { %v584_v19 = vstv %s2684_s25  ;;  %v579_v21 = vstv %s2682_s24  ;;  %v588_v22 = vmul.f32 %v587_v7, %v3507_v34  ;;  %v591_v26 = vstv %s2687_s5  ;;  %s2774_s30 = sld [smem:[#allocation5 + $0x23]] }
 0x2f8   :  { %s2776_s16 = sld [smem:[#allocation5 + $0x2d]] }
 0x2f9   :  { %s2778_s2 = sld [smem:[#allocation5 + $0x2f]] }
 0x2fa   :  { %s2780_s14 = sld [smem:[#allocation5 + $0x39]] }
 0x2fb   :  { %s2782_s15 = sld [smem:[#allocation5 + $0x3b]] }
 0x2fc   :  { %s2784_s17 = sld [smem:[#allocation5 + $0x45]] }
 0x2fd   :  { %s2786_s18 = sld [smem:[#allocation5 + $0x47]] }
 0x2fe   :  { %s2788_s19 = sld [smem:[#allocation5 + $0x51]] }
 0x2ff   :  { %s2790_s1 = sld [smem:[#allocation5 + $0x53]] }
 0x300   :  { %s2087_s8 = spop %2086  ;;  %s2792_s4 = sld [smem:[#allocation5 + $0x5d]] }
 0x301   :  { %v292_v13 = vstv %s2087_s8  ;;  %s2756_s8 = sld [smem:[#allocation5 + $0x3a]] }
 0x302   :  { %v293_v0 = vmul.f32 %v292_v13, %v287_v51  ;;  %s2796_s22 = sld [smem:[#allocation5 + $0x5f]] }
 0x304   :  { %vm294_vm5 = vcmp.gt.f32.partialorder %v293_v0, 0.0  ;;  %v295_v54 = vmul.f32 0.01, %v293_v0 }
 0x306   :  { %v2634_v61 = vsel %vm294_vm5, %v293_v0, %v295_v54 }
 0x307   :  { %598 = vrot.lane.b32.xlu1 %v2634_v61, %s3505_s28  ;;  %595 = vrot.lane.b32.xlu0 %v2634_v61, %s3506_s29 }
 0x32e   :  { %v494_v49 = vpop.permute.xlu1 %493 }
 0x32f   :  { %v495_v20 = vsel %vm105_vm0, %v494_v49, 0.0  ;;  %v621_v49 = vstv %s2770_s21 }
 0x330   :  { %v501_v55 = vmul.f32 %v500_v2, %v495_v20  ;;  %v513_v28 = vmul.f32 %v512_v12, %v495_v20  ;;  %v525_v31 = vmul.f32 %v524_v8, %v495_v20  ;;  %v537_v32 = vmul.f32 %v536_v9, %v495_v20 }
 0x331   :  { %v549_v35 = vmul.f32 %v548_v15, %v495_v20  ;;  %v561_v39 = vmul.f32 %v560_v41, %v495_v20  ;;  %v573_v43 = vmul.f32 %v572_v36, %v495_v20  ;;  %v585_v23 = vmul.f32 %v584_v19, %v495_v20 }
 0x332   :  { %v497_v44 = vpop.permute.xlu1 %496  ;;  %v505_v52 = vadd.f32 %v504_v5, %v501_v55  ;;  %v517_v50 = vadd.f32 %v516_v27, %v513_v28  ;;  %v529_v53 = vadd.f32 %v528_v45, %v525_v31  ;;  %v541_v57 = vadd.f32 %v540_v46, %v537_v32 }
 0x333   :  { %v498_v59 = vsel %vm109_vm1, %v497_v44, 0.0  ;;  %v553_v10 = vadd.f32 %v552_v47, %v549_v35  ;;  %v565_v51 = vadd.f32 %v564_v48, %v561_v39  ;;  %v577_v13 = vadd.f32 %v576_v60, %v573_v43 }
 0x334   :  { %v508_v0 = vmul.f32 %v507_v6, %v498_v59  ;;  %v520_v54 = vmul.f32 %v519_v11, %v498_v59  ;;  %v532_v14 = vmul.f32 %v531_v56, %v498_v59  ;;  %v544_v40 = vmul.f32 %v543_v17, %v498_v59 }
 0x335   :  { %v556_v62 = vmul.f32 %v555_v38, %v498_v59  ;;  %v568_v63 = vmul.f32 %v567_v18, %v498_v59  ;;  %v580_v1 = vmul.f32 %v579_v21, %v498_v59  ;;  %v589_v2 = vadd.f32 %v588_v22, %v585_v23 }
 0x336   :  { %v509_v3 = vadd.f32 %v508_v0, %v505_v52  ;;  %v521_v4 = vadd.f32 %v520_v54, %v517_v50  ;;  %v533_v7 = vadd.f32 %v532_v14, %v529_v53  ;;  %v545_v12 = vadd.f32 %v544_v40, %v541_v57 }
 0x337   :  { %v557_v8 = vadd.f32 %v556_v62, %v553_v10  ;;  %v569_v9 = vadd.f32 %v568_v63, %v565_v51  ;;  %v581_v15 = vadd.f32 %v580_v1, %v577_v13  ;;  %v592_v34 = vmul.f32 %v591_v26, %v498_v59 }
 0x338   :  { %v2725_v5 = vadd.f32 %v509_v3, %v2613_v24  ;;  %v2728_v6 = vadd.f32 %v521_v4, %v2615_v25  ;;  %v2731_v11 = vadd.f32 %v533_v7, %v2618_v29  ;;  %v2734_v56 = vadd.f32 %v545_v12, %v2620_v30 }
 0x339   :  { %v2737_v17 = vadd.f32 %v557_v8, %v2622_v33  ;;  %v2740_v27 = vadd.f32 %v569_v9, %v2624_v42  ;;  %v2743_v38 = vadd.f32 %v581_v15, %v2628_v16  ;;  %v593_v24 = vadd.f32 %v592_v34, %v589_v2 }
 0x33a   :  { %v605_v25 = vstv %s2748_s26  ;;  %v617_v29 = vstv %s2750_s0  ;;  %v629_v30 = vstv %s2752_s27  ;;  %v641_v33 = vstv %s2754_s6  ;;  %s3508_s0 = smov 0.0  }
 0x33b   :  { %v2746_v41 = vadd.f32 %v593_v24, %v2630_v58  ;;  %v653_v42 = vstv %s2756_s8  ;;  %v665_v16 = vstv %s2758_s9  ;;  %v602_v58 = vstv %s2764_s3 }
 0x33c   :  { %v609_v45 = vstv %s2766_s12  ;;  %v677_v46 = vstv %s2760_s11  ;;  %v689_v47 = vstv %s2762_s13  ;;  %v614_v48 = vstv %s2768_s20 }
 0x33d   :  { %v626_v18 = vstv %s2772_s10  ;;  %v633_v36 = vstv %s2774_s30  ;;  %v638_v60 = vstv %s2776_s16  ;;  %v645_v19 = vstv %s2778_s2 }
 0x33e   :  { %v650_v20 = vstv %s2780_s14  ;;  %v657_v21 = vstv %s2782_s15  ;;  %v606_v22 = vmul.f32 %v605_v25, %v2634_v61  ;;  %v618_v26 = vmul.f32 %v617_v29, %v2634_v61 }
 0x33f   :  { %v662_v55 = vstv %s2784_s17  ;;  %v669_v28 = vstv %s2786_s18  ;;  %v630_v31 = vmul.f32 %v629_v30, %v2634_v61  ;;  %v642_v32 = vmul.f32 %v641_v33, %v2634_v61 }
 0x340   :  { %v654_v35 = vmul.f32 %v653_v42, %v2634_v61  ;;  %v674_v39 = vstv %s2788_s19  ;;  %v666_v44 = vmul.f32 %v665_v16, %v2634_v61  ;;  %v678_v52 = vmul.f32 %v677_v46, %v2634_v61 }
 0x341   :  { %v681_v50 = vstv %s2790_s1  ;;  %v686_v53 = vstv %s2792_s4  ;;  %v690_v10 = vmul.f32 %v689_v47, %v2634_v61  ;;  %v693_v51 = vstv %s2796_s22 }
 0x379   :  { %v596_v43 = vpop.permute.xlu0 %595  ;;  %v599_v23 = vpop.permute.xlu1 %598 }
 0x37a   :  { %v597_v57 = vsel %vm105_vm0, %v596_v43, 0.0  ;;  %v600_v59 = vsel %vm109_vm1, %v599_v23, 0.0 }
 0x37b   :  { %v603_v13 = vmul.f32 %v602_v58, %v597_v57  ;;  %v610_v0 = vmul.f32 %v609_v45, %v600_v59  ;;  %v615_v54 = vmul.f32 %v614_v48, %v597_v57  ;;  %v622_v14 = vmul.f32 %v621_v49, %v600_v59 }
 0x37c   :  { %v627_v40 = vmul.f32 %v626_v18, %v597_v57  ;;  %v634_v62 = vmul.f32 %v633_v36, %v600_v59  ;;  %v639_v63 = vmul.f32 %v638_v60, %v597_v57  ;;  %v646_v1 = vmul.f32 %v645_v19, %v600_v59 }
 0x37d   :  { %v607_v2 = vadd.f32 %v606_v22, %v603_v13  ;;  %v619_v3 = vadd.f32 %v618_v26, %v615_v54  ;;  %v651_v4 = vmul.f32 %v650_v20, %v597_v57  ;;  %v658_v7 = vmul.f32 %v657_v21, %v600_v59 }
 0x37e   :  { %v631_v12 = vadd.f32 %v630_v31, %v627_v40  ;;  %v643_v8 = vadd.f32 %v642_v32, %v639_v63  ;;  %v663_v9 = vmul.f32 %v662_v55, %v597_v57  ;;  %v670_v15 = vmul.f32 %v669_v28, %v600_v59 }
 0x37f   :  { %v611_v34 = vadd.f32 %v610_v0, %v607_v2  ;;  %v623_v24 = vadd.f32 %v622_v14, %v619_v3  ;;  %v655_v61 = vadd.f32 %v654_v35, %v651_v4  ;;  %v675_v25 = vmul.f32 %v674_v39, %v597_v57 }
 0x380   :  { %v635_v29 = vadd.f32 %v634_v62, %v631_v12  ;;  %v647_v30 = vadd.f32 %v646_v1, %v643_v8  ;;  %v667_v33 = vadd.f32 %v666_v44, %v663_v9  ;;  %v682_v42 = vmul.f32 %v681_v50, %v600_v59 }
 0x381   :  { %v2833_v16 = vadd.f32 %v611_v34, %v2725_v5  ;;  %v2836_v58 = vadd.f32 %v623_v24, %v2728_v6  ;;  %v659_v45 = vadd.f32 %v658_v7, %v655_v61  ;;  %v679_v46 = vadd.f32 %v678_v52, %v675_v25 }
 0x382   :  { %v2839_v47 = vadd.f32 %v635_v29, %v2731_v11  ;;  %v2842_v48 = vadd.f32 %v647_v30, %v2734_v56  ;;  %v671_v49 = vadd.f32 %v670_v15, %v667_v33  ;;  %v687_v18 = vmul.f32 %v686_v53, %v597_v57 }
 0x383   :  { %697 = vadd.xlane.f32.xlu0 %v2833_v16  ;;  %v706_v36 = vmul.f32 %v2833_v16, %v2833_v16  ;;  %v2848_v5 = vadd.f32 %v659_v45, %v2737_v17  ;;  %v683_v6 = vadd.f32 %v682_v42, %v679_v46  ;;  %v694_v56 = vmul.f32 %v693_v51, %v600_v59 }
 0x384   :  { %v2851_v60 = vadd.f32 %v671_v49, %v2740_v27  ;;  %v691_v19 = vadd.f32 %v690_v10, %v687_v18  ;;  %v741_v21 = vmul.f32 %v2836_v58, %v2836_v58  ;;  %v776_v27 = vmul.f32 %v2839_v47, %v2839_v47 }
 0x385   :  { %707 = vadd.xlane.f32.xlu1 %v706_v36  ;;  %v2854_v11 = vadd.f32 %v683_v6, %v2743_v38  ;;  %v811_v38 = vmul.f32 %v2842_v48, %v2842_v48  ;;  %v846_v22 = vmul.f32 %v2848_v5, %v2848_v5 }
 0x386   :  { %v695_v20 = vadd.f32 %v694_v56, %v691_v19 }
 0x387   :  { %732 = vadd.xlane.f32.xlu0 %v2836_v58  ;;  %v916_v26 = vmul.f32 %v2854_v11, %v2854_v11 }
 0x388   :  { %v2861_v17 = vadd.f32 %v695_v20, %v2746_v41  ;;  %v881_v41 = vmul.f32 %v2851_v60, %v2851_v60 }
 0x389   :  { %767 = vadd.xlane.f32.xlu1 %v2839_v47 }
 0x38a   :  { %v951_v55 = vmul.f32 %v2861_v17, %v2861_v17 }
 0x38b   :  { %742 = vadd.xlane.f32.xlu0 %v741_v21 }
 0x38d   :  { %802 = vadd.xlane.f32.xlu1 %v2842_v48 }
 0x38f   :  { %777 = vadd.xlane.f32.xlu0 %v776_v27 }
 0x391   :  { %837 = vadd.xlane.f32.xlu1 %v2848_v5 }
 0x393   :  { %812 = vadd.xlane.f32.xlu0 %v811_v38 }
 0x395   :  { %872 = vadd.xlane.f32.xlu1 %v2851_v60 }
 0x397   :  { %847 = vadd.xlane.f32.xlu0 %v846_v22 }
 0x399   :  { %907 = vadd.xlane.f32.xlu1 %v2854_v11 }
 0x39b   :  { %882 = vadd.xlane.f32.xlu0 %v881_v41 }
 0x39d   :  { %942 = vadd.xlane.f32.xlu1 %v2861_v17 }
 0x39f   :  { %917 = vadd.xlane.f32.xlu0 %v916_v26 }
 0x3a3   :  { %952 = vadd.xlane.f32.xlu0 %v951_v55 }
 0x40c   :  { %v698_v28 = vpop.xlane.xlu0 %697 }
 0x40d   :  { %v699_v31 = vrot.slane %v698_v28, 4 }
 0x40e   :  { %v708_v32 = vpop.xlane.xlu1 %707 }
 0x40f   :  { %v700_v35 = vadd.f32 %v699_v31, %v698_v28  ;;  %v709_v39 = vrot.slane %v708_v32, 4 }
 0x410   :  { %v733_v51 = vpop.xlane.xlu0 %732 }
 0x411   :  { %v701_v43 = vrot.slane %v700_v35, 2  ;;  %v710_v23 = vadd.f32 %v709_v39, %v708_v32  ;;  %v734_v0 = vrot.slane %v733_v51, 4 }
 0x412   :  { %v768_v61 = vpop.xlane.xlu1 %767 }
 0x413   :  { %v711_v44 = vrot.slane %v710_v23, 2  ;;  %v702_v52 = vadd.f32 %v701_v43, %v700_v35  ;;  %v735_v14 = vadd.f32 %v734_v0, %v733_v51  ;;  %v769_v33 = vrot.slane %v768_v61, 4 }
 0x414   :  { %v743_v13 = vpop.xlane.xlu0 %742 }
 0x415   :  { %v703_v50 = vrot.slane %v702_v52, 1  ;;  %v712_v53 = vadd.f32 %v711_v44, %v710_v23  ;;  %v744_v54 = vrot.slane %v743_v13, 4  ;;  %v736_v63 = vrot.slane %v735_v14, 2 }
 0x416   :  { %v803_v55 = vpop.xlane.xlu1 %802 }
 0x417   :  { %v704_v57 = vadd.f32 %v703_v50, %v702_v52  ;;  %v713_v59 = vrot.slane %v712_v53, 1  ;;  %v745_v40 = vadd.f32 %v744_v54, %v743_v13  ;;  %v737_v2 = vadd.f32 %v736_v63, %v735_v14 }
 0x418   :  { %v778_v29 = vpop.xlane.xlu0 %777  ;;  %v804_v35 = vrot.slane %v803_v55, 4 }
 0x419   :  { %2088 = vpush %v704_v57  ;;  %v714_v10 = vadd.f32 %v713_v59, %v712_v53  ;;  %v746_v1 = vrot.slane %v745_v40, 2  ;;  %v738_v4 = vrot.slane %v737_v2, 1  ;;  %v779_v42 = vrot.slane %v778_v29, 4 }
 0x41b   :  { %2090 = vpush %v714_v10  ;;  %v747_v3 = vadd.f32 %v746_v1, %v745_v40  ;;  %v739_v8 = vadd.f32 %v738_v4, %v737_v2  ;;  %v780_v46 = vadd.f32 %v779_v42, %v778_v29 }
 0x41c   :  { %v813_v31 = vpop.xlane.xlu0 %812 }
 0x41d   :  { %v748_v7 = vrot.slane %v747_v3, 1  ;;  %v781_v36 = vrot.slane %v780_v46, 2  ;;  %v814_v39 = vrot.slane %v813_v31, 4 }
 0x41f   :  { %v749_v9 = vadd.f32 %v748_v7, %v747_v3  ;;  %v782_v19 = vadd.f32 %v781_v36, %v780_v46  ;;  %v815_v23 = vadd.f32 %v814_v39, %v813_v31 }
 0x420   :  { %v848_v1 = vpop.xlane.xlu0 %847 }
 0x421   :  { %v783_v20 = vrot.slane %v782_v19, 1  ;;  %v816_v50 = vrot.slane %v815_v23, 2  ;;  %v849_v4 = vrot.slane %v848_v1, 4 }
 0x423   :  { %v784_v38 = vadd.f32 %v783_v20, %v782_v19  ;;  %v817_v57 = vadd.f32 %v816_v50, %v815_v23 }
 0x424   :  { %v2957_v46 = vpop.xlane.xlu0 %882 }
 0x425   :  { %v818_v10 = vrot.slane %v817_v57, 1 }
 0x427   :  { %v819_v0 = vadd.f32 %v818_v10, %v817_v57 }
 0x428   :  { %v2973_v36 = vpop.xlane.xlu0 %917 }
 0x44a   :  { %s2089_s23 = spop %2088 }
 0x44b   :  { %s716_s7 = smul.f32 0.0009765625, %s2089_s23 }
 0x44c   :  { %s2091_s25 = spop %2090 }
 0x44d   :  { %s718_s24 = smul.f32 %s716_s7, %s716_s7  ;;  %v721_v15 = vstv %s716_s7 }
 0x44e   :  { %s717_s5 = smul.f32 0.0009765625, %s2091_s25  ;;  %v722_v34 = vsub.f32 %v2833_v16, %v721_v15  ;;  %v770_v16 = vadd.f32 %v769_v33, %v768_v61 }
 0x450   :  { %s719_s26 = ssub.f32 %s717_s5, %s718_s24  ;;  %v771_v18 = vrot.slane %v770_v16, 2 }
 0x452   :  { %s720_s27 = smax.f32 %s3508_s0, %s719_s26  ;;  %v772_v6 = vadd.f32 %v771_v18, %v770_v16 }
 0x453   :  { %s723_s6 = sadd.f32 1e-05, %s720_s27 }
 0x454   :  { %v773_v56 = vrot.slane %v772_v6, 1 }
 0x455   :  { %v724_v62 = vstv %s723_s6  ;;  %s2919_s6 = sld [smem:[#allocation7 + $0x1]] }
 0x456   :  { %2184 = vrsqrt.f32 %v724_v62  ;;  %v774_v27 = vadd.f32 %v773_v56, %v772_v6  ;;  %v838_v62 = vpop.xlane.xlu1 %837 }
 0x457   :  { %v839_v3 = vrot.slane %v838_v62, 4 }
 0x45b   :  { %v987_v6 = vstv %s2919_s6 }
 0x463   :  { %v2185_v12 = vpop.eup %2184 }
 0x464   :  { %2092 = vpush %v2185_v12  ;;  %v850_v12 = vadd.f32 %v849_v4, %v848_v1 }
 0x465   :  { %2094 = vpush %v739_v8 }
 0x466   :  { %2096 = vpush %v749_v9  ;;  %v851_v15 = vrot.slane %v850_v12, 2 }
 0x468   :  { %v852_v61 = vadd.f32 %v851_v15, %v850_v12 }
 0x46a   :  { %v853_v29 = vrot.slane %v852_v61, 1 }
 0x46c   :  { %v854_v16 = vadd.f32 %v853_v29, %v852_v61 }
 0x495   :  { %s2093_s8 = spop %2092 }
 0x496   :  { %v727_v24 = vstv %s2093_s8  ;;  %s2095_s9 = spop %2094  ;;  %s2921_s8 = sld [smem:[#allocation7 + $0x19]] }
 0x497   :  { %v728_v25 = vmul.f32 %v727_v24, %v722_v34  ;;  %s2882_s11 = smul.f32 0.0009765625, %s2095_s9  ;;  %s2097_s13 = spop %2096  ;;  %v2929_v24 = vpop.xlane.xlu1 %872 }
 0x498   :  { %s752_s3 = smul.f32 0.0009765625, %s2097_s13  ;;  %s2923_s9 = sld [smem:[#allocation7 + $0x31]] }
 0x499   :  { %vm729_vm6 = vcmp.gt.f32.partialorder %v728_v25, 0.0  ;;  %v730_v30 = vmul.f32 0.01, %v728_v25  ;;  %s753_s12 = smul.f32 %s2882_s11, %s2882_s11  ;;  %v756_v22 = vstv %s2882_s11  ;;  %s2925_s11 = sld [smem:[#allocation7 + $0x49]] }
 0x49a   :  { %v757_v41 = vsub.f32 %v2836_v58, %v756_v22  ;;  %v805_v58 = vadd.f32 %v804_v35, %v803_v55  ;;  %s2927_s13 = sld [smem:[#allocation7 + $0x4]] }
 0x49b   :  { %v2886_v45 = vsel %vm729_vm6, %v728_v25, %v730_v30  ;;  %s754_s20 = ssub.f32 %s752_s3, %s753_s12  ;;  %v2943_v30 = vpop.xlane.xlu1 %907 }
 0x49c   :  { %977 = vrot.lane.b32.xlu1 %v2886_v45, %s3506_s29  ;;  %v806_v52 = vrot.slane %v805_v58, 2  ;;  %s2931_s3 = sld [smem:[#allocation7 + $0x1c]]  ;;  %v998_v19 = vstv %s2921_s8 }
 0x49d   :  { %s755_s21 = smax.f32 %s3508_s0, %s754_s20  ;;  %s2933_s12 = sld [smem:[#allocation7 + $0x34]]  ;;  %v999_v23 = vmul.f32 %v998_v19, %v2886_v45 }
 0x49e   :  { %s758_s10 = sadd.f32 1e-05, %s755_s21  ;;  %v807_v53 = vadd.f32 %v806_v52, %v805_v58  ;;  %v1009_v56 = vstv %s2923_s9  ;;  %v988_v58 = vmul.f32 %v987_v6, %v2886_v45 }
 0x49f   :  { %s2935_s20 = sld [smem:[#allocation7 + $0x4c]]  ;;  %v1020_v20 = vstv %s2925_s11 }
 0x4a0   :  { %v759_v49 = vstv %s758_s10  ;;  %980 = vrot.lane.b32.xlu1 %v2886_v45, %s3505_s28  ;;  %v808_v59 = vrot.slane %v807_v53, 1  ;;  %s2937_s21 = sld [smem:[#allocation7]] }
 0x4a1   :  { %2186 = vrsqrt.f32 %v759_v49  ;;  %s2939_s10 = sld [smem:[#allocation7 + $0x18]]  ;;  %v2959_v49 = vpop.xlane.xlu1 %942 }
 0x4a2   :  { %v809_v13 = vadd.f32 %v808_v59, %v807_v53  ;;  %v1021_v53 = vmul.f32 %v1020_v20, %v2886_v45 }
 0x4a5   :  { %v1073_v22 = vstv %s2935_s20  ;;  %s1928_s20 = sld [smem:[#allocation7 + $0x37]] }
 0x4ae   :  { %v2187_v21 = vpop.eup %2186 }
 0x4af   :  { %2098 = vpush %v2187_v21  ;;  %v1037_v21 = vstv %s2927_s13 }
 0x4b0   :  { %2100 = vpush %v774_v27  ;;  %v1049_v27 = vstv %s2931_s3  ;;  %s1922_s3 = sld [smem:[#allocation7 + $0x7]] }
 0x4b1   :  { %2102 = vpush %v784_v38  ;;  %v1061_v38 = vstv %s2933_s12  ;;  %s1925_s12 = sld [smem:[#allocation7 + $0x1f]] }
 0x4e0   :  { %s2099_s30 = spop %2098 }
 0x4e1   :  { %v762_v26 = vstv %s2099_s30  ;;  %s2101_s16 = spop %2100  ;;  %s2941_s30 = sld [smem:[#allocation7 + $0x30]] }
 0x4e2   :  { %v763_v28 = vmul.f32 %v762_v26, %v757_v41  ;;  %s2895_s2 = smul.f32 0.0009765625, %s2101_s16  ;;  %s2103_s14 = spop %2102  ;;  %v984_v41 = vstv %s2937_s21  ;;  %v995_v26 = vstv %s2939_s10 }
 0x4e3   :  { %s787_s15 = smul.f32 0.0009765625, %s2103_s14  ;;  %s2945_s16 = sld [smem:[#allocation7 + $0x48]] }
 0x4e4   :  { %vm764_vm7 = vcmp.gt.f32.partialorder %v763_v28, 0.0  ;;  %v765_v32 = vmul.f32 0.01, %v763_v28  ;;  %s788_s17 = smul.f32 %s2895_s2, %s2895_s2  ;;  %v791_v54 = vstv %s2895_s2  ;;  %s2947_s2 = sld [smem:[#allocation7 + $0x2]] }
 0x4e5   :  { %v792_v14 = vsub.f32 %v2839_v47, %v791_v54  ;;  %v840_v47 = vadd.f32 %v839_v3, %v838_v62  ;;  %s2949_s14 = sld [smem:[#allocation7 + $0x1a]] }
 0x4e6   :  { %v2899_v43 = vsel %vm764_vm7, %v763_v28, %v765_v32  ;;  %s789_s18 = ssub.f32 %s787_s15, %s788_s17 }
 0x4e7   :  { %1027 = vrot.lane.b32.xlu0 %v2899_v43, %s3506_s29  ;;  %1030 = vrot.lane.b32.xlu1 %v2899_v43, %s3505_s28  ;;  %v841_v9 = vrot.slane %v840_v47, 2  ;;  %s2951_s15 = sld [smem:[#allocation7 + $0x32]]  ;;  %v1006_v55 = vstv %s2941_s30 }
 0x4e8   :  { %s790_s19 = smax.f32 %s3508_s0, %s789_s18  ;;  %s2953_s17 = sld [smem:[#allocation7 + $0x4a]] }
 0x4e9   :  { %s793_s1 = sadd.f32 1e-05, %s790_s19  ;;  %v842_v34 = vadd.f32 %v841_v9, %v840_v47  ;;  %v1017_v31 = vstv %s2945_s16  ;;  %v1074_v9 = vmul.f32 %v1073_v22, %v2899_v43 }
 0x4ea   :  { %s2955_s18 = sld [smem:[#allocation7 + $0x3]]  ;;  %v991_v32 = vstv %s2947_s2 }
 0x4eb   :  { %v794_v44 = vstv %s793_s1  ;;  %v843_v25 = vrot.slane %v842_v34, 1  ;;  %s2961_s19 = sld [smem:[#allocation7 + $0x1b]]  ;;  %v1002_v35 = vstv %s2949_s14 }
 0x4ec   :  { %2188 = vrsqrt.f32 %v794_v44  ;;  %s2963_s1 = sld [smem:[#allocation7 + $0x33]]  ;;  %v1010_v44 = vmul.f32 %v1009_v56, %v2886_v45  ;;  %v1050_v45 = vmul.f32 %v1049_v27, %v2899_v43 }
 0x4ed   :  { %v844_v42 = vadd.f32 %v843_v25, %v842_v34  ;;  %v1013_v39 = vstv %s2951_s15  ;;  %s1931_s21 = sld [smem:[#allocation7 + $0x4f]] }
 0x4ee   :  { %v1024_v52 = vstv %s2953_s17  ;;  %s1921_s10 = sld [smem:[#allocation7 + $0x6]] }
 0x4ef   :  { %s1924_s30 = sld [smem:[#allocation7 + $0x1e]] }
 0x4f0   :  { %v1034_v10 = vstv %s2955_s18  ;;  %s1927_s16 = sld [smem:[#allocation7 + $0x36]] }
 0x4f1   :  { %v1046_v54 = vstv %s2961_s19  ;;  %s1930_s2 = sld [smem:[#allocation7 + $0x4e]] }
 0x4f2   :  { %s1923_s14 = sld [smem:[#allocation7 + $0x8]] }
 0x4f3   :  { %s1926_s15 = sld [smem:[#allocation7 + $0x20]] }
 0x4f4   :  { %s1929_s17 = sld [smem:[#allocation7 + $0x38]] }
 0x4f5   :  { %s1932_s18 = sld [smem:[#allocation7 + $0x50]] }
 0x4f9   :  { %v2189_v51 = vpop.eup %2188 }
 0x4fa   :  { %2104 = vpush %v2189_v51  ;;  %v3000_v51 = vpop.xlane.xlu0 %952 }
 0x4fb   :  { %2106 = vpush %v809_v13 }
 0x4fc   :  { %2108 = vpush %v819_v0 }
 0x50e   :  { %v978_v18 = vpop.permute.xlu1 %977 }
 0x50f   :  { %v979_v28 = vsel %vm105_vm0, %v978_v18, 0.0 }
 0x510   :  { %v985_v57 = vmul.f32 %v984_v41, %v979_v28  ;;  %v996_v59 = vmul.f32 %v995_v26, %v979_v28  ;;  %v1007_v13 = vmul.f32 %v1006_v55, %v979_v28  ;;  %v1018_v0 = vmul.f32 %v1017_v31, %v979_v28 }
 0x512   :  { %v981_v50 = vpop.permute.xlu1 %980  ;;  %v989_v47 = vadd.f32 %v988_v58, %v985_v57  ;;  %v1000_v12 = vadd.f32 %v999_v23, %v996_v59  ;;  %v1011_v15 = vadd.f32 %v1010_v44, %v1007_v13  ;;  %v1022_v34 = vadd.f32 %v1021_v53, %v1018_v0 }
 0x52b   :  { %s2105_s4 = spop %2104 }
 0x52c   :  { %v797_v40 = vstv %s2105_s4  ;;  %s2107_s22 = spop %2106  ;;  %s2965_s4 = sld [smem:[#allocation7 + $0x4b]] }
 0x52d   :  { %v798_v63 = vmul.f32 %v797_v40, %v792_v14  ;;  %s2908_s23 = smul.f32 0.0009765625, %s2107_s22  ;;  %s2109_s7 = spop %2108  ;;  %v1058_v14 = vstv %s2963_s1  ;;  %v982_v40 = vsel %vm109_vm1, %v981_v50, 0.0 }
 0x52e   :  { %s822_s24 = smul.f32 0.0009765625, %s2109_s7  ;;  %s2967_s22 = sld [smem:[#allocation7 + $0x5]]  ;;  %v992_v61 = vmul.f32 %v991_v32, %v982_v40  ;;  %v1003_v25 = vmul.f32 %v1002_v35, %v982_v40 }
 0x52f   :  { %vm799_vm8 = vcmp.gt.f32.partialorder %v798_v63, 0.0  ;;  %v800_v2 = vmul.f32 0.01, %v798_v63  ;;  %s823_s25 = smul.f32 %s2908_s23, %s2908_s23  ;;  %s2969_s7 = sld [smem:[#allocation7 + $0x1d]] }
 0x530   :  { %v993_v31 = vadd.f32 %v992_v61, %v989_v47  ;;  %v1004_v32 = vadd.f32 %v1003_v25, %v1000_v12  ;;  %v1088_v61 = vstv %s1921_s10  ;;  %v1100_v25 = vstv %s1924_s30  ;;  %s1944_s10 = sld [smem:[#allocation7 + $0x53]] }
 0x531   :  { %v2912_v7 = vsel %vm799_vm8, %v798_v63, %v800_v2  ;;  %s824_s5 = ssub.f32 %s822_s24, %s823_s25  ;;  %v1038_v2 = vmul.f32 %v1037_v21, %v2899_v43 }
 0x532   :  { %1084 = vrot.lane.b32.xlu1 %v2912_v7, %s3505_s28  ;;  %1081 = vrot.lane.b32.xlu0 %v2912_v7, %s3506_s29  ;;  %s2971_s24 = sld [smem:[#allocation7 + $0x35]]  ;;  %v1070_v62 = vstv %s2965_s4 }
 0x533   :  { %s825_s26 = smax.f32 %s3508_s0, %s824_s5  ;;  %s2979_s25 = sld [smem:[#allocation7 + $0x4d]] }
 0x534   :  { %s828_s27 = sadd.f32 1e-05, %s825_s26  ;;  %v1041_v63 = vstv %s2967_s22 }
 0x535   :  { %v1053_v1 = vstv %s2969_s7 }
 0x536   :  { %v829_v8 = vstv %s828_s27 }
 0x537   :  { %2190 = vrsqrt.f32 %v829_v8  ;;  %v1062_v8 = vmul.f32 %v1061_v38, %v2899_v43 }
 0x538   :  { %v1065_v3 = vstv %s2971_s24 }
 0x539   :  { %v1077_v4 = vstv %s2979_s25 }
 0x544   :  { %v2191_v33 = vpop.eup %2190 }
 0x545   :  { %2110 = vpush %v2191_v33 }
 0x546   :  { %2112 = vpush %v844_v42  ;;  %v1014_v42 = vmul.f32 %v1013_v39, %v982_v40 }
 0x547   :  { %2114 = vpush %v854_v16  ;;  %v1025_v16 = vmul.f32 %v1024_v52, %v982_v40  ;;  %v874_v40 = vrot.slane %v2929_v24, 4 }
 0x548   :  { %v1015_v35 = vadd.f32 %v1014_v42, %v1011_v15  ;;  %v1112_v42 = vstv %s1927_s16 }
 0x549   :  { %v1026_v39 = vadd.f32 %v1025_v16, %v1022_v34  ;;  %v1124_v16 = vstv %s1930_s2 }
 0x559   :  { %v1028_v29 = vpop.permute.xlu0 %1027  ;;  %v1031_v33 = vpop.permute.xlu1 %1030 }
 0x55a   :  { %v1029_v18 = vsel %vm105_vm0, %v1028_v29, 0.0  ;;  %v1032_v6 = vsel %vm109_vm1, %v1031_v33, 0.0  ;;  %v1115_v29 = vstv %s1928_s20  ;;  %v1127_v33 = vstv %s1931_s21  ;;  %s1938_s20 = sld [smem:[#allocation7 + $0x23]] }
 0x55b   :  { %v1035_v19 = vmul.f32 %v1034_v10, %v1029_v18  ;;  %v1047_v56 = vmul.f32 %v1046_v54, %v1029_v18  ;;  %v1059_v20 = vmul.f32 %v1058_v14, %v1029_v18  ;;  %v1071_v21 = vmul.f32 %v1070_v62, %v1029_v18  ;;  %s1941_s21 = sld [smem:[#allocation7 + $0x3b]] }
 0x55c   :  { %v1042_v27 = vmul.f32 %v1041_v63, %v1032_v6  ;;  %v1054_v43 = vmul.f32 %v1053_v1, %v1032_v6  ;;  %v1066_v38 = vmul.f32 %v1065_v3, %v1032_v6  ;;  %v1078_v22 = vmul.f32 %v1077_v4, %v1032_v6 }
 0x55d   :  { %v1039_v41 = vadd.f32 %v1038_v2, %v1035_v19  ;;  %v1051_v26 = vadd.f32 %v1050_v45, %v1047_v56  ;;  %v1063_v55 = vadd.f32 %v1062_v8, %v1059_v20  ;;  %v1075_v28 = vadd.f32 %v1074_v9, %v1071_v21 }
 0x55e   :  { %v826_v10 = vstv %s2908_s23  ;;  %v884_v62 = vrot.slane %v2957_v46, 4  ;;  %v1095_v18 = vstv %s1923_s14  ;;  %v1107_v6 = vstv %s1926_s15 }
 0x55f   :  { %v1043_v58 = vadd.f32 %v1042_v27, %v1039_v41  ;;  %v1055_v23 = vadd.f32 %v1054_v43, %v1051_v26  ;;  %v1067_v44 = vadd.f32 %v1066_v38, %v1063_v55  ;;  %v1079_v52 = vadd.f32 %v1078_v22, %v1075_v28 }
 0x560   :  { %v827_v13 = vsub.f32 %v2842_v48, %v826_v10  ;;  %v875_v48 = vadd.f32 %v874_v40, %v2929_v24  ;;  %v885_v1 = vadd.f32 %v884_v62, %v2957_v46  ;;  %v1091_v24 = vstv %s1922_s3  ;;  %s1942_s3 = sld [smem:[#allocation7 + $0x51]] }
 0x561   :  { %v3019_v50 = vadd.f32 %v1043_v58, %v993_v31  ;;  %v3021_v53 = vadd.f32 %v1055_v23, %v1004_v32  ;;  %v3023_v57 = vadd.f32 %v1067_v44, %v1015_v35  ;;  %v3025_v59 = vadd.f32 %v1079_v52, %v1026_v39 }
 0x562   :  { %v876_v45 = vrot.slane %v875_v48, 2  ;;  %v886_v3 = vrot.slane %v885_v1, 2  ;;  %v1103_v46 = vstv %s1925_s12  ;;  %v1092_v56 = vmul.f32 %v1091_v24, %v2912_v7  ;;  %s1935_s12 = sld [smem:[#allocation7 + $0xb]] }
 0x563   :  { %v1104_v20 = vmul.f32 %v1103_v46, %v2912_v7  ;;  %v1119_v21 = vstv %s1929_s17  ;;  %v1131_v27 = vstv %s1932_s18  ;;  %v1116_v22 = vmul.f32 %v1115_v29, %v2912_v7 }
 0x564   :  { %v877_v4 = vadd.f32 %v876_v45, %v875_v48  ;;  %v887_v47 = vadd.f32 %v886_v3, %v885_v1  ;;  %v1128_v41 = vmul.f32 %v1127_v33, %v2912_v7 }
 0x566   :  { %v878_v12 = vrot.slane %v877_v4, 1  ;;  %v888_v8 = vrot.slane %v887_v47, 1 }
 0x568   :  { %v879_v15 = vadd.f32 %v878_v12, %v877_v4  ;;  %v889_v34 = vadd.f32 %v888_v8, %v887_v47 }
 0x576   :  { %s2111_s5 = spop %2110 }
 0x577   :  { %v832_v0 = vstv %s2111_s5  ;;  %s2113_s26 = spop %2112 }
 0x578   :  { %v833_v54 = vmul.f32 %v832_v0, %v827_v13  ;;  %s3029_s27 = smul.f32 0.0009765625, %s2113_s26  ;;  %s2115_s6 = spop %2114 }
 0x579   :  { %s857_s8 = smul.f32 0.0009765625, %s2115_s6  ;;  %s1937_s6 = sld [smem:[#allocation7 + $0x22]] }
 0x57a   :  { %vm834_vm9 = vcmp.gt.f32.partialorder %v833_v54, 0.0  ;;  %v835_v14 = vmul.f32 0.01, %v833_v54  ;;  %s858_s9 = smul.f32 %s3029_s27, %s3029_s27 }
 0x57c   :  { %v3035_v63 = vsel %vm834_vm9, %v833_v54, %v835_v14  ;;  %s859_s23 = ssub.f32 %s857_s8, %s858_s9 }
 0x57d   :  { %1138 = vrot.lane.b32.xlu1 %v3035_v63, %s3505_s28  ;;  %1135 = vrot.lane.b32.xlu0 %v3035_v63, %s3506_s29  ;;  %s1940_s8 = sld [smem:[#allocation7 + $0x3a]] }
 0x57e   :  { %s860_s11 = smax.f32 %s3508_s0, %s859_s23  ;;  %s1943_s9 = sld [smem:[#allocation7 + $0x52]] }
 0x57f   :  { %s863_s13 = sadd.f32 1e-05, %s860_s11 }
 0x580   :  { %s1933_s23 = sld [smem:[#allocation7 + $0x9]] }
 0x581   :  { %v864_v2 = vstv %s863_s13  ;;  %s1936_s11 = sld [smem:[#allocation7 + $0x21]] }
 0x582   :  { %2192 = vrsqrt.f32 %v864_v2  ;;  %v861_v2 = vstv %s3029_s27  ;;  %s1934_s27 = sld [smem:[#allocation7 + $0xa]] }
 0x583   :  { %v862_v45 = vsub.f32 %v2848_v5, %v861_v2  ;;  %s1939_s13 = sld [smem:[#allocation7 + $0x39]] }
 0x586   :  { %v1142_v33 = vstv %s1933_s23  ;;  %s1956_s23 = sld [smem:[#allocation7 + $0x56]] }
 0x58f   :  { %v2193_v9 = vpop.eup %2192 }
 0x590   :  { %2116 = vpush %v2193_v9 }
 0x591   :  { %2118 = vpush %v879_v15 }
 0x592   :  { %2120 = vpush %v889_v34 }
 0x5a4   :  { %v1082_v19 = vpop.permute.xlu0 %1081  ;;  %v1085_v43 = vpop.permute.xlu1 %1084 }
 0x5a5   :  { %v1083_v38 = vsel %vm105_vm0, %v1082_v19, 0.0  ;;  %v1086_v26 = vsel %vm109_vm1, %v1085_v43, 0.0  ;;  %v1178_v19 = vstv %s1942_s3 }
 0x5a6   :  { %v1089_v55 = vmul.f32 %v1088_v61, %v1083_v38  ;;  %v1101_v28 = vmul.f32 %v1100_v25, %v1083_v38  ;;  %v1113_v31 = vmul.f32 %v1112_v42, %v1083_v38  ;;  %v1125_v32 = vmul.f32 %v1124_v16, %v1083_v38 }
 0x5a7   :  { %v1096_v35 = vmul.f32 %v1095_v18, %v1086_v26  ;;  %v1108_v39 = vmul.f32 %v1107_v6, %v1086_v26  ;;  %v1120_v58 = vmul.f32 %v1119_v21, %v1086_v26  ;;  %v1132_v23 = vmul.f32 %v1131_v27, %v1086_v26 }
 0x5a8   :  { %v1093_v44 = vadd.f32 %v1092_v56, %v1089_v55  ;;  %v1105_v52 = vadd.f32 %v1104_v20, %v1101_v28  ;;  %v1117_v10 = vadd.f32 %v1116_v22, %v1113_v31  ;;  %v1129_v13 = vadd.f32 %v1128_v41, %v1125_v32 }
 0x5a9   :  { %v1154_v42 = vstv %s1936_s11  ;;  %v1169_v16 = vstv %s1940_s8  ;;  %v1181_v18 = vstv %s1943_s9  ;;  %v1166_v6 = vstv %s1939_s13  ;;  %s1950_s8 = sld [smem:[#allocation7 + $0x26]] }
 0x5aa   :  { %v1097_v0 = vadd.f32 %v1096_v35, %v1093_v44  ;;  %v1109_v54 = vadd.f32 %v1108_v39, %v1105_v52  ;;  %v1121_v14 = vadd.f32 %v1120_v58, %v1117_v10  ;;  %v1133_v7 = vadd.f32 %v1132_v23, %v1129_v13  ;;  %s1953_s9 = sld [smem:[#allocation7 + $0x3e]] }
 0x5ab   :  { %v1149_v56 = vstv %s1935_s12  ;;  %v1161_v20 = vstv %s1938_s20  ;;  %v1173_v38 = vstv %s1941_s21  ;;  %v1185_v22 = vstv %s1944_s10 }
 0x5ac   :  { %v3053_v40 = vadd.f32 %v1097_v0, %v3019_v50  ;;  %v3056_v62 = vadd.f32 %v1109_v54, %v3021_v53  ;;  %v3059_v48 = vadd.f32 %v1121_v14, %v3023_v57  ;;  %v3062_v1 = vadd.f32 %v1133_v7, %v3025_v59 }
 0x5ad   :  { %v909_v53 = vrot.slane %v2943_v30, 4  ;;  %v919_v57 = vrot.slane %v2973_v36, 4  ;;  %v1170_v55 = vmul.f32 %v1169_v16, %v3035_v63  ;;  %v1182_v28 = vmul.f32 %v1181_v18, %v3035_v63 }
 0x5af   :  { %v910_v5 = vadd.f32 %v909_v53, %v2943_v30  ;;  %v920_v47 = vadd.f32 %v919_v57, %v2973_v36  ;;  %v1145_v30 = vstv %s1934_s27  ;;  %v1157_v36 = vstv %s1937_s6  ;;  %s1954_s27 = sld [smem:[#allocation7 + $0x54]] }
 0x5b0   :  { %v1146_v27 = vmul.f32 %v1145_v30, %v3035_v63  ;;  %v1158_v43 = vmul.f32 %v1157_v36, %v3035_v63  ;;  %s1947_s6 = sld [smem:[#allocation7 + $0xe]] }
 0x5b1   :  { %v911_v8 = vrot.slane %v910_v5, 2  ;;  %v921_v9 = vrot.slane %v920_v47, 2 }
 0x5b3   :  { %v912_v15 = vadd.f32 %v911_v8, %v910_v5  ;;  %v922_v34 = vadd.f32 %v921_v9, %v920_v47 }
 0x5b5   :  { %v913_v24 = vrot.slane %v912_v15, 1  ;;  %v923_v46 = vrot.slane %v922_v34, 1 }
 0x5b7   :  { %v914_v25 = vadd.f32 %v913_v24, %v912_v15  ;;  %v924_v29 = vadd.f32 %v923_v46, %v922_v34 }
 0x5c1   :  { %s2117_s19 = spop %2116 }
 0x5c2   :  { %v867_v3 = vstv %s2117_s19  ;;  %s2119_s1 = spop %2118 }
 0x5c3   :  { %v868_v4 = vmul.f32 %v867_v3, %v862_v45  ;;  %s3066_s4 = smul.f32 0.0009765625, %s2119_s1  ;;  %s2121_s22 = spop %2120 }
 0x5c4   :  { %s892_s7 = smul.f32 0.0009765625, %s2121_s22  ;;  %s1949_s22 = sld [smem:[#allocation7 + $0x25]] }
 0x5c5   :  { %vm869_vm10 = vcmp.gt.f32.partialorder %v868_v4, 0.0  ;;  %v870_v50 = vmul.f32 0.01, %v868_v4  ;;  %s893_s24 = smul.f32 %s3066_s4, %s3066_s4  ;;  %v896_v57 = vstv %s3066_s4  ;;  %s1946_s4 = sld [smem:[#allocation7 + $0xd]] }
 0x5c6   :  { %v897_v5 = vsub.f32 %v2851_v60, %v896_v57 }
 0x5c7   :  { %v3072_v59 = vsel %vm869_vm10, %v868_v4, %v870_v50  ;;  %s894_s25 = ssub.f32 %s892_s7, %s893_s24 }
 0x5c8   :  { %1192 = vrot.lane.b32.xlu1 %v3072_v59, %s3505_s28  ;;  %1189 = vrot.lane.b32.xlu0 %v3072_v59, %s3506_s29  ;;  %s1952_s7 = sld [smem:[#allocation7 + $0x3d]] }
 0x5c9   :  { %s895_s5 = smax.f32 %s3508_s0, %s894_s25  ;;  %s1955_s24 = sld [smem:[#allocation7 + $0x55]] }
 0x5ca   :  { %s898_s26 = sadd.f32 1e-05, %s895_s5 }
 0x5cb   :  { %s1945_s25 = sld [smem:[#allocation7 + $0xc]] }
 0x5cc   :  { %v899_v12 = vstv %s898_s26  ;;  %s1948_s5 = sld [smem:[#allocation7 + $0x24]] }
 0x5cd   :  { %2194 = vrsqrt.f32 %v899_v12  ;;  %s1951_s26 = sld [smem:[#allocation7 + $0x3c]] }
 0x5ce   :  { %v1223_v16 = vstv %s1952_s7  ;;  %s1962_s7 = sld [smem:[#allocation7 + $0x29]] }
 0x5cf   :  { %v1235_v18 = vstv %s1955_s24  ;;  %s1965_s24 = sld [smem:[#allocation7 + $0x41]] }
 0x5da   :  { %v2195_v61 = vpop.eup %2194 }
 0x5db   :  { %2122 = vpush %v2195_v61 }
 0x5dc   :  { %2124 = vpush %v914_v25 }
 0x5dd   :  { %2126 = vpush %v924_v29 }
 0x5ef   :  { %v1136_v21 = vpop.permute.xlu0 %1135  ;;  %v1139_v41 = vpop.permute.xlu1 %1138 }
 0x5f0   :  { %v1137_v26 = vsel %vm105_vm0, %v1136_v21, 0.0  ;;  %v1140_v31 = vsel %vm109_vm1, %v1139_v41, 0.0 }
 0x5f1   :  { %v1143_v32 = vmul.f32 %v1142_v33, %v1137_v26  ;;  %v1155_v35 = vmul.f32 %v1154_v42, %v1137_v26  ;;  %v1167_v39 = vmul.f32 %v1166_v6, %v1137_v26  ;;  %v1179_v58 = vmul.f32 %v1178_v19, %v1137_v26 }
 0x5f2   :  { %v1150_v23 = vmul.f32 %v1149_v56, %v1140_v31  ;;  %v1162_v44 = vmul.f32 %v1161_v20, %v1140_v31  ;;  %v1174_v52 = vmul.f32 %v1173_v38, %v1140_v31  ;;  %v1186_v10 = vmul.f32 %v1185_v22, %v1140_v31 }
 0x5f3   :  { %v1147_v13 = vadd.f32 %v1146_v27, %v1143_v32  ;;  %v1159_v0 = vadd.f32 %v1158_v43, %v1155_v35  ;;  %v1171_v54 = vadd.f32 %v1170_v55, %v1167_v39  ;;  %v1183_v14 = vadd.f32 %v1182_v28, %v1179_v58 }
 0x5f4   :  { %v1196_v33 = vstv %s1945_s25  ;;  %v1208_v42 = vstv %s1948_s5  ;;  %v1220_v6 = vstv %s1951_s26  ;;  %v1232_v19 = vstv %s1954_s27  ;;  %s1968_s25 = sld [smem:[#allocation7 + $0x59]] }
 0x5f5   :  { %v1151_v7 = vadd.f32 %v1150_v23, %v1147_v13  ;;  %v1163_v2 = vadd.f32 %v1162_v44, %v1159_v0  ;;  %v1175_v45 = vadd.f32 %v1174_v52, %v1171_v54  ;;  %v1187_v63 = vadd.f32 %v1186_v10, %v1183_v14  ;;  %s1970_s26 = sld [smem:[#allocation7 + $0x13]] }
 0x5f6   :  { %v1203_v56 = vstv %s1947_s6  ;;  %v1215_v20 = vstv %s1950_s8  ;;  %v1227_v38 = vstv %s1953_s9  ;;  %v1239_v22 = vstv %s1956_s23  ;;  %s1973_s27 = sld [smem:[#allocation7 + $0x2b]] }
 0x5f7   :  { %v3090_v3 = vadd.f32 %v1151_v7, %v3053_v40  ;;  %v3093_v4 = vadd.f32 %v1163_v2, %v3056_v62  ;;  %v3096_v50 = vadd.f32 %v1175_v45, %v3059_v48  ;;  %v3099_v53 = vadd.f32 %v1187_v63, %v3062_v1  ;;  %s1976_s6 = sld [smem:[#allocation7 + $0x43]] }
 0x5f8   :  { %v944_v62 = vrot.slane %v2959_v49, 4  ;;  %v954_v48 = vrot.slane %v3000_v51, 4  ;;  %v1224_v55 = vmul.f32 %v1223_v16, %v3072_v59  ;;  %v1236_v28 = vmul.f32 %v1235_v18, %v3072_v59  ;;  %s1979_s8 = sld [smem:[#allocation7 + $0x5b]] }
 0x5f9   :  { %s1969_s9 = sld [smem:[#allocation7 + $0x12]] }
 0x5fa   :  { %v945_v60 = vadd.f32 %v944_v62, %v2959_v49  ;;  %v955_v8 = vadd.f32 %v954_v48, %v3000_v51  ;;  %v1199_v49 = vstv %s1946_s4  ;;  %v1211_v51 = vstv %s1949_s22  ;;  %s1966_s4 = sld [smem:[#allocation7 + $0x57]] }
 0x5fb   :  { %v1200_v27 = vmul.f32 %v1199_v49, %v3072_v59  ;;  %v1212_v43 = vmul.f32 %v1211_v51, %v3072_v59  ;;  %s1959_s22 = sld [smem:[#allocation7 + $0x11]]  ;;  %v1281_v49 = vstv %s1965_s24  ;;  %v1293_v51 = vstv %s1968_s25 }
 0x5fc   :  { %v946_v15 = vrot.slane %v945_v60, 2  ;;  %v956_v34 = vrot.slane %v955_v8, 2  ;;  %s1972_s23 = sld [smem:[#allocation7 + $0x2a]] }
 0x5fe   :  { %v947_v24 = vadd.f32 %v946_v15, %v945_v60  ;;  %v957_v46 = vadd.f32 %v956_v34, %v955_v8 }
 0x600   :  { %v948_v61 = vrot.slane %v947_v24, 1  ;;  %v958_v25 = vrot.slane %v957_v46, 1 }
 0x602   :  { %v949_v30 = vadd.f32 %v948_v61, %v947_v24  ;;  %v959_v36 = vadd.f32 %v958_v25, %v957_v46  ;;  %v1286_v46 = vstv %s1966_s4  ;;  %v1257_v61 = vstv %s1959_s22 }
 0x603   :  { %v1269_v25 = vstv %s1962_s7  ;;  %s3509_s7 = sld [smem:[#allocation33_spill]] }
 0x60c   :  { %s2123_s30 = spop %2122 }
 0x60d   :  { %v902_v47 = vstv %s2123_s30  ;;  %s2125_s16 = spop %2124 }
 0x60e   :  { %v903_v12 = vmul.f32 %v902_v47, %v897_v5  ;;  %s3103_s2 = smul.f32 0.0009765625, %s2125_s16  ;;  %s2127_s14 = spop %2126 }
 0x60f   :  { %s927_s15 = smul.f32 0.0009765625, %s2127_s14  ;;  %s1961_s14 = sld [smem:[#allocation7 + $0x28]] }
 0x610   :  { %vm904_vm11 = vcmp.gt.f32.partialorder %v903_v12, 0.0  ;;  %v905_v40 = vmul.f32 0.01, %v903_v12  ;;  %s928_s17 = smul.f32 %s3103_s2, %s3103_s2 }
 0x612   :  { %v3109_v1 = vsel %vm904_vm11, %v903_v12, %v905_v40  ;;  %s929_s18 = ssub.f32 %s927_s15, %s928_s17  ;;  %v931_v12 = vstv %s3103_s2 }
 0x613   :  { %1246 = vrot.lane.b32.xlu1 %v3109_v1, %s3505_s28  ;;  %1243 = vrot.lane.b32.xlu0 %v3109_v1, %s3506_s29  ;;  %v932_v40 = vsub.f32 %v2854_v11, %v931_v12  ;;  %s1958_s2 = sld [smem:[#allocation7 + $0x10]] }
 0x614   :  { %s930_s19 = smax.f32 %s3508_s0, %s929_s18  ;;  %s1964_s15 = sld [smem:[#allocation7 + $0x40]] }
 0x615   :  { %s933_s1 = sadd.f32 1e-05, %s930_s19  ;;  %v1265_v60 = vstv %s1961_s14 }
 0x616   :  { %s1967_s17 = sld [smem:[#allocation7 + $0x58]] }
 0x617   :  { %v934_v9 = vstv %s933_s1  ;;  %s1957_s18 = sld [smem:[#allocation7 + $0xf]] }
 0x618   :  { %2196 = vrsqrt.f32 %v934_v9  ;;  %s1960_s19 = sld [smem:[#allocation7 + $0x27]] }
 0x619   :  { %s1963_s1 = sld [smem:[#allocation7 + $0x3f]] }
 0x61a   :  { %v1277_v15 = vstv %s1964_s15  ;;  %s1987_s14 = sld [smem:[#allocation7 + $0x45]] }
 0x61b   :  { %v1278_v16 = vmul.f32 %v1277_v15, %v3109_v1  ;;  %s1990_s15 = sld [smem:[#allocation7 + $0x5d]] }
 0x61c   :  { %v1289_v34 = vstv %s1967_s17  ;;  %s1983_s17 = sld [smem:[#allocation7 + $0x17]] }
 0x61d   :  { %v1250_v8 = vstv %s1957_s18  ;;  %v1290_v18 = vmul.f32 %v1289_v34, %v3109_v1  ;;  %s1986_s18 = sld [smem:[#allocation7 + $0x2f]] }
 0x61e   :  { %v1262_v9 = vstv %s1960_s19  ;;  %s1989_s19 = sld [smem:[#allocation7 + $0x47]] }
 0x61f   :  { %v1274_v24 = vstv %s1963_s1  ;;  %s1992_s1 = sld [smem:[#allocation7 + $0x5f]] }
 0x625   :  { %v2197_v29 = vpop.eup %2196 }
 0x626   :  { %2128 = vpush %v2197_v29 }
 0x627   :  { %2130 = vpush %v949_v30 }
 0x628   :  { %2132 = vpush %v959_v36  ;;  %v1266_v36 = vmul.f32 %v1265_v60, %v3109_v1 }
 0x63a   :  { %v1190_v21 = vpop.permute.xlu0 %1189  ;;  %v1193_v41 = vpop.permute.xlu1 %1192 }
 0x63b   :  { %v1191_v26 = vsel %vm105_vm0, %v1190_v21, 0.0  ;;  %v1194_v31 = vsel %vm109_vm1, %v1193_v41, 0.0 }
 0x63c   :  { %v1197_v32 = vmul.f32 %v1196_v33, %v1191_v26  ;;  %v1209_v35 = vmul.f32 %v1208_v42, %v1191_v26  ;;  %v1221_v39 = vmul.f32 %v1220_v6, %v1191_v26  ;;  %v1233_v58 = vmul.f32 %v1232_v19, %v1191_v26 }
 0x63d   :  { %v1204_v23 = vmul.f32 %v1203_v56, %v1194_v31  ;;  %v1216_v44 = vmul.f32 %v1215_v20, %v1194_v31  ;;  %v1228_v52 = vmul.f32 %v1227_v38, %v1194_v31  ;;  %v1240_v10 = vmul.f32 %v1239_v22, %v1194_v31 }
 0x63e   :  { %v1201_v13 = vadd.f32 %v1200_v27, %v1197_v32  ;;  %v1213_v0 = vadd.f32 %v1212_v43, %v1209_v35  ;;  %v1225_v54 = vadd.f32 %v1224_v55, %v1221_v39  ;;  %v1237_v14 = vadd.f32 %v1236_v28, %v1233_v58 }
 0x640   :  { %v1205_v7 = vadd.f32 %v1204_v23, %v1201_v13  ;;  %v1217_v2 = vadd.f32 %v1216_v44, %v1213_v0  ;;  %v1229_v45 = vadd.f32 %v1228_v52, %v1225_v54  ;;  %v1241_v59 = vadd.f32 %v1240_v10, %v1237_v14 }
 0x642   :  { %v3127_v63 = vadd.f32 %v1205_v7, %v3090_v3  ;;  %v3130_v57 = vadd.f32 %v1217_v2, %v3093_v4  ;;  %v3133_v5 = vadd.f32 %v1229_v45, %v3096_v50  ;;  %v3136_v47 = vadd.f32 %v1241_v59, %v3099_v53 }
 0x643   :  { %v1253_v53 = vstv %s1958_s2  ;;  %v1319_v7 = vstv %s1973_s27  ;;  %v1304_v2 = vstv %s1969_s9  ;;  %v1316_v45 = vstv %s1972_s23  ;;  %s1984_s2 = sld [smem:[#allocation7 + $0x2d]] }
 0x644   :  { %v1254_v30 = vmul.f32 %v1253_v53, %v3109_v1  ;;  %v1331_v59 = vstv %s1976_s6 }
 0x657   :  { %s2129_s11 = spop %2128 }
 0x658   :  { %v937_v62 = vstv %s2129_s11  ;;  %s2131_s13 = spop %2130  ;;  %s1975_s11 = sld [smem:[#allocation7 + $0x42]] }
 0x659   :  { %v938_v48 = vmul.f32 %v937_v62, %v932_v40  ;;  %s3140_s3 = smul.f32 0.0009765625, %s2131_s13  ;;  %s2133_s12 = spop %2132 }
 0x65a   :  { %s962_s20 = smul.f32 0.0009765625, %s2133_s12  ;;  %s1978_s13 = sld [smem:[#allocation7 + $0x5a]] }
 0x65b   :  { %vm939_vm12 = vcmp.gt.f32.partialorder %v938_v48, 0.0  ;;  %v940_v3 = vmul.f32 0.01, %v938_v48  ;;  %s963_s21 = smul.f32 %s3140_s3, %s3140_s3  ;;  %v966_v52 = vstv %s3140_s3  ;;  %s1971_s3 = sld [smem:[#allocation7 + $0x14]] }
 0x65c   :  { %v967_v10 = vsub.f32 %v2861_v17, %v966_v52  ;;  %s1974_s12 = sld [smem:[#allocation7 + $0x2c]]  ;;  %v1307_v17 = vstv %s1970_s26 }
 0x65d   :  { %v3144_v4 = vsel %vm939_vm12, %v938_v48, %v940_v3  ;;  %s964_s10 = ssub.f32 %s962_s20, %s963_s21 }
 0x65e   :  { %1300 = vrot.lane.b32.xlu1 %v3144_v4, %s3505_s28  ;;  %1297 = vrot.lane.b32.xlu0 %v3144_v4, %s3506_s29  ;;  %s1977_s20 = sld [smem:[#allocation7 + $0x44]]  ;;  %v1308_v62 = vmul.f32 %v1307_v17, %v3144_v4  ;;  %v1320_v48 = vmul.f32 %v1319_v7, %v3144_v4  ;;  %v1332_v60 = vmul.f32 %v1331_v59, %v3144_v4 }
 0x65f   :  { %s965_s30 = smax.f32 %s3508_s0, %s964_s10  ;;  %s1980_s21 = sld [smem:[#allocation7 + $0x5c]] }
 0x660   :  { %s968_s16 = sadd.f32 1e-05, %s965_s30 }
 0x661   :  { %s1988_s10 = sld [smem:[#allocation7 + $0x46]] }
 0x662   :  { %v969_v11 = vstv %s968_s16  ;;  %v1323_v12 = vstv %s1974_s12  ;;  %s1991_s30 = sld [smem:[#allocation7 + $0x5e]] }
 0x663   :  { %2198 = vrsqrt.f32 %v969_v11  ;;  %s1981_s16 = sld [smem:[#allocation7 + $0x15]] }
 0x664   :  { %v1335_v3 = vstv %s1977_s20 }
 0x665   :  { %v1347_v11 = vstv %s1980_s21 }
 0x670   :  { %v2199_v50 = vpop.eup %2198 }
 0x671   :  { %2134 = vpush %v2199_v50 }
 0x685   :  { %v1244_v29 = vpop.permute.xlu0 %1243  ;;  %v1247_v33 = vpop.permute.xlu1 %1246 }
 0x686   :  { %v1245_v42 = vsel %vm105_vm0, %v1244_v29, 0.0  ;;  %v1248_v6 = vsel %vm109_vm1, %v1247_v33, 0.0 }
 0x687   :  { %v1251_v19 = vmul.f32 %v1250_v8, %v1245_v42  ;;  %v1263_v56 = vmul.f32 %v1262_v9, %v1245_v42  ;;  %v1275_v20 = vmul.f32 %v1274_v24, %v1245_v42  ;;  %v1287_v21 = vmul.f32 %v1286_v46, %v1245_v42 }
 0x688   :  { %v1258_v27 = vmul.f32 %v1257_v61, %v1248_v6  ;;  %v1270_v43 = vmul.f32 %v1269_v25, %v1248_v6  ;;  %v1282_v38 = vmul.f32 %v1281_v49, %v1248_v6  ;;  %v1294_v22 = vmul.f32 %v1293_v51, %v1248_v6 }
 0x689   :  { %v1255_v41 = vadd.f32 %v1254_v30, %v1251_v19  ;;  %v1267_v26 = vadd.f32 %v1266_v36, %v1263_v56  ;;  %v1279_v55 = vadd.f32 %v1278_v16, %v1275_v20  ;;  %v1291_v28 = vadd.f32 %v1290_v18, %v1287_v21 }
 0x68b   :  { %v1259_v31 = vadd.f32 %v1258_v27, %v1255_v41  ;;  %v1271_v32 = vadd.f32 %v1270_v43, %v1267_v26  ;;  %v1283_v35 = vadd.f32 %v1282_v38, %v1279_v55  ;;  %v1295_v1 = vadd.f32 %v1294_v22, %v1291_v28 }
 0x68c   :  { %v1358_v43 = vstv %s1981_s16  ;;  %v1370_v38 = vstv %s1984_s2  ;;  %v1385_v22 = vstv %s1988_s10  ;;  %v1397_v41 = vstv %s1991_s30 }
 0x68d   :  { %v1260_v39 = vadd.f32 %v1259_v31, %v3127_v63  ;;  %v1272_v58 = vadd.f32 %v1271_v32, %v3130_v57  ;;  %v1284_v23 = vadd.f32 %v1283_v35, %v3133_v5  ;;  %v1296_v44 = vadd.f32 %v1295_v1, %v3136_v47 }
 0x68e   :  { %v1343_v63 = vstv %s1979_s8  ;;  %v1328_v57 = vstv %s1975_s11  ;;  %v1340_v5 = vstv %s1978_s13  ;;  %v1311_v47 = vstv %s1971_s3 }
 0x68f   :  { %v1344_v8 = vmul.f32 %v1343_v63, %v3144_v4  ;;  %v1382_v26 = vstv %s1987_s14  ;;  %v1394_v55 = vstv %s1990_s15  ;;  %v1365_v28 = vstv %s1983_s17 }
 0x690   :  { %v1377_v31 = vstv %s1986_s18 }
 0x6a2   :  { %s2135_s5 = spop %2134 }
 0x6a3   :  { %v972_v13 = vstv %s2135_s5 }
 0x6a4   :  { %v973_v0 = vmul.f32 %v972_v13, %v967_v10 }
 0x6a6   :  { %vm974_vm13 = vcmp.gt.f32.partialorder %v973_v0, 0.0  ;;  %v975_v54 = vmul.f32 0.01, %v973_v0 }
 0x6a8   :  { %v3165_v14 = vsel %vm974_vm13, %v973_v0, %v975_v54 }
 0x6a9   :  { %1354 = vrot.lane.b32.xlu1 %v3165_v14, %s3505_s28  ;;  %1351 = vrot.lane.b32.xlu0 %v3165_v14, %s3506_s29  ;;  %s1982_s28 = sld [smem:[#allocation7 + $0x16]]  ;;  %v1386_v52 = vmul.f32 %v1385_v22, %v3165_v14  ;;  %v1398_v10 = vmul.f32 %v1397_v41, %v3165_v14  ;;  %v1571_v22 = vld [vmem:[%s3509_s7 + $0xd0] sm:$0xff] }
 0x6aa   :  { %s1985_s29 = sld [smem:[#allocation7 + $0x2e]]  ;;  %v1555_v41 = vld [vmem:[%s3509_s7 + $0x50] sm:$0xff] }
 0x6af   :  { %v1361_v21 = vstv %s1982_s28 }
 0x6b0   :  { %v1373_v27 = vstv %s1985_s29  ;;  %v1362_v35 = vmul.f32 %v1361_v21, %v3165_v14  ;;  %v1573_v21 = vld [vmem:[%s3509_s7 + $0xe0] sm:$0xff] }
 0x6b1   :  { %v1374_v1 = vmul.f32 %v1373_v27, %v3165_v14  ;;  %v1557_v27 = vld [vmem:[%s3509_s7 + $0x60] sm:$0xff] }
 0x6d0   :  { %v1298_v40 = vpop.permute.xlu0 %1297  ;;  %v1301_v50 = vpop.permute.xlu1 %1300 }
 0x6d1   :  { %v1299_v53 = vsel %vm105_vm0, %v1298_v40, 0.0  ;;  %v1302_v9 = vsel %vm109_vm1, %v1301_v50, 0.0 }
 0x6d2   :  { %v1305_v15 = vmul.f32 %v1304_v2, %v1299_v53  ;;  %v1317_v34 = vmul.f32 %v1316_v45, %v1299_v53  ;;  %v1329_v24 = vmul.f32 %v1328_v57, %v1299_v53  ;;  %v1341_v46 = vmul.f32 %v1340_v5, %v1299_v53 }
 0x6d3   :  { %v1312_v61 = vmul.f32 %v1311_v47, %v1302_v9  ;;  %v1324_v25 = vmul.f32 %v1323_v12, %v1302_v9  ;;  %v1336_v29 = vmul.f32 %v1335_v3, %v1302_v9  ;;  %v1348_v30 = vmul.f32 %v1347_v11, %v1302_v9 }
 0x6d4   :  { %v1309_v36 = vadd.f32 %v1308_v62, %v1305_v15  ;;  %v1321_v49 = vadd.f32 %v1320_v48, %v1317_v34  ;;  %v1333_v51 = vadd.f32 %v1332_v60, %v1329_v24  ;;  %v1345_v33 = vadd.f32 %v1344_v8, %v1341_v46 }
 0x6d6   :  { %v1313_v42 = vadd.f32 %v1312_v61, %v1309_v36  ;;  %v1325_v16 = vadd.f32 %v1324_v25, %v1321_v49  ;;  %v1337_v18 = vadd.f32 %v1336_v29, %v1333_v51  ;;  %v1349_v6 = vadd.f32 %v1348_v30, %v1345_v33 }
 0x6d8   :  { %v1314_v4 = vadd.f32 %v1313_v42, %v1260_v39  ;;  %v1326_v19 = vadd.f32 %v1325_v16, %v1272_v58  ;;  %v1338_v56 = vadd.f32 %v1337_v18, %v1284_v23  ;;  %v1350_v20 = vadd.f32 %v1349_v6, %v1296_v44  ;;  %v1576_v18 = vld [vmem:[%s3509_s7 + $0xf8] sm:$0xff] }
 0x6d9   :  { %v1389_v39 = vstv %s1989_s19  ;;  %v1401_v58 = vstv %s1992_s1  ;;  %v1560_v6 = vld [vmem:[%s3509_s7 + $0x78] sm:$0xff]  ;;  %1994 = vmatprep.subr.mxu0 %v1576_v18 }
 0x6da   :  { %1995 = vmatpush3.msra.mxu0 %v1560_v6 }
 0x71b   :  { %v1352_v32 = vpop.permute.xlu0 %1351  ;;  %v1355_v23 = vpop.permute.xlu1 %1354 }
 0x71c   :  { %v1353_v44 = vsel %vm105_vm0, %v1352_v32, 0.0  ;;  %v1356_v13 = vsel %vm109_vm1, %v1355_v23, 0.0  ;;  %v1568_v32 = vld [vmem:[%s3509_s7 + $0xb8] sm:$0xff]  ;;  %v1550_v23 = vld [vmem:[%s3509_s7 + $0x28] sm:$0xff] }
 0x71d   :  { %v1359_v0 = vmul.f32 %v1358_v43, %v1353_v44  ;;  %v1371_v54 = vmul.f32 %v1370_v38, %v1353_v44  ;;  %v1383_v17 = vmul.f32 %v1382_v26, %v1353_v44  ;;  %v1395_v7 = vmul.f32 %v1394_v55, %v1353_v44  ;;  %v1572_v43 = vld [vmem:[%s3509_s7 + $0xd8] sm:$0xff]  ;;  %v1570_v26 = vld [vmem:[%s3509_s7 + $0xc8] sm:$0xff]  ;;  %v1565_v44 = vld [vmem:[%s3509_s7 + $0xa0] sm:$0xff] }
 0x71e   :  { %v1366_v2 = vmul.f32 %v1365_v28, %v1356_v13  ;;  %v1378_v45 = vmul.f32 %v1377_v31, %v1356_v13  ;;  %v1390_v59 = vmul.f32 %v1389_v39, %v1356_v13  ;;  %v1402_v63 = vmul.f32 %v1401_v58, %v1356_v13  ;;  %v1556_v38 = vld [vmem:[%s3509_s7 + $0x58] sm:$0xff]  ;;  %v1554_v55 = vld [vmem:[%s3509_s7 + $0x48] sm:$0xff]  ;;  %v1569_v28 = vld [vmem:[%s3509_s7 + $0xc0] sm:$0xff] }
 0x71f   :  { %v1363_v57 = vadd.f32 %v1362_v35, %v1359_v0  ;;  %v1375_v5 = vadd.f32 %v1374_v1, %v1371_v54  ;;  %v1387_v47 = vadd.f32 %v1386_v52, %v1383_v17  ;;  %v1399_v12 = vadd.f32 %v1398_v10, %v1395_v7  ;;  %v1553_v31 = vld [vmem:[%s3509_s7 + $0x40] sm:$0xff]  ;;  %v1552_v35 = vld [vmem:[%s3509_s7 + $0x38] sm:$0xff]  ;;  %v1567_v1 = vld [vmem:[%s3509_s7 + $0xb0] sm:$0xff] }
 0x720   :  { %v1551_v39 = vld [vmem:[%s3509_s7 + $0x30] sm:$0xff]  ;;  %v1566_v58 = vld [vmem:[%s3509_s7 + $0xa8] sm:$0xff]  ;;  %v1549_v52 = vld [vmem:[%s3509_s7 + $0x20] sm:$0xff] }
 0x721   :  { %v1367_v40 = vadd.f32 %v1366_v2, %v1363_v57  ;;  %v1379_v62 = vadd.f32 %v1378_v45, %v1375_v5  ;;  %v1391_v48 = vadd.f32 %v1390_v59, %v1387_v47  ;;  %v1403_v3 = vadd.f32 %v1402_v63, %v1399_v12  ;;  %v1564_v12 = vld [vmem:[%s3509_s7 + $0x98] sm:$0xff] }
 0x723   :  { %v3187_v14 = vadd.f32 %v1367_v40, %v1314_v4  ;;  %v3189_v37 = vadd.f32 %v1379_v62, %v1326_v19  ;;  %v3191_v11 = vadd.f32 %v1391_v48, %v1338_v56  ;;  %v3193_v50 = vadd.f32 %v1403_v3, %v1350_v20  ;;  %v1575_v4 = vld [vmem:[%s3509_s7 + $0xf0] sm:$0xff]  ;;  %v1574_v56 = vld [vmem:[%s3509_s7 + $0xe8] sm:$0xff]  ;;  %v1548_v40 = vld [vmem:[%s3509_s7 + $0x18] sm:$0xff] }
 0x724   :  { %v1559_v19 = vld [vmem:[%s3509_s7 + $0x70] sm:$0xff]  ;;  %1996 = vmatprep.subr.mxu0 %v1575_v4  ;;  %v1558_v20 = vld [vmem:[%s3509_s7 + $0x68] sm:$0xff] }
 0x725   :  { %1405 = vadd.xlane.f32.xlu0 %v3187_v14  ;;  %v1414_v53 = vmul.f32 %v3187_v14, %v3187_v14  ;;  %v1449_v60 = vmul.f32 %v3189_v37, %v3189_v37  ;;  %v1484_v8 = vmul.f32 %v3191_v11, %v3191_v11  ;;  %v1519_v9 = vmul.f32 %v3193_v50, %v3193_v50  ;;  %v1563_v3 = vld [vmem:[%s3509_s7 + $0x90] sm:$0xff] }
 0x726   :  { %1997 = vmatpush3.msra.mxu0 %v1559_v19 }
 0x727   :  { %1415 = vadd.xlane.f32.xlu1 %v1414_v53  ;;  %1998 = vmatprep.subr.mxu0 %v1574_v56 }
 0x728   :  { %1999 = vmatpush3.msra.mxu0 %v1558_v20 }
 0x729   :  { %1440 = vadd.xlane.f32.xlu0 %v3189_v37  ;;  %2000 = vmatprep.subr.mxu0 %v1573_v21 }
 0x72a   :  { %2001 = vmatpush3.msra.mxu0 %v1557_v27  ;;  %v1608_v27 = vld [vmem:[%s3509_s7 + $0x1f8] sm:$0xff] }
 0x72b   :  { %1475 = vadd.xlane.f32.xlu1 %v3191_v11  ;;  %2002 = vmatprep.subr.mxu0 %v1572_v43  ;;  %v1592_v43 = vld [vmem:[%s3509_s7 + $0x178] sm:$0xff] }
 0x72c   :  { %2003 = vmatpush3.msra.mxu0 %v1556_v38  ;;  %v1607_v38 = vld [vmem:[%s3509_s7 + $0x1f0] sm:$0xff]  ;;  %2029 = vmatprep.subr.mxu1 %v1608_v27 }
 0x72d   :  { %1450 = vadd.xlane.f32.xlu0 %v1449_v60  ;;  %2004 = vmatprep.subr.mxu0 %v1571_v22  ;;  %v1547_v60 = vld [vmem:[%s3509_s7 + $0x10] sm:$0xff] }
 0x72e   :  { %2005 = vmatpush3.msra.mxu0 %v1555_v41  ;;  %v1591_v22 = vld [vmem:[%s3509_s7 + $0x170] sm:$0xff]  ;;  %2030 = vmatpush3.msra.mxu1 %v1592_v43  ;;  %v1606_v41 = vld [vmem:[%s3509_s7 + $0x1e8] sm:$0xff] }
 0x72f   :  { %1510 = vadd.xlane.f32.xlu1 %v3193_v50  ;;  %2006 = vmatprep.subr.mxu0 %v1570_v26  ;;  %v1590_v26 = vld [vmem:[%s3509_s7 + $0x168] sm:$0xff] }
 0x730   :  { %2007 = vmatpush3.msra.mxu0 %v1554_v55  ;;  %2031 = vmatprep.subr.mxu1 %v1607_v38  ;;  %v1605_v55 = vld [vmem:[%s3509_s7 + $0x1e0] sm:$0xff] }
 0x731   :  { %1485 = vadd.xlane.f32.xlu0 %v1484_v8  ;;  %2008 = vmatprep.subr.mxu0 %v1569_v28  ;;  %v1562_v8 = vld [vmem:[%s3509_s7 + $0x88] sm:$0xff]  ;;  %v1589_v28 = vld [vmem:[%s3509_s7 + $0x160] sm:$0xff] }
 0x732   :  { %2009 = vmatpush3.msra.mxu0 %v1553_v31  ;;  %2032 = vmatpush3.msra.mxu1 %v1591_v22  ;;  %v1604_v31 = vld [vmem:[%s3509_s7 + $0x1d8] sm:$0xff] }
 0x733   :  { %2010 = vmatprep.subr.mxu0 %v1568_v32  ;;  %2033 = vmatprep.subr.mxu1 %v1606_v41  ;;  %v1588_v32 = vld [vmem:[%s3509_s7 + $0x158] sm:$0xff] }
 0x734   :  { %2011 = vmatpush3.msra.mxu0 %v1552_v35  ;;  %2034 = vmatpush3.msra.mxu1 %v1590_v26  ;;  %v1603_v35 = vld [vmem:[%s3509_s7 + $0x1d0] sm:$0xff] }
 0x735   :  { %1520 = vadd.xlane.f32.xlu0 %v1519_v9  ;;  %2012 = vmatprep.subr.mxu0 %v1567_v1  ;;  %v1546_v9 = vld [vmem:[%s3509_s7 + $0x8] sm:$0xff]  ;;  %v1587_v1 = vld [vmem:[%s3509_s7 + $0x150] sm:$0xff] }
 0x736   :  { %2013 = vmatpush3.msra.mxu0 %v1551_v39  ;;  %2035 = vmatprep.subr.mxu1 %v1605_v55  ;;  %v1602_v39 = vld [vmem:[%s3509_s7 + $0x1c8] sm:$0xff] }
 0x737   :  { %2014 = vmatprep.subr.mxu0 %v1566_v58  ;;  %2036 = vmatpush3.msra.mxu1 %v1589_v28  ;;  %v1586_v58 = vld [vmem:[%s3509_s7 + $0x148] sm:$0xff] }
 0x738   :  { %2015 = vmatpush3.msra.mxu0 %v1550_v23  ;;  %2037 = vmatprep.subr.mxu1 %v1604_v31  ;;  %v1601_v23 = vld [vmem:[%s3509_s7 + $0x1c0] sm:$0xff] }
 0x739   :  { %2016 = vmatprep.subr.mxu0 %v1565_v44  ;;  %2038 = vmatpush3.msra.mxu1 %v1588_v32  ;;  %v1585_v44 = vld [vmem:[%s3509_s7 + $0x140] sm:$0xff] }
 0x73a   :  { %2017 = vmatpush3.msra.mxu0 %v1549_v52  ;;  %2039 = vmatprep.subr.mxu1 %v1603_v35  ;;  %v1600_v52 = vld [vmem:[%s3509_s7 + $0x1b8] sm:$0xff] }
 0x73b   :  { %2018 = vmatprep.subr.mxu0 %v1564_v12  ;;  %2040 = vmatpush3.msra.mxu1 %v1587_v1 }
 0x73c   :  { %2019 = vmatpush3.msra.mxu0 %v1548_v40  ;;  %2041 = vmatprep.subr.mxu1 %v1602_v39 }
 0x73d   :  { %2020 = vmatprep.subr.mxu0 %v1563_v3  ;;  %2042 = vmatpush3.msra.mxu1 %v1586_v58 }
 0x73e   :  { %2021 = vmatpush3.msra.mxu0 %v1547_v60  ;;  %2043 = vmatprep.subr.mxu1 %v1601_v23 }
 0x73f   :  { %2022 = vmatprep.subr.mxu0 %v1562_v8  ;;  %2044 = vmatpush3.msra.mxu1 %v1585_v44 }
 0x740   :  { %2023 = vmatpush3.msra.mxu0 %v1546_v9  ;;  %2045 = vmatprep.subr.mxu1 %v1600_v52 }
 0x7ae   :  { %v1406_v15 = vpop.xlane.xlu0 %1405 }
 0x7af   :  { %v1407_v34 = vrot.slane %v1406_v15, 4 }
 0x7b0   :  { %v1416_v24 = vpop.xlane.xlu1 %1415 }
 0x7b1   :  { %v1408_v46 = vadd.f32 %v1407_v34, %v1406_v15  ;;  %v1417_v61 = vrot.slane %v1416_v24, 4  ;;  %v1561_v15 = vld [vmem:[%s3509_s7 + $0x80] sm:$0xff] }
 0x7b2   :  { %v1441_v10 = vpop.xlane.xlu0 %1440  ;;  %2024 = vmatprep.subr.mxu0 %v1561_v15  ;;  %v1545_v34 = vld [vmem:[%s3509_s7] sm:$0xff] }
 0x7b3   :  { %v1409_v25 = vrot.slane %v1408_v46, 2  ;;  %v1418_v29 = vadd.f32 %v1417_v61, %v1416_v24  ;;  %v1442_v0 = vrot.slane %v1441_v10, 4  ;;  %2025 = vmatpush3.msra.mxu0 %v1545_v34 }
 0x7b5   :  { %v1419_v30 = vrot.slane %v1418_v29, 2  ;;  %v1410_v36 = vadd.f32 %v1409_v25, %v1408_v46  ;;  %v1443_v17 = vadd.f32 %v1442_v0, %v1441_v10  ;;  %v1476_v25 = vpop.xlane.xlu1 %1475  ;;  %v1584_v10 = vld [vmem:[%s3509_s7 + $0x138] sm:$0xff]  ;;  %v1583_v0 = vld [vmem:[%s3509_s7 + $0x130] sm:$0xff] }
 0x7b6   :  { %v1451_v13 = vpop.xlane.xlu0 %1450  ;;  %2046 = vmatpush3.msra.mxu1 %v1584_v10 }
 0x7b7   :  { %v1411_v49 = vrot.slane %v1410_v36, 1  ;;  %v1420_v51 = vadd.f32 %v1419_v30, %v1418_v29  ;;  %v1452_v54 = vrot.slane %v1451_v13, 4  ;;  %v1444_v45 = vrot.slane %v1443_v17, 2 }
 0x7b9   :  { %v1412_v33 = vadd.f32 %v1411_v49, %v1410_v36  ;;  %v1421_v42 = vrot.slane %v1420_v51, 1  ;;  %v1453_v7 = vadd.f32 %v1452_v54, %v1451_v13  ;;  %v1445_v63 = vadd.f32 %v1444_v45, %v1443_v17  ;;  %v1599_v13 = vld [vmem:[%s3509_s7 + $0x1b0] sm:$0xff]  ;;  %v1598_v54 = vld [vmem:[%s3509_s7 + $0x1a8] sm:$0xff] }
 0x7ba   :  { %v1486_v30 = vpop.xlane.xlu0 %1485  ;;  %v1477_v36 = vrot.slane %v1476_v25, 4  ;;  %2047 = vmatprep.subr.mxu1 %v1599_v13  ;;  %v1582_v17 = vld [vmem:[%s3509_s7 + $0x128] sm:$0xff] }
 0x7bb   :  { %2136 = vpush %v1412_v33  ;;  %v1422_v16 = vadd.f32 %v1421_v42, %v1420_v51  ;;  %v1454_v59 = vrot.slane %v1453_v7, 2  ;;  %v1446_v5 = vrot.slane %v1445_v63, 1  ;;  %v1487_v49 = vrot.slane %v1486_v30, 4  ;;  %2048 = vmatpush3.msra.mxu1 %v1583_v0 }
 0x7bc   :  { %2049 = vmatprep.subr.mxu1 %v1598_v54 }
 0x7bd   :  { %2138 = vpush %v1422_v16  ;;  %v1455_v57 = vadd.f32 %v1454_v59, %v1453_v7  ;;  %v1447_v48 = vadd.f32 %v1446_v5, %v1445_v63  ;;  %v1488_v51 = vadd.f32 %v1487_v49, %v1486_v30  ;;  %v1597_v7 = vld [vmem:[%s3509_s7 + $0x1a0] sm:$0xff]  ;;  %2050 = vmatpush3.msra.mxu1 %v1582_v17  ;;  %v1595_v30 = vld [vmem:[%s3509_s7 + $0x190] sm:$0xff]  ;;  %v1594_v49 = vld [vmem:[%s3509_s7 + $0x188] sm:$0xff] }
 0x7be   :  { %2051 = vmatprep.subr.mxu1 %v1597_v7 }
 0x7bf   :  { %v1456_v47 = vrot.slane %v1455_v57, 1  ;;  %v1489_v16 = vrot.slane %v1488_v51, 2 }
 0x7c1   :  { %v1457_v53 = vadd.f32 %v1456_v47, %v1455_v57  ;;  %v1490_v6 = vadd.f32 %v1489_v16, %v1488_v51  ;;  %v1511_v57 = vpop.xlane.xlu1 %1510  ;;  %v1521_v47 = vpop.xlane.xlu0 %1520  ;;  %v1593_v16 = vld [vmem:[%s3509_s7 + $0x180] sm:$0xff] }
 0x7c3   :  { %v1491_v19 = vrot.slane %v1490_v6, 1 }
 0x7c5   :  { %v1492_v21 = vadd.f32 %v1491_v19, %v1490_v6 }
 0x7ec   :  { %s2137_s10 = spop %2136 }
 0x7ed   :  { %s3279_s30 = smul.f32 0.0009765625, %s2137_s10 }
 0x7ee   :  { %s2139_s2 = spop %2138 }
 0x7ef   :  { %s1426_s16 = smul.f32 %s3279_s30, %s3279_s30  ;;  %v1429_v24 = vstv %s3279_s30 }
 0x7f0   :  { %s1425_s14 = smul.f32 0.0009765625, %s2139_s2  ;;  %v1430_v46 = vsub.f32 %v3187_v14, %v1429_v24  ;;  %v1478_v14 = vadd.f32 %v1477_v36, %v1476_v25  ;;  %v1596_v25 = vld [vmem:[%s3509_s7 + $0x198] sm:$0xff]  ;;  %v1579_v36 = vld [vmem:[%s3509_s7 + $0x110] sm:$0xff] }
 0x7f2   :  { %s1427_s15 = ssub.f32 %s1425_s14, %s1426_s16  ;;  %v1479_v42 = vrot.slane %v1478_v14, 2 }
 0x7f4   :  { %s1428_s17 = smax.f32 %s3508_s0, %s1427_s15  ;;  %v1480_v18 = vadd.f32 %v1479_v42, %v1478_v14 }
 0x7f5   :  { %s1431_s18 = sadd.f32 1e-05, %s1428_s17 }
 0x7f6   :  { %v1481_v4 = vrot.slane %v1480_v18, 1 }
 0x7f7   :  { %v1432_v2 = vstv %s1431_s18 }
 0x7f8   :  { %2200 = vrsqrt.f32 %v1432_v2  ;;  %v1482_v20 = vadd.f32 %v1481_v4, %v1480_v18  ;;  %v1581_v2 = vld [vmem:[%s3509_s7 + $0x120] sm:$0xff] }
 0x7f9   :  { %2052 = vmatpush3.msra.mxu1 %v1581_v2  ;;  %v1577_v18 = vld [vmem:[%s3509_s7 + $0x100] sm:$0xff] }
 0x7fa   :  { %2053 = vmatprep.subr.mxu1 %v1596_v25 }
 0x805   :  { %v2201_v62 = vpop.eup %2200 }
 0x806   :  { %2140 = vpush %v2201_v62  ;;  %v1522_v62 = vrot.slane %v1521_v47, 4 }
 0x807   :  { %2142 = vpush %v1447_v48 }
 0x808   :  { %2144 = vpush %v1457_v53  ;;  %v1523_v60 = vadd.f32 %v1522_v62, %v1521_v47 }
 0x80a   :  { %v1524_v15 = vrot.slane %v1523_v60, 2 }
 0x80c   :  { %v1525_v24 = vadd.f32 %v1524_v15, %v1523_v60 }
 0x837   :  { %s2141_s12 = spop %2140 }
 0x838   :  { %v1435_v61 = vstv %s2141_s12  ;;  %s2143_s20 = spop %2142 }
 0x839   :  { %v3310_v29 = vmul.f32 %v1435_v61, %v1430_v46  ;;  %s3312_s21 = smul.f32 0.0009765625, %s2143_s20  ;;  %s2145_s28 = spop %2144  ;;  %v1526_v61 = vrot.slane %v1525_v24, 1 }
 0x83a   :  { %s1460_s29 = smul.f32 0.0009765625, %s2145_s28 }
 0x83b   :  { %s1461_s10 = smul.f32 %s3312_s21, %s3312_s21  ;;  %v1464_v45 = vstv %s3312_s21  ;;  %v1438_v12 = vmul.f32 0.01, %v3310_v29  ;;  %vm1437_vm15 = vcmp.gt.f32.partialorder %v3310_v29, 0.0  ;;  %v1527_v42 = vadd.f32 %v1526_v61, %v1525_v24 }
 0x83c   :  { %v1465_v59 = vsub.f32 %v3189_v37, %v1464_v45  ;;  %v1512_v37 = vrot.slane %v1511_v57, 4 }
 0x83d   :  { %s1462_s16 = ssub.f32 %s1460_s29, %s1461_s10  ;;  %v1439_v3 = vsel %vm1437_vm15, %v3310_v29, %v1438_v12  ;;  %v1580_v29 = vld [vmem:[%s3509_s7 + $0x118] sm:$0xff] }
 0x83e   :  { %v1513_v53 = vadd.f32 %v1512_v37, %v1511_v57  ;;  %2054 = vmatpush3.msra.mxu1 %v1580_v29 }
 0x83f   :  { %s1463_s30 = smax.f32 %s3508_s0, %s1462_s16  ;;  %2055 = vmatprep.subr.mxu1 %v1595_v30 }
 0x840   :  { %s1466_s2 = sadd.f32 1e-05, %s1463_s30  ;;  %v1514_v9 = vrot.slane %v1513_v53, 2  ;;  %2056 = vmatpush3.msra.mxu1 %v1579_v36 }
 0x841   :  { %2057 = vmatprep.subr.mxu1 %v1594_v49 }
 0x842   :  { %v1467_v33 = vstv %s1466_s2  ;;  %v1515_v34 = vadd.f32 %v1514_v9, %v1513_v53 }
 0x843   :  { %2202 = vrsqrt.f32 %v1467_v33  ;;  %v1578_v33 = vld [vmem:[%s3509_s7 + $0x108] sm:$0xff] }
 0x844   :  { %v1516_v46 = vrot.slane %v1515_v34, 1  ;;  %2058 = vmatpush3.msra.mxu1 %v1578_v33 }
 0x845   :  { %2059 = vmatprep.subr.mxu1 %v1593_v16 }
 0x846   :  { %v1517_v51 = vadd.f32 %v1516_v46, %v1515_v34  ;;  %2060 = vmatpush3.msra.mxu1 %v1577_v18 }
 0x850   :  { %v2203_v56 = vpop.eup %2202 }
 0x851   :  { %2146 = vpush %v2203_v56 }
 0x852   :  { %2148 = vpush %v1482_v20 }
 0x853   :  { %2150 = vpush %v1492_v21 }
 0x882   :  { %s2147_s12 = spop %2146 }
 0x883   :  { %v1470_v63 = vstv %s2147_s12  ;;  %s2149_s20 = spop %2148 }
 0x884   :  { %v1471_v5 = vmul.f32 %v1470_v63, %v1465_v59  ;;  %s3391_s28 = smul.f32 0.0009765625, %s2149_s20  ;;  %s2151_s29 = spop %2150 }
 0x885   :  { %s1495_s10 = smul.f32 0.0009765625, %s2151_s29 }
 0x886   :  { %s1496_s16 = smul.f32 %s3391_s28, %s3391_s28  ;;  %vm1472_vm14 = vcmp.gt.f32.partialorder %v1471_v5, 0.0  ;;  %v1473_v40 = vmul.f32 0.01, %v1471_v5  ;;  %v1499_v6 = vstv %s3391_s28 }
 0x887   :  { %v1500_v4 = vsub.f32 %v3191_v11, %v1499_v6 }
 0x888   :  { %s1497_s21 = ssub.f32 %s1495_s10, %s1496_s16  ;;  %v1474_v48 = vsel %vm1472_vm14, %v1471_v5, %v1473_v40 }
 0x889   :  { %1680 = vmatprep.mubr.f32.mxu0 %v1474_v48 }
 0x88a   :  { %s1498_s30 = smax.f32 %s3508_s0, %s1497_s21  ;;  %1681 = vmatmul.mubr.f32.vlgmr.msra.gmra.mxu0 %v1439_v3 }
 0x88b   :  { %s1501_s2 = sadd.f32 1e-05, %s1498_s30 }
 0x88d   :  { %v1502_v8 = vstv %s1501_s2 }
 0x88e   :  { %2204 = vrsqrt.f32 %v1502_v8 }
 0x89b   :  { %v2205_v14 = vpop.eup %2204 }
 0x89c   :  { %2152 = vpush %v2205_v14 }
 0x89d   :  { %2154 = vpush %v1517_v51 }
 0x89e   :  { %2156 = vpush %v1527_v42 }
 0x8cd   :  { %s2153_s23 = spop %2152 }
 0x8ce   :  { %v1505_v19 = vstv %s2153_s23  ;;  %s2155_s11 = spop %2154 }
 0x8cf   :  { %v1506_v56 = vmul.f32 %v1505_v19, %v1500_v4  ;;  %s1529_s13 = smul.f32 0.0009765625, %s2155_s11  ;;  %s2157_s3 = spop %2156 }
 0x8d0   :  { %s1530_s12 = smul.f32 0.0009765625, %s2157_s3 }
 0x8d1   :  { %s1531_s20 = smul.f32 %s1529_s13, %s1529_s13  ;;  %v1534_v27 = vstv %s1529_s13  ;;  %v1508_v22 = vmul.f32 0.01, %v1506_v56  ;;  %vm1507_vm1 = vcmp.gt.f32.partialorder %v1506_v56, 0.0 }
 0x8d2   :  { %v1535_v43 = vsub.f32 %v3193_v50, %v1534_v27 }
 0x8d3   :  { %s1532_s29 = ssub.f32 %s1530_s12, %s1531_s20  ;;  %v1509_v55 = vsel %vm1507_vm1, %v1506_v56, %v1508_v22 }
 0x8d5   :  { %s1533_s10 = smax.f32 %s3508_s0, %s1532_s29  ;;  %s2299_s0 = smov [#allocation9]  }
 0x8d6   :  { %s1536_s16 = sadd.f32 1e-05, %s1533_s10  ;;  %s1777_s28 = sshll.u32 %s2299_s0, 4  ;;  %s1778_s28 = int_to_ptr.vmem [resolvable:$true] %s1777_s28 }
 0x8d7   :  { %s2245_s21 = scalar_lea.vmem %s1778_s28, 128  ;;  %p2250_p2 = scmp.lt.s32.totalorder %s1778_s28, %s1778_s28 }
 0x8d8   :  { %v1537_v20 = vstv %s1536_s16  ;;  %p2246_p1 = scmp.ne.s32.totalorder %s1778_s28, %s2245_s21  ;;  %p2251_p3 = scmp.lt.s32.totalorder %s2245_s21, %s2245_s21 }
 0x8d9   :  { %2206 = vrsqrt.f32 %v1537_v20 }
 0x8da   :  { %p2252_p4 = por %p2251_p3, %p2250_p2 }
 0x8dc   :  { %p2253_p5 = pnand %p2252_p4, %p2246_p1 }
 0x8e6   :  { %v2207_v21 = vpop.eup %2206 }
 0x8e7   :  { %2158 = vpush %v2207_v21 }
 0x918   :  { %s2159_s7 = spop %2158 }
 0x919   :  { %v1540_v11 = vstv %s2159_s7 }
 0x91a   :  { %v1541_v38 = vmul.f32 %v1540_v11, %v1535_v43 }
 0x91c   :  { %vm1542_vm0 = vcmp.gt.f32.partialorder %v1541_v38, 0.0  ;;  %v1543_v41 = vmul.f32 0.01, %v1541_v38 }
 0x91e   :  { %v1544_v26 = vsel %vm1542_vm0, %v1541_v38, %v1543_v41 }
 0x91f   :  { %1750 = vmatprep.mubr.f32.mxu1 %v1544_v26 }
 0x920   :  { %1751 = vmatmul.mubr.f32.vlgmr.msra.gmra.mxu1 %v1509_v55 }
 0x921   :  { %2256 = shalt.err (!%p2253_p5)
}
 0x922   :  { %s3510_s14 = sld [smem:[#allocation36_spill]]  ;;  %v3512_v1 = vld [vmem:[#allocation15_spill] sm:$0xff]  ;;  %s2300_s22 = smov [#allocation8]  }
 0x923   :  { %s3511_s18 = sld [smem:[#allocation34_spill]]  ;;  %v1757_v39 = vsub.f32 1.0, %v3512_v1  ;;  %s1767_s24 = sshll.u32 %s2300_s22, 4  ;;  %s1768_s24 = int_to_ptr.vmem [resolvable:$true] %s1767_s24 }
 0x924   :  { %s3513_s4 = sld [smem:[#allocation32_spill]]  ;;  %s2265_s25 = scalar_lea.vmem %s1768_s24, 128 }
 0x925   :  { %p2266_p6 = scmp.ne.s32.totalorder %s1768_s24, %s2265_s25  ;;  %p2270_p7 = scmp.lt.s32.totalorder %s1768_s24, %s1768_s24 }
 0x926   :  { %p2271_p8 = scmp.lt.s32.totalorder %s2265_s25, %s2265_s25 }
 0x928   :  { %1780 = dma.vmem_to_hbm [thread:$0]  %s1778_s28, 128, %s3510_s14, [#allocation10]  }
 0x929   :  { %v1993_v32 = vld [vmem:[%s3511_s18] ss:$0 sm:$0xff]  ;;  %p2272_p9 = por %p2271_p8, %p2270_p7 }
 0x92a   :  { %v2208_v10 = vld [vmem:[%s3513_s4] sm:$0xff] }
 0x92b   :  { %v1758_v13 = vmul.f32 %v2208_v10, %v1757_v39  ;;  %p2273_p10 = pnand %p2272_p9, %p2266_p6 }
 0x94a   :  { %v2026_v50 = vpop.f32.mrf.mxu0 }
 0x94c   :  { %v2027_v28 = vpop.f32.mrf.mxu0 }
 0x94d   :  { %v2028_v31 = vadd.f32 %v2027_v28, %v2026_v50 }
 0x94f   :  { %v1683_v23 = vadd.f32 %v2028_v31, %v1993_v32 }
 0x9e0   :  { %v2061_v35 = vpop.f32.mrf.mxu1 }
 0x9e2   :  { %v2062_v58 = vpop.f32.mrf.mxu1 }
 0x9e3   :  { %v2063_v44 = vadd.f32 %v2062_v58, %v2061_v35 }
 0x9e5   :  { %v1753_v52 = vadd.f32 %v2063_v44, %v1683_v23 }
 0x9e7   :  { %v1756_v0 = vmul.f32 %v1753_v52, %v3512_v1 }
 0x9e9   :  { %v1759_v54 = vadd.f32 %v1758_v13, %v1756_v0 }
 0x9eb   :  { %1760 = vst [vmem:[#allocation8] sm:$0xff] %v1759_v54 }
 0x9ec   :  { %2276 = shalt.err (!%p2273_p10)
}
 0x9ed   :  { %s3514_s27 = sld [smem:[#allocation35_spill]] }
 0x9f3   :  { %1770 = dma.vmem_to_hbm [thread:$0]  %s1768_s24, 128, %s3514_s27, [#allocation3]  }
 0x9f4   :  { %2289 = dma.done.wait [#allocation3], 128  }
 0x9f5   :  { %2290 = vsyncadd [#allocation3], 4294967168 }
 0x9f6   :  { %2291 = dma.done.wait [#allocation10], 128  }
 0x9f7   :  { %2292 = vsyncadd [#allocation10], 4294967168 }
 0x9f8   :  { %1787 = vsyncpa [#allocation3], 1 }
 0x9f9   :  { %1788 = vsyncpa [#allocation10], 1 }
 0x9fa   :  { %1789 = vsyncpa [#allocation4], 1 }
 0x9fb   :  { %1790 = vsyncpa [#allocation6], 1 }

</bundles_post_ra>
